<compile_context>
chip_gen: v7x
topology: tpu7x:2x2x1
jax: 0.10.0
libtpu: 0.0.40
codegen_flags: <defaults>
</compile_context>

<pallas_src>
import jax
import jax.numpy as jnp
from jax import lax
from jax.experimental import pallas as pl
from jax.experimental.pallas import tpu as pltpu

_BN_EPS = 1e-5


# --------------------------------------------------------------------------
# In-kernel helpers
# --------------------------------------------------------------------------
def _conv_tap_acc(src_ref, w_ref, base, n_rows):
    """(1,5) conv as 5 accumulated MXU dots.

    src_ref: (rows, 128/256-lane) bf16 activations (channels zero-padded).
    w_ref:   (5*128, cout) bf16; tap k occupies rows [128k, 128k+128).
    Returns conv rows [base, base+n_rows) as an f32 (n_rows, cout) value.
    """
    acc = None
    for k in range(5):
        lhs = src_ref[pl.ds(base + k, n_rows), :]            # (n_rows, 128) bf16
        rhs = w_ref[pl.ds(128 * k, 128), :]                  # (128, cout)   bf16
        d = jnp.dot(lhs, rhs, preferred_element_type=jnp.float32)
        acc = d if acc is None else acc + d
    return acc


def _pool_shift_relu(acc, sel_e, sel_o, shift):
    """MaxPool(1,2) via two bf16 0/1 selection dots, then folded BN/bias + ReLU.

    relu(max(a,b)+s) == max(relu(a+s), relu(b+s)), so applying shift/ReLU after
    the pool matches the PyTorch op order.  Selection rows beyond the valid
    pooled length are all-zero -> they produce relu(shift) padding rows that
    downstream consumers never read (or multiply by zero weights).
    """
    accb = acc.astype(jnp.bfloat16)
    e = jnp.dot(sel_e, accb, preferred_element_type=jnp.float32)
    o = jnp.dot(sel_o, accb, preferred_element_type=jnp.float32)
    return jnp.maximum(jnp.maximum(e, o) + shift, 0.0)


# --------------------------------------------------------------------------
# Fused kernel: conv0 -> conv1 -> conv2 -> conv3 -> classifier
# (n_per samples per grid step, looped with fori_loop; scratch reused)
# --------------------------------------------------------------------------
def _deepconvnet_kernel(xce_ref, xco_ref, w0_ref, sh0_ref, w1_ref, sh1_ref,
                        w2_ref, sh2_ref, w3_ref, sh3_ref,
                        se64_ref, so64_ref, se96_ref, so96_ref,
                        se48_ref, so48_ref, wfc0_ref, wfc1_ref, bfc_ref,
                        o_ref, s0_ref, s1_ref, s2_ref):
    f32 = jnp.float32
    n_per = o_ref.shape[0]

    # s0 rows 384..399 are read by conv1's tap reads (up to row 387) but never
    # written by conv0; zero just that tail (everything else is write-before-read).
    s0_ref[pl.ds(384, 16), :] = jnp.zeros((16, 128), s0_ref.dtype)

    # Lane masks for assembling the 2-logit output row (hoisted out of the loop).
    lane = lax.broadcasted_iota(jnp.int32, (1, 128), 1)
    mask0 = (lane == 0).astype(f32)
    mask1 = (lane == 1).astype(f32)

    def sample_body(s, carry):
        x0 = pl.multiple_of(s * 384, 128)

        # ---- conv0: folded Conv(1,5)+Conv(2,1)+bias+BN.  Even/odd conv columns
        # come pre-split from the wrapper, so MaxPool(1,2) is an elementwise max
        # (no pooling matmuls).  3 chunks x 128 pooled rows; valid rows 0..372,
        # rows 373..383 are finite relu(shift0) padding never used downstream.
        w0 = w0_ref[...]                                     # (10, 128) bf16
        sh0 = sh0_ref[...]                                   # (1, 128)  f32
        for c in range(3):
            off = pl.multiple_of(x0 + 128 * c, 128)
            acc_e = jnp.dot(xce_ref[pl.ds(off, 128), :], w0,
                            preferred_element_type=f32)      # (128, 128) f32
            acc_o = jnp.dot(xco_ref[pl.ds(off, 128), :], w0,
                            preferred_element_type=f32)
            pooled = jnp.maximum(jnp.maximum(acc_e, acc_o) + sh0, 0.0)
            s0_ref[pl.ds(128 * c, 128), :] = pooled.astype(s0_ref.dtype)

        # ---- conv1: Cin 25 -> Cout 50 (lane padded to 128).  3 chunks x 64
        # pooled rows; valid pooled rows 0..183 (rows 184..191 are padding).
        sh1 = sh1_ref[...]
        se64 = se64_ref[...]
        so64 = so64_ref[...]
        for c in range(3):
            acc = _conv_tap_acc(s0_ref, w1_ref, 128 * c, 128)   # (128, 128) f32
            pooled = _pool_shift_relu(acc, se64, so64, sh1)     # (64, 128)
            s1_ref[pl.ds(64 * c, 64), :] = pooled.astype(s1_ref.dtype)

        # ---- conv2: 184 -> 180 conv rows -> 90 pooled rows (selector rows
        # 90..95 are zero padding; s2 rows 90..95 never read by conv3).
        acc = _conv_tap_acc(s1_ref, w2_ref, 0, 180)             # (180, 128) f32
        pooled = _pool_shift_relu(acc, se96_ref[...], so96_ref[...],
                                  sh2_ref[...])                 # (96, 128)
        s2_ref[...] = pooled.astype(s2_ref.dtype)

        # ---- conv3: 90 -> 86 conv rows -> 43 pooled rows (rows 43..47 padding),
        # kept as an f32 value feeding the classifier directly.
        acc = _conv_tap_acc(s2_ref, w3_ref, 0, 86)              # (86, 256) f32
        act = _pool_shift_relu(acc, se48_ref[...], so48_ref[...],
                               sh3_ref[...])                    # (48, 256) f32

        # ---- classifier: Linear(200*43 -> 2).  The channel-major flatten is
        # folded into wfc{0,1} (shape (48, 256), W-major); padded rows 43..47
        # and lanes 200..255 of wfc are zero, so padding rows contribute 0.
        r0 = jnp.sum(act * wfc0_ref[...], axis=0, keepdims=True)   # (1, 256)
        r1 = jnp.sum(act * wfc1_ref[...], axis=0, keepdims=True)
        t0 = jnp.sum(r0, axis=1, keepdims=True)                    # (1, 1)
        t1 = jnp.sum(r1, axis=1, keepdims=True)
        row = t0 * mask0 + t1 * mask1 + bfc_ref[...]               # (1, 128)
        o_ref[pl.ds(s, 1), :] = row
        return carry

    lax.fori_loop(0, n_per, sample_body, 0)


# --------------------------------------------------------------------------
# Wrapper-side parameter folding / layout prep (cheap, done once per forward)
# --------------------------------------------------------------------------
def _prepare_inference_params(p):
    f32, bf16 = jnp.float32, jnp.bfloat16

    # conv0: fold Conv(1,5)+bias -> Conv(2,1)+bias -> BN(scale, shift) into a
    # single (10, 25) weight (rows indexed by r*5+k) and one shift vector.
    wa = p['wa0'][:, 0, :].astype(f32)                           # (5, 25)
    wcomb = jnp.einsum('kc,rco->rko', wa, p['wb0'])              # (2, 5, 25)
    bcomb = p['ba0'] @ (p['wb0'][0] + p['wb0'][1]) + p['bb0']    # (1, 25)
    w0 = wcomb.reshape(10, 25) * p['scale0']                     # BN scale folded
    sh0 = bcomb * p['scale0'] + p['shift0']                      # biases + BN shift
    w0p = jnp.zeros((10, 128), f32).at[:, :25].set(w0).astype(bf16)
    sh0p = jnp.zeros((1, 128), f32).at[:, :25].set(sh0)

    def conv_block_params(w, b, scale, shift, cin, cout, cout_pad):
        wf = w * scale.reshape(1, 1, cout)                       # fold BN scale
        wp = jnp.zeros((5, 128, cout_pad), f32).at[:, :cin, :cout].set(wf)
        shp = jnp.zeros((1, cout_pad), f32).at[:, :cout].set(b * scale + shift)
        return wp.reshape(5 * 128, cout_pad).astype(bf16), shp

    w1p, sh1p = conv_block_params(p['w1'], p['b1'], p['scale1'], p['shift1'], 25, 50, 128)
    w2p, sh2p = conv_block_params(p['w2'], p['b2'], p['scale2'], p['shift2'], 50, 100, 128)
    w3p, sh3p = conv_block_params(p['w3'], p['b3'], p['scale3'], p['shift3'], 100, 200, 256)

    # Classifier: PyTorch flattens (B, 200, 1, 43) channel-major (idx = c*43+w);
    # fold that permutation into the weight so the kernel needs no transpose.
    # Pad to 48 rows / 256 lanes with zeros so the kernel's padding rows vanish.
    wfc = p['wfc'].reshape(200, 43, 2)                           # [c, w, o]
    wfc = jnp.transpose(wfc, (1, 0, 2))                          # (43, 200, 2)
    wfc_p = jnp.zeros((48, 256, 2), f32).at[:43, :200, :].set(wfc)
    bfc_row = jnp.zeros((1, 128), f32).at[0, :2].set(p['bfc'][0])

    return (w0p, sh0p, w1p, sh1p, w2p, sh2p, w3p, sh3p,
            wfc_p[:, :, 0], wfc_p[:, :, 1], bfc_row)


def _make_pool_selectors():
    """Precomputed bf16 0/1 even/odd row selectors (conv1/conv2/conv3 pools)."""
    def sel(m, n):
        r = jnp.arange(m, dtype=jnp.int32)[:, None]
        c = jnp.arange(n, dtype=jnp.int32)[None, :]
        e = (c == 2 * r).astype(jnp.bfloat16)
        o = (c == 2 * r + 1).astype(jnp.bfloat16)
        return e, o
    se64, so64 = sel(64, 128)     # conv1 chunks: 128 conv rows -> 64 pooled
    se96, so96 = sel(96, 180)     # conv2: 180 conv rows -> 90 pooled (+6 pad)
    se48, so48 = sel(48, 86)      # conv3: 86 conv rows -> 43 pooled (+5 pad)
    return se64, so64, se96, so96, se48, so48


def _build_conv0_im2col_eo(x):
    """(B,1,2,750) NCHW -> even/odd (B, 384, 10) bf16 im2col slabs.

    Column j = r*5 + k holds x[b, 0, r, w + k]; even slab has conv columns
    w = 0,2,...,744 and odd slab w = 1,3,...,745, so conv0's MaxPool(1,2) is an
    elementwise max of the two conv results.  Rows 373..383 are zero padding.
    """
    x2 = x[:, 0].astype(jnp.float32)                             # (B, 2, 750)
    cols = [x2[:, r, k:k + 746] for r in (0, 1) for k in range(5)]
    xc = jnp.stack(cols, axis=-1)                                # (B, 746, 10)
    xe = xc[:, 0::2, :]                                          # (B, 373, 10)
    xo = xc[:, 1::2, :]
    pad = 384 - 373
    xe = jnp.pad(xe, ((0, 0), (0, pad), (0, 0)))
    xo = jnp.pad(xo, ((0, 0), (0, pad), (0, 0)))
    return xe.astype(jnp.bfloat16), xo.astype(jnp.bfloat16)


def deepconvnet_forward(x, params):
    """x: (B, 1, 2, 750) float32, NCHW (as in the PyTorch module)."""
    B = x.shape[0]
    # Samples per grid step (amortize per-step overhead); keep grid >= 2 so the
    # "parallel" grid axis can still shard across TensorCores.
    if B >= 16:
        n_per = 8
    elif B >= 4:
        n_per = 2
    else:
        n_per = 1
    n_grid = -(-B // n_per)
    Bp = n_grid * n_per

    xe, xo = _build_conv0_im2col_eo(x)                           # (B, 384, 10)
    if Bp != B:
        xe = jnp.pad(xe, ((0, Bp - B), (0, 0), (0, 0)))
        xo = jnp.pad(xo, ((0, Bp - B), (0, 0), (0, 0)))
    xe = xe.reshape(n_grid, n_per * 384, 10)
    xo = xo.reshape(n_grid, n_per * 384, 10)

    (w0p, sh0p, w1p, sh1p, w2p, sh2p, w3p, sh3p,
     wfc0, wfc1, bfcr) = _prepare_inference_params(params)
    se64, so64, se96, so96, se48, so48 = _make_pool_selectors()
    consts = (w0p, sh0p, w1p, sh1p, w2p, sh2p, w3p, sh3p,
              se64, so64, se96, so96, se48, so48, wfc0, wfc1, bfcr)

    x_spec = pl.BlockSpec((None, n_per * 384, 10), lambda g: (g, 0, 0))
    in_specs = ([x_spec, x_spec]
                + [pl.BlockSpec(a.shape, lambda g: (0, 0)) for a in consts])

    out = pl.pallas_call(
        _deepconvnet_kernel,
        out_shape=jax.ShapeDtypeStruct((n_grid, n_per, 128), jnp.float32),
        grid=(n_grid,),
        in_specs=in_specs,
        out_specs=pl.BlockSpec((None, n_per, 128), lambda g: (g, 0, 0)),
        scratch_shapes=[
            pltpu.VMEM((400, 128), jnp.bfloat16),   # conv0 out (373 valid rows)
            pltpu.VMEM((192, 128), jnp.bfloat16),   # conv1 out (184 valid rows)
            pltpu.VMEM((96, 128), jnp.bfloat16),    # conv2 out (90 valid rows)
        ],
        compiler_params=pltpu.CompilerParams(
            dimension_semantics=("parallel",)),
    )(xe, xo, *consts)

    return out.reshape(Bp, 128)[:B, :2]


# --------------------------------------------------------------------------
# Pure-JAX reference (eval-mode DeepConvNet) for a correctness cross-check
# --------------------------------------------------------------------------
def _reference_forward(x, p):
    x2 = x[:, 0].astype(jnp.float32)                             # (B, 2, 750)
    wa = p['wa0'][:, 0, :]                                       # (5, 25)
    ya = sum(x2[:, :, k:k + 746, None] * wa[k] for k in range(5)) + p['ba0']
    yb = jnp.einsum('brwc,rco->bwo', ya, p['wb0']) + p['bb0']    # (B, 746, 25)
    z = jnp.maximum(yb * p['scale0'] + p['shift0'], 0.0)
    a = jnp.maximum(z[:, 0::2, :], z[:, 1::2, :])                # (B, 373, 25)

    def block(a, w, b, scale, shift):
        wout = a.shape[1] - 4
        y = sum(jnp.einsum('bwc,co->bwo', a[:, k:k + wout], w[k])
                for k in range(5)) + b
        z = jnp.maximum(y * scale + shift, 0.0)
        m = wout // 2
        return jnp.maximum(z[:, 0:2 * m:2, :], z[:, 1:2 * m:2, :])

    a = block(a, p['w1'], p['b1'], p['scale1'], p['shift1'])     # (B, 184, 50)
    a = block(a, p['w2'], p['b2'], p['scale2'], p['shift2'])     # (B, 90, 100)
    a = block(a, p['w3'], p['b3'], p['scale3'], p['shift3'])     # (B, 43, 200)
    feat = jnp.transpose(a, (0, 2, 1)).reshape(a.shape[0], -1)   # channel-major
    return feat @ p['wfc'] + p['bfc']


# --------------------------------------------------------------------------
# Deterministic synthetic parameters (shapes from DeepConvNet.__init__)
# --------------------------------------------------------------------------
def init_params(key):
    ks = jax.random.split(key, 32)
    it = iter(ks)

    def conv_w(shape):  # (K, Cin, Cout)
        fan_in = float(shape[0] * shape[1])
        return jax.random.normal(next(it), shape, jnp.float32) / jnp.sqrt(fan_in)

    def bias(c):
        return 0.05 * jax.random.normal(next(it), (1, c), jnp.float32)

    def bn_affine(c):
        gamma = 1.0 + 0.1 * jax.random.normal(next(it), (c,), jnp.float32)
        beta = 0.1 * jax.random.normal(next(it), (c,), jnp.float32)
        mean = 0.1 * jax.random.normal(next(it), (c,), jnp.float32)
        var = 0.5 + jax.random.uniform(next(it), (c,), jnp.float32)
        scale = gamma / jnp.sqrt(var + _BN_EPS)
        shift = beta - mean * scale
        return scale.reshape(1, c), shift.reshape(1, c)

    params = {}
    params['wa0'] = conv_w((5, 1, 25))      # Conv2d(1, 25, (1, 5))
    params['ba0'] = bias(25)
    params['wb0'] = conv_w((2, 25, 25))     # Conv2d(25, 25, (2, 1))
    params['bb0'] = bias(25)
    params['scale0'], params['shift0'] = bn_affine(25)

    params['w1'] = conv_w((5, 25, 50))      # Conv2d(25, 50, (1, 5))
    params['b1'] = bias(50)
    params['scale1'], params['shift1'] = bn_affine(50)

    params['w2'] = conv_w((5, 50, 100))     # Conv2d(50, 100, (1, 5))
    params['b2'] = bias(100)
    params['scale2'], params['shift2'] = bn_affine(100)

    params['w3'] = conv_w((5, 100, 200))    # Conv2d(100, 200, (1, 5))
    params['b3'] = bias(200)
    params['scale3'], params['shift3'] = bn_affine(200)

    params['wfc'] = (jax.random.normal(next(it), (43 * 200, 2), jnp.float32)
                     / jnp.sqrt(43.0 * 200.0))                   # Linear(8600, 2)
    params['bfc'] = bias(2)
    return params


if __name__ == "__main__":
    key = jax.random.PRNGKey(0)
    kx, kp = jax.random.split(key)
    # Small batch; W=750 is forced by the Linear(43*200, 2) classifier.
    x = jax.random.normal(kx, (4, 1, 2, 750), jnp.float32)
    params = init_params(kp)

    fwd = jax.jit(deepconvnet_forward)
    logits = fwd(x, params)
    jax.block_until_ready(logits)
    assert logits.shape == (4, 2) and logits.dtype == jnp.float32

    # Cross-check against a pure-JAX reference (tolerance covers bf16 operands).
    ref = _reference_forward(x, params)
    err = float(jnp.max(jnp.abs(logits - ref)))
    assert err < 0.1, f"kernel/reference mismatch: max abs err = {err}"
    print("KERNEL_OK")
</pallas_src>

<mosaic_0001>
module attributes {stable_mosaic.version = 11 : i64} {
  func.func @_deepconvnet_kernel(%arg0: i32, %arg1: memref<1x768x10xbf16, #tpu.memory_space<vmem>>, %arg2: memref<1x768x10xbf16, #tpu.memory_space<vmem>>, %arg3: memref<10x128xbf16, #tpu.memory_space<vmem>>, %arg4: memref<1x128xf32, #tpu.memory_space<vmem>>, %arg5: memref<640x128xbf16, #tpu.memory_space<vmem>>, %arg6: memref<1x128xf32, #tpu.memory_space<vmem>>, %arg7: memref<640x128xbf16, #tpu.memory_space<vmem>>, %arg8: memref<1x128xf32, #tpu.memory_space<vmem>>, %arg9: memref<640x256xbf16, #tpu.memory_space<vmem>>, %arg10: memref<1x256xf32, #tpu.memory_space<vmem>>, %arg11: memref<64x128xbf16, #tpu.memory_space<vmem>>, %arg12: memref<64x128xbf16, #tpu.memory_space<vmem>>, %arg13: memref<96x180xbf16, #tpu.memory_space<vmem>>, %arg14: memref<96x180xbf16, #tpu.memory_space<vmem>>, %arg15: memref<48x86xbf16, #tpu.memory_space<vmem>>, %arg16: memref<48x86xbf16, #tpu.memory_space<vmem>>, %arg17: memref<48x256xf32, #tpu.memory_space<vmem>>, %arg18: memref<48x256xf32, #tpu.memory_space<vmem>>, %arg19: memref<1x128xf32, #tpu.memory_space<vmem>>, %arg20: memref<1x2x128xf32, #tpu.memory_space<vmem>>, %arg21: memref<400x128xbf16, #tpu.memory_space<vmem>>, %arg22: memref<192x128xbf16, #tpu.memory_space<vmem>>, %arg23: memref<96x128xbf16, #tpu.memory_space<vmem>>) attributes {dimension_semantics = [#tpu.dimension_semantics<parallel>], iteration_bounds = array<i64: 2>, scalar_prefetch = 0 : i64, scratch_operands = 3 : i64, tpu.core_type = #tpu.core_type<tc>, window_params = [{transform_indices = @transform_0, window_bounds = array<i64: 1, 768, 10>}, {transform_indices = @transform_1, window_bounds = array<i64: 1, 768, 10>}, {pipeline_mode = #tpu.pipeline_mode<synchronous>, transform_indices = @transform_2, window_bounds = array<i64: 10, 128>}, {pipeline_mode = #tpu.pipeline_mode<synchronous>, transform_indices = @transform_3, window_bounds = array<i64: 1, 128>}, {pipeline_mode = #tpu.pipeline_mode<synchronous>, transform_indices = @transform_4, window_bounds = array<i64: 640, 128>}, {pipeline_mode = #tpu.pipeline_mode<synchronous>, transform_indices = @transform_5, window_bounds = array<i64: 1, 128>}, {pipeline_mode = #tpu.pipeline_mode<synchronous>, transform_indices = @transform_6, window_bounds = array<i64: 640, 128>}, {pipeline_mode = #tpu.pipeline_mode<synchronous>, transform_indices = @transform_7, window_bounds = array<i64: 1, 128>}, {pipeline_mode = #tpu.pipeline_mode<synchronous>, transform_indices = @transform_8, window_bounds = array<i64: 640, 256>}, {pipeline_mode = #tpu.pipeline_mode<synchronous>, transform_indices = @transform_9, window_bounds = array<i64: 1, 256>}, {pipeline_mode = #tpu.pipeline_mode<synchronous>, transform_indices = @transform_10, window_bounds = array<i64: 64, 128>}, {pipeline_mode = #tpu.pipeline_mode<synchronous>, transform_indices = @transform_11, window_bounds = array<i64: 64, 128>}, {pipeline_mode = #tpu.pipeline_mode<synchronous>, transform_indices = @transform_12, window_bounds = array<i64: 96, 180>}, {pipeline_mode = #tpu.pipeline_mode<synchronous>, transform_indices = @transform_13, window_bounds = array<i64: 96, 180>}, {pipeline_mode = #tpu.pipeline_mode<synchronous>, transform_indices = @transform_14, window_bounds = array<i64: 48, 86>}, {pipeline_mode = #tpu.pipeline_mode<synchronous>, transform_indices = @transform_15, window_bounds = array<i64: 48, 86>}, {pipeline_mode = #tpu.pipeline_mode<synchronous>, transform_indices = @transform_16, window_bounds = array<i64: 48, 256>}, {pipeline_mode = #tpu.pipeline_mode<synchronous>, transform_indices = @transform_17, window_bounds = array<i64: 48, 256>}, {pipeline_mode = #tpu.pipeline_mode<synchronous>, transform_indices = @transform_18, window_bounds = array<i64: 1, 128>}, {transform_indices = @transform_19, window_bounds = array<i64: 1, 2, 128>}]} {
    %cst = arith.constant 0.000000e+00 : bf16
    %0 = vector.broadcast %cst : bf16 to vector<16x128xbf16>
    %c384 = arith.constant 384 : index
    %c0 = arith.constant 0 : index
    %1 = vector.load %arg21[%c384, %c0] : memref<400x128xbf16, #tpu.memory_space<vmem>>, vector<16x128xbf16>
    tpu.vector_store %arg21[%c384, %c0], %0 {strides = array<i32>} : memref<400x128xbf16, #tpu.memory_space<vmem>>, vector<16x128xbf16>,
    %2 = tpu.iota {dimensions = array<i32: 1>} : vector<1x128xi32>
    %c0_i32 = arith.constant 0 : i32
    %3 = vector.broadcast %c0_i32 : i32 to vector<1x128xi32>
    %4 = arith.cmpi eq, %2, %3 : vector<1x128xi32>
    %5 = arith.extui %4 : vector<1x128xi1> to vector<1x128xi32>
    %6 = arith.sitofp %5 : vector<1x128xi32> to vector<1x128xf32>
    %c1_i32 = arith.constant 1 : i32
    %7 = vector.broadcast %c1_i32 : i32 to vector<1x128xi32>
    %8 = arith.cmpi eq, %2, %7 : vector<1x128xi32>
    %9 = arith.extui %8 : vector<1x128xi1> to vector<1x128xi32>
    %10 = arith.sitofp %9 : vector<1x128xi32> to vector<1x128xf32>
    %c0_i32_0 = arith.constant 0 : i32
    %c2_i32 = arith.constant 2 : i32
    %11 = arith.addi %c0_i32_0, %c2_i32 : i32
    %c1_i32_1 = arith.constant 1 : i32
    scf.for %arg24 = %c0_i32_0 to %11 step %c1_i32_1  : i32 {
      %c384_i32 = arith.constant 384 : i32
      %12 = arith.muli %arg24, %c384_i32 : i32
      %13 = tpu.assume_multiple %12, 128 : i32
      %c0_3 = arith.constant 0 : index
      %c0_4 = arith.constant 0 : index
      %14 = vector.load %arg3[%c0_3, %c0_4] : memref<10x128xbf16, #tpu.memory_space<vmem>>, vector<10x128xbf16>
      %c0_5 = arith.constant 0 : index
      %c0_6 = arith.constant 0 : index
      %15 = vector.load %arg4[%c0_5, %c0_6] : memref<1x128xf32, #tpu.memory_space<vmem>>, vector<1x128xf32>
      %c0_i32_7 = arith.constant 0 : i32
      %16 = arith.addi %13, %c0_i32_7 : i32
      %17 = tpu.assume_multiple %16, 128 : i32
      %c0_8 = arith.constant 0 : index
      %18 = arith.index_cast %17 : i32 to index
      %c0_9 = arith.constant 0 : index
      %19 = vector.load %arg1[%c0_8, %18, %c0_9] : memref<1x768x10xbf16, #tpu.memory_space<vmem>>, vector<1x128x10xbf16>
      %20 = vector.shape_cast %19 : vector<1x128x10xbf16> to vector<128x10xbf16>
      %cst_10 = arith.constant dense<0.000000e+00> : vector<128x128xf32>
      %21 = tpu.matmul %20, %14, %cst_10 {dimension_numbers = #tpu.dot_dimension_numbers<[1], [0], [0], [1], [0, 0, 1, 1], [], []>} : vector<128x10xbf16>, vector<10x128xbf16>, vector<128x128xf32> -> vector<128x128xf32>
      %c0_11 = arith.constant 0 : index
      %22 = arith.index_cast %17 : i32 to index
      %c0_12 = arith.constant 0 : index
      %23 = vector.load %arg2[%c0_11, %22, %c0_12] : memref<1x768x10xbf16, #tpu.memory_space<vmem>>, vector<1x128x10xbf16>
      %24 = vector.shape_cast %23 : vector<1x128x10xbf16> to vector<128x10xbf16>
      %cst_13 = arith.constant dense<0.000000e+00> : vector<128x128xf32>
      %25 = tpu.matmul %24, %14, %cst_13 {dimension_numbers = #tpu.dot_dimension_numbers<[1], [0], [0], [1], [0, 0, 1, 1], [], []>} : vector<128x10xbf16>, vector<10x128xbf16>, vector<128x128xf32> -> vector<128x128xf32>
      %26 = arith.maximumf %21, %25 : vector<128x128xf32>
      %27 = vector.broadcast %15 : vector<1x128xf32> to vector<128x128xf32>
      %28 = arith.addf %26, %27 : vector<128x128xf32>
      %cst_14 = arith.constant 0.000000e+00 : f32
      %29 = vector.broadcast %cst_14 : f32 to vector<128x128xf32>
      %30 = arith.maximumf %28, %29 : vector<128x128xf32>
      %31 = arith.truncf %30 : vector<128x128xf32> to vector<128x128xbf16>
      %c0_15 = arith.constant 0 : index
      %c0_16 = arith.constant 0 : index
      %32 = vector.load %arg21[%c0_15, %c0_16] : memref<400x128xbf16, #tpu.memory_space<vmem>>, vector<128x128xbf16>
      tpu.vector_store %arg21[%c0_15, %c0_16], %31 {strides = array<i32>} : memref<400x128xbf16, #tpu.memory_space<vmem>>, vector<128x128xbf16>,
      %c128_i32 = arith.constant 128 : i32
      %33 = arith.addi %13, %c128_i32 : i32
      %34 = tpu.assume_multiple %33, 128 : i32
      %c0_17 = arith.constant 0 : index
      %35 = arith.index_cast %34 : i32 to index
      %c0_18 = arith.constant 0 : index
      %36 = vector.load %arg1[%c0_17, %35, %c0_18] : memref<1x768x10xbf16, #tpu.memory_space<vmem>>, vector<1x128x10xbf16>
      %37 = vector.shape_cast %36 : vector<1x128x10xbf16> to vector<128x10xbf16>
      %cst_19 = arith.constant dense<0.000000e+00> : vector<128x128xf32>
      %38 = tpu.matmul %37, %14, %cst_19 {dimension_numbers = #tpu.dot_dimension_numbers<[1], [0], [0], [1], [0, 0, 1, 1], [], []>} : vector<128x10xbf16>, vector<10x128xbf16>, vector<128x128xf32> -> vector<128x128xf32>
      %c0_20 = arith.constant 0 : index
      %39 = arith.index_cast %34 : i32 to index
      %c0_21 = arith.constant 0 : index
      %40 = vector.load %arg2[%c0_20, %39, %c0_21] : memref<1x768x10xbf16, #tpu.memory_space<vmem>>, vector<1x128x10xbf16>
      %41 = vector.shape_cast %40 : vector<1x128x10xbf16> to vector<128x10xbf16>
      %cst_22 = arith.constant dense<0.000000e+00> : vector<128x128xf32>
      %42 = tpu.matmul %41, %14, %cst_22 {dimension_numbers = #tpu.dot_dimension_numbers<[1], [0], [0], [1], [0, 0, 1, 1], [], []>} : vector<128x10xbf16>, vector<10x128xbf16>, vector<128x128xf32> -> vector<128x128xf32>
      %43 = arith.maximumf %38, %42 : vector<128x128xf32>
      %44 = vector.broadcast %15 : vector<1x128xf32> to vector<128x128xf32>
      %45 = arith.addf %43, %44 : vector<128x128xf32>
      %cst_23 = arith.constant 0.000000e+00 : f32
      %46 = vector.broadcast %cst_23 : f32 to vector<128x128xf32>
      %47 = arith.maximumf %45, %46 : vector<128x128xf32>
      %48 = arith.truncf %47 : vector<128x128xf32> to vector<128x128xbf16>
      %c128 = arith.constant 128 : index
      %c0_24 = arith.constant 0 : index
      %49 = vector.load %arg21[%c128, %c0_24] : memref<400x128xbf16, #tpu.memory_space<vmem>>, vector<128x128xbf16>
      tpu.vector_store %arg21[%c128, %c0_24], %48 {strides = array<i32>} : memref<400x128xbf16, #tpu.memory_space<vmem>>, vector<128x128xbf16>,
      %c256_i32 = arith.constant 256 : i32
      %50 = arith.addi %13, %c256_i32 : i32
      %51 = tpu.assume_multiple %50, 128 : i32
      %c0_25 = arith.constant 0 : index
      %52 = arith.index_cast %51 : i32 to index
      %c0_26 = arith.constant 0 : index
      %53 = vector.load %arg1[%c0_25, %52, %c0_26] : memref<1x768x10xbf16, #tpu.memory_space<vmem>>, vector<1x128x10xbf16>
      %54 = vector.shape_cast %53 : vector<1x128x10xbf16> to vector<128x10xbf16>
      %cst_27 = arith.constant dense<0.000000e+00> : vector<128x128xf32>
      %55 = tpu.matmul %54, %14, %cst_27 {dimension_numbers = #tpu.dot_dimension_numbers<[1], [0], [0], [1], [0, 0, 1, 1], [], []>} : vector<128x10xbf16>, vector<10x128xbf16>, vector<128x128xf32> -> vector<128x128xf32>
      %c0_28 = arith.constant 0 : index
      %56 = arith.index_cast %51 : i32 to index
      %c0_29 = arith.constant 0 : index
      %57 = vector.load %arg2[%c0_28, %56, %c0_29] : memref<1x768x10xbf16, #tpu.memory_space<vmem>>, vector<1x128x10xbf16>
      %58 = vector.shape_cast %57 : vector<1x128x10xbf16> to vector<128x10xbf16>
      %cst_30 = arith.constant dense<0.000000e+00> : vector<128x128xf32>
      %59 = tpu.matmul %58, %14, %cst_30 {dimension_numbers = #tpu.dot_dimension_numbers<[1], [0], [0], [1], [0, 0, 1, 1], [], []>} : vector<128x10xbf16>, vector<10x128xbf16>, vector<128x128xf32> -> vector<128x128xf32>
      %60 = arith.maximumf %55, %59 : vector<128x128xf32>
      %61 = vector.broadcast %15 : vector<1x128xf32> to vector<128x128xf32>
      %62 = arith.addf %60, %61 : vector<128x128xf32>
      %cst_31 = arith.constant 0.000000e+00 : f32
      %63 = vector.broadcast %cst_31 : f32 to vector<128x128xf32>
      %64 = arith.maximumf %62, %63 : vector<128x128xf32>
      %65 = arith.truncf %64 : vector<128x128xf32> to vector<128x128xbf16>
      %c256 = arith.constant 256 : index
      %c0_32 = arith.constant 0 : index
      %66 = vector.load %arg21[%c256, %c0_32] : memref<400x128xbf16, #tpu.memory_space<vmem>>, vector<128x128xbf16>
      tpu.vector_store %arg21[%c256, %c0_32], %65 {strides = array<i32>} : memref<400x128xbf16, #tpu.memory_space<vmem>>, vector<128x128xbf16>,
      %c0_33 = arith.constant 0 : index
      %c0_34 = arith.constant 0 : index
      %67 = vector.load %arg6[%c0_33, %c0_34] : memref<1x128xf32, #tpu.memory_space<vmem>>, vector<1x128xf32>
      %c0_35 = arith.constant 0 : index
      %c0_36 = arith.constant 0 : index
      %68 = vector.load %arg11[%c0_35, %c0_36] : memref<64x128xbf16, #tpu.memory_space<vmem>>, vector<64x128xbf16>
      %c0_37 = arith.constant 0 : index
      %c0_38 = arith.constant 0 : index
      %69 = vector.load %arg12[%c0_37, %c0_38] : memref<64x128xbf16, #tpu.memory_space<vmem>>, vector<64x128xbf16>
      %c0_39 = arith.constant 0 : index
      %c0_40 = arith.constant 0 : index
      %70 = vector.load %arg21[%c0_39, %c0_40] : memref<400x128xbf16, #tpu.memory_space<vmem>>, vector<128x128xbf16>
      %c0_41 = arith.constant 0 : index
      %c0_42 = arith.constant 0 : index
      %71 = vector.load %arg5[%c0_41, %c0_42] : memref<640x128xbf16, #tpu.memory_space<vmem>>, vector<128x128xbf16>
      %cst_43 = arith.constant dense<0.000000e+00> : vector<128x128xf32>
      %72 = tpu.matmul %70, %71, %cst_43 {dimension_numbers = #tpu.dot_dimension_numbers<[1], [0], [0], [1], [0, 0, 1, 1], [], []>} : vector<128x128xbf16>, vector<128x128xbf16>, vector<128x128xf32> -> vector<128x128xf32>
      %c1 = arith.constant 1 : index
      %c0_44 = arith.constant 0 : index
      %73 = vector.load %arg21[%c1, %c0_44] : memref<400x128xbf16, #tpu.memory_space<vmem>>, vector<128x128xbf16>
      %c128_45 = arith.constant 128 : index
      %c0_46 = arith.constant 0 : index
      %74 = vector.load %arg5[%c128_45, %c0_46] : memref<640x128xbf16, #tpu.memory_space<vmem>>, vector<128x128xbf16>
      %cst_47 = arith.constant dense<0.000000e+00> : vector<128x128xf32>
      %75 = tpu.matmul %73, %74, %cst_47 {dimension_numbers = #tpu.dot_dimension_numbers<[1], [0], [0], [1], [0, 0, 1, 1], [], []>} : vector<128x128xbf16>, vector<128x128xbf16>, vector<128x128xf32> -> vector<128x128xf32>
      %76 = arith.addf %72, %75 : vector<128x128xf32>
      %c2 = arith.constant 2 : index
      %c0_48 = arith.constant 0 : index
      %77 = vector.load %arg21[%c2, %c0_48] : memref<400x128xbf16, #tpu.memory_space<vmem>>, vector<128x128xbf16>
      %c256_49 = arith.constant 256 : index
      %c0_50 = arith.constant 0 : index
      %78 = vector.load %arg5[%c256_49, %c0_50] : memref<640x128xbf16, #tpu.memory_space<vmem>>, vector<128x128xbf16>
      %cst_51 = arith.constant dense<0.000000e+00> : vector<128x128xf32>
      %79 = tpu.matmul %77, %78, %cst_51 {dimension_numbers = #tpu.dot_dimension_numbers<[1], [0], [0], [1], [0, 0, 1, 1], [], []>} : vector<128x128xbf16>, vector<128x128xbf16>, vector<128x128xf32> -> vector<128x128xf32>
      %80 = arith.addf %76, %79 : vector<128x128xf32>
      %c3 = arith.constant 3 : index
      %c0_52 = arith.constant 0 : index
      %81 = vector.load %arg21[%c3, %c0_52] : memref<400x128xbf16, #tpu.memory_space<vmem>>, vector<128x128xbf16>
      %c384_53 = arith.constant 384 : index
      %c0_54 = arith.constant 0 : index
      %82 = vector.load %arg5[%c384_53, %c0_54] : memref<640x128xbf16, #tpu.memory_space<vmem>>, vector<128x128xbf16>
      %cst_55 = arith.constant dense<0.000000e+00> : vector<128x128xf32>
      %83 = tpu.matmul %81, %82, %cst_55 {dimension_numbers = #tpu.dot_dimension_numbers<[1], [0], [0], [1], [0, 0, 1, 1], [], []>} : vector<128x128xbf16>, vector<128x128xbf16>, vector<128x128xf32> -> vector<128x128xf32>
      %84 = arith.addf %80, %83 : vector<128x128xf32>
      %c4 = arith.constant 4 : index
      %c0_56 = arith.constant 0 : index
      %85 = vector.load %arg21[%c4, %c0_56] : memref<400x128xbf16, #tpu.memory_space<vmem>>, vector<128x128xbf16>
      %c512 = arith.constant 512 : index
      %c0_57 = arith.constant 0 : index
      %86 = vector.load %arg5[%c512, %c0_57] : memref<640x128xbf16, #tpu.memory_space<vmem>>, vector<128x128xbf16>
      %cst_58 = arith.constant dense<0.000000e+00> : vector<128x128xf32>
      %87 = tpu.matmul %85, %86, %cst_58 {dimension_numbers = #tpu.dot_dimension_numbers<[1], [0], [0], [1], [0, 0, 1, 1], [], []>} : vector<128x128xbf16>, vector<128x128xbf16>, vector<128x128xf32> -> vector<128x128xf32>
      %88 = arith.addf %84, %87 : vector<128x128xf32>
      %89 = arith.truncf %88 : vector<128x128xf32> to vector<128x128xbf16>
      %cst_59 = arith.constant dense<0.000000e+00> : vector<64x128xf32>
      %90 = tpu.matmul %68, %89, %cst_59 {dimension_numbers = #tpu.dot_dimension_numbers<[1], [0], [0], [1], [0, 0, 1, 1], [], []>} : vector<64x128xbf16>, vector<128x128xbf16>, vector<64x128xf32> -> vector<64x128xf32>
      %cst_60 = arith.constant dense<0.000000e+00> : vector<64x128xf32>
      %91 = tpu.matmul %69, %89, %cst_60 {dimension_numbers = #tpu.dot_dimension_numbers<[1], [0], [0], [1], [0, 0, 1, 1], [], []>} : vector<64x128xbf16>, vector<128x128xbf16>, vector<64x128xf32> -> vector<64x128xf32>
      %92 = arith.maximumf %90, %91 : vector<64x128xf32>
      %93 = vector.broadcast %67 : vector<1x128xf32> to vector<64x128xf32>
      %94 = arith.addf %92, %93 : vector<64x128xf32>
      %cst_61 = arith.constant 0.000000e+00 : f32
      %95 = vector.broadcast %cst_61 : f32 to vector<64x128xf32>
      %96 = arith.maximumf %94, %95 : vector<64x128xf32>
      %97 = arith.truncf %96 : vector<64x128xf32> to vector<64x128xbf16>
      %c0_62 = arith.constant 0 : index
      %c0_63 = arith.constant 0 : index
      %98 = vector.load %arg22[%c0_62, %c0_63] : memref<192x128xbf16, #tpu.memory_space<vmem>>, vector<64x128xbf16>
      tpu.vector_store %arg22[%c0_62, %c0_63], %97 {strides = array<i32>} : memref<192x128xbf16, #tpu.memory_space<vmem>>, vector<64x128xbf16>,
      %c128_64 = arith.constant 128 : index
      %c0_65 = arith.constant 0 : index
      %99 = vector.load %arg21[%c128_64, %c0_65] : memref<400x128xbf16, #tpu.memory_space<vmem>>, vector<128x128xbf16>
      %c0_66 = arith.constant 0 : index
      %c0_67 = arith.constant 0 : index
      %100 = vector.load %arg5[%c0_66, %c0_67] : memref<640x128xbf16, #tpu.memory_space<vmem>>, vector<128x128xbf16>
      %cst_68 = arith.constant dense<0.000000e+00> : vector<128x128xf32>
      %101 = tpu.matmul %99, %100, %cst_68 {dimension_numbers = #tpu.dot_dimension_numbers<[1], [0], [0], [1], [0, 0, 1, 1], [], []>} : vector<128x128xbf16>, vector<128x128xbf16>, vector<128x128xf32> -> vector<128x128xf32>
      %c129 = arith.constant 129 : index
      %c0_69 = arith.constant 0 : index
      %102 = vector.load %arg21[%c129, %c0_69] : memref<400x128xbf16, #tpu.memory_space<vmem>>, vector<128x128xbf16>
      %c128_70 = arith.constant 128 : index
      %c0_71 = arith.constant 0 : index
      %103 = vector.load %arg5[%c128_70, %c0_71] : memref<640x128xbf16, #tpu.memory_space<vmem>>, vector<128x128xbf16>
      %cst_72 = arith.constant dense<0.000000e+00> : vector<128x128xf32>
      %104 = tpu.matmul %102, %103, %cst_72 {dimension_numbers = #tpu.dot_dimension_numbers<[1], [0], [0], [1], [0, 0, 1, 1], [], []>} : vector<128x128xbf16>, vector<128x128xbf16>, vector<128x128xf32> -> vector<128x128xf32>
      %105 = arith.addf %101, %104 : vector<128x128xf32>
      %c130 = arith.constant 130 : index
      %c0_73 = arith.constant 0 : index
      %106 = vector.load %arg21[%c130, %c0_73] : memref<400x128xbf16, #tpu.memory_space<vmem>>, vector<128x128xbf16>
      %c256_74 = arith.constant 256 : index
      %c0_75 = arith.constant 0 : index
      %107 = vector.load %arg5[%c256_74, %c0_75] : memref<640x128xbf16, #tpu.memory_space<vmem>>, vector<128x128xbf16>
      %cst_76 = arith.constant dense<0.000000e+00> : vector<128x128xf32>
      %108 = tpu.matmul %106, %107, %cst_76 {dimension_numbers = #tpu.dot_dimension_numbers<[1], [0], [0], [1], [0, 0, 1, 1], [], []>} : vector<128x128xbf16>, vector<128x128xbf16>, vector<128x128xf32> -> vector<128x128xf32>
      %109 = arith.addf %105, %108 : vector<128x128xf32>
      %c131 = arith.constant 131 : index
      %c0_77 = arith.constant 0 : index
      %110 = vector.load %arg21[%c131, %c0_77] : memref<400x128xbf16, #tpu.memory_space<vmem>>, vector<128x128xbf16>
      %c384_78 = arith.constant 384 : index
      %c0_79 = arith.constant 0 : index
      %111 = vector.load %arg5[%c384_78, %c0_79] : memref<640x128xbf16, #tpu.memory_space<vmem>>, vector<128x128xbf16>
      %cst_80 = arith.constant dense<0.000000e+00> : vector<128x128xf32>
      %112 = tpu.matmul %110, %111, %cst_80 {dimension_numbers = #tpu.dot_dimension_numbers<[1], [0], [0], [1], [0, 0, 1, 1], [], []>} : vector<128x128xbf16>, vector<128x128xbf16>, vector<128x128xf32> -> vector<128x128xf32>
      %113 = arith.addf %109, %112 : vector<128x128xf32>
      %c132 = arith.constant 132 : index
      %c0_81 = arith.constant 0 : index
      %114 = vector.load %arg21[%c132, %c0_81] : memref<400x128xbf16, #tpu.memory_space<vmem>>, vector<128x128xbf16>
      %c512_82 = arith.constant 512 : index
      %c0_83 = arith.constant 0 : index
      %115 = vector.load %arg5[%c512_82, %c0_83] : memref<640x128xbf16, #tpu.memory_space<vmem>>, vector<128x128xbf16>
      %cst_84 = arith.constant dense<0.000000e+00> : vector<128x128xf32>
      %116 = tpu.matmul %114, %115, %cst_84 {dimension_numbers = #tpu.dot_dimension_numbers<[1], [0], [0], [1], [0, 0, 1, 1], [], []>} : vector<128x128xbf16>, vector<128x128xbf16>, vector<128x128xf32> -> vector<128x128xf32>
      %117 = arith.addf %113, %116 : vector<128x128xf32>
      %118 = arith.truncf %117 : vector<128x128xf32> to vector<128x128xbf16>
      %cst_85 = arith.constant dense<0.000000e+00> : vector<64x128xf32>
      %119 = tpu.matmul %68, %118, %cst_85 {dimension_numbers = #tpu.dot_dimension_numbers<[1], [0], [0], [1], [0, 0, 1, 1], [], []>} : vector<64x128xbf16>, vector<128x128xbf16>, vector<64x128xf32> -> vector<64x128xf32>
      %cst_86 = arith.constant dense<0.000000e+00> : vector<64x128xf32>
      %120 = tpu.matmul %69, %118, %cst_86 {dimension_numbers = #tpu.dot_dimension_numbers<[1], [0], [0], [1], [0, 0, 1, 1], [], []>} : vector<64x128xbf16>, vector<128x128xbf16>, vector<64x128xf32> -> vector<64x128xf32>
      %121 = arith.maximumf %119, %120 : vector<64x128xf32>
      %122 = vector.broadcast %67 : vector<1x128xf32> to vector<64x128xf32>
      %123 = arith.addf %121, %122 : vector<64x128xf32>
      %cst_87 = arith.constant 0.000000e+00 : f32
      %124 = vector.broadcast %cst_87 : f32 to vector<64x128xf32>
      %125 = arith.maximumf %123, %124 : vector<64x128xf32>
      %126 = arith.truncf %125 : vector<64x128xf32> to vector<64x128xbf16>
      %c64 = arith.constant 64 : index
      %c0_88 = arith.constant 0 : index
      %127 = vector.load %arg22[%c64, %c0_88] : memref<192x128xbf16, #tpu.memory_space<vmem>>, vector<64x128xbf16>
      tpu.vector_store %arg22[%c64, %c0_88], %126 {strides = array<i32>} : memref<192x128xbf16, #tpu.memory_space<vmem>>, vector<64x128xbf16>,
      %c256_89 = arith.constant 256 : index
      %c0_90 = arith.constant 0 : index
      %128 = vector.load %arg21[%c256_89, %c0_90] : memref<400x128xbf16, #tpu.memory_space<vmem>>, vector<128x128xbf16>
      %c0_91 = arith.constant 0 : index
      %c0_92 = arith.constant 0 : index
      %129 = vector.load %arg5[%c0_91, %c0_92] : memref<640x128xbf16, #tpu.memory_space<vmem>>, vector<128x128xbf16>
      %cst_93 = arith.constant dense<0.000000e+00> : vector<128x128xf32>
      %130 = tpu.matmul %128, %129, %cst_93 {dimension_numbers = #tpu.dot_dimension_numbers<[1], [0], [0], [1], [0, 0, 1, 1], [], []>} : vector<128x128xbf16>, vector<128x128xbf16>, vector<128x128xf32> -> vector<128x128xf32>
      %c257 = arith.constant 257 : index
      %c0_94 = arith.constant 0 : index
      %131 = vector.load %arg21[%c257, %c0_94] : memref<400x128xbf16, #tpu.memory_space<vmem>>, vector<128x128xbf16>
      %c128_95 = arith.constant 128 : index
      %c0_96 = arith.constant 0 : index
      %132 = vector.load %arg5[%c128_95, %c0_96] : memref<640x128xbf16, #tpu.memory_space<vmem>>, vector<128x128xbf16>
      %cst_97 = arith.constant dense<0.000000e+00> : vector<128x128xf32>
      %133 = tpu.matmul %131, %132, %cst_97 {dimension_numbers = #tpu.dot_dimension_numbers<[1], [0], [0], [1], [0, 0, 1, 1], [], []>} : vector<128x128xbf16>, vector<128x128xbf16>, vector<128x128xf32> -> vector<128x128xf32>
      %134 = arith.addf %130, %133 : vector<128x128xf32>
      %c258 = arith.constant 258 : index
      %c0_98 = arith.constant 0 : index
      %135 = vector.load %arg21[%c258, %c0_98] : memref<400x128xbf16, #tpu.memory_space<vmem>>, vector<128x128xbf16>
      %c256_99 = arith.constant 256 : index
      %c0_100 = arith.constant 0 : index
      %136 = vector.load %arg5[%c256_99, %c0_100] : memref<640x128xbf16, #tpu.memory_space<vmem>>, vector<128x128xbf16>
      %cst_101 = arith.constant dense<0.000000e+00> : vector<128x128xf32>
      %137 = tpu.matmul %135, %136, %cst_101 {dimension_numbers = #tpu.dot_dimension_numbers<[1], [0], [0], [1], [0, 0, 1, 1], [], []>} : vector<128x128xbf16>, vector<128x128xbf16>, vector<128x128xf32> -> vector<128x128xf32>
      %138 = arith.addf %134, %137 : vector<128x128xf32>
      %c259 = arith.constant 259 : index
      %c0_102 = arith.constant 0 : index
      %139 = vector.load %arg21[%c259, %c0_102] : memref<400x128xbf16, #tpu.memory_space<vmem>>, vector<128x128xbf16>
      %c384_103 = arith.constant 384 : index
      %c0_104 = arith.constant 0 : index
      %140 = vector.load %arg5[%c384_103, %c0_104] : memref<640x128xbf16, #tpu.memory_space<vmem>>, vector<128x128xbf16>
      %cst_105 = arith.constant dense<0.000000e+00> : vector<128x128xf32>
      %141 = tpu.matmul %139, %140, %cst_105 {dimension_numbers = #tpu.dot_dimension_numbers<[1], [0], [0], [1], [0, 0, 1, 1], [], []>} : vector<128x128xbf16>, vector<128x128xbf16>, vector<128x128xf32> -> vector<128x128xf32>
      %142 = arith.addf %138, %141 : vector<128x128xf32>
      %c260 = arith.constant 260 : index
      %c0_106 = arith.constant 0 : index
      %143 = vector.load %arg21[%c260, %c0_106] : memref<400x128xbf16, #tpu.memory_space<vmem>>, vector<128x128xbf16>
      %c512_107 = arith.constant 512 : index
      %c0_108 = arith.constant 0 : index
      %144 = vector.load %arg5[%c512_107, %c0_108] : memref<640x128xbf16, #tpu.memory_space<vmem>>, vector<128x128xbf16>
      %cst_109 = arith.constant dense<0.000000e+00> : vector<128x128xf32>
      %145 = tpu.matmul %143, %144, %cst_109 {dimension_numbers = #tpu.dot_dimension_numbers<[1], [0], [0], [1], [0, 0, 1, 1], [], []>} : vector<128x128xbf16>, vector<128x128xbf16>, vector<128x128xf32> -> vector<128x128xf32>
      %146 = arith.addf %142, %145 : vector<128x128xf32>
      %147 = arith.truncf %146 : vector<128x128xf32> to vector<128x128xbf16>
      %cst_110 = arith.constant dense<0.000000e+00> : vector<64x128xf32>
      %148 = tpu.matmul %68, %147, %cst_110 {dimension_numbers = #tpu.dot_dimension_numbers<[1], [0], [0], [1], [0, 0, 1, 1], [], []>} : vector<64x128xbf16>, vector<128x128xbf16>, vector<64x128xf32> -> vector<64x128xf32>
      %cst_111 = arith.constant dense<0.000000e+00> : vector<64x128xf32>
      %149 = tpu.matmul %69, %147, %cst_111 {dimension_numbers = #tpu.dot_dimension_numbers<[1], [0], [0], [1], [0, 0, 1, 1], [], []>} : vector<64x128xbf16>, vector<128x128xbf16>, vector<64x128xf32> -> vector<64x128xf32>
      %150 = arith.maximumf %148, %149 : vector<64x128xf32>
      %151 = vector.broadcast %67 : vector<1x128xf32> to vector<64x128xf32>
      %152 = arith.addf %150, %151 : vector<64x128xf32>
      %cst_112 = arith.constant 0.000000e+00 : f32
      %153 = vector.broadcast %cst_112 : f32 to vector<64x128xf32>
      %154 = arith.maximumf %152, %153 : vector<64x128xf32>
      %155 = arith.truncf %154 : vector<64x128xf32> to vector<64x128xbf16>
      %c128_113 = arith.constant 128 : index
      %c0_114 = arith.constant 0 : index
      %156 = vector.load %arg22[%c128_113, %c0_114] : memref<192x128xbf16, #tpu.memory_space<vmem>>, vector<64x128xbf16>
      tpu.vector_store %arg22[%c128_113, %c0_114], %155 {strides = array<i32>} : memref<192x128xbf16, #tpu.memory_space<vmem>>, vector<64x128xbf16>,
      %c0_115 = arith.constant 0 : index
      %c0_116 = arith.constant 0 : index
      %157 = vector.load %arg22[%c0_115, %c0_116] : memref<192x128xbf16, #tpu.memory_space<vmem>>, vector<180x128xbf16>
      %c0_117 = arith.constant 0 : index
      %c0_118 = arith.constant 0 : index
      %158 = vector.load %arg7[%c0_117, %c0_118] : memref<640x128xbf16, #tpu.memory_space<vmem>>, vector<128x128xbf16>
      %cst_119 = arith.constant dense<0.000000e+00> : vector<180x128xf32>
      %159 = tpu.matmul %157, %158, %cst_119 {dimension_numbers = #tpu.dot_dimension_numbers<[1], [0], [0], [1], [0, 0, 1, 1], [], []>} : vector<180x128xbf16>, vector<128x128xbf16>, vector<180x128xf32> -> vector<180x128xf32>
      %c1_120 = arith.constant 1 : index
      %c0_121 = arith.constant 0 : index
      %160 = vector.load %arg22[%c1_120, %c0_121] : memref<192x128xbf16, #tpu.memory_space<vmem>>, vector<180x128xbf16>
      %c128_122 = arith.constant 128 : index
      %c0_123 = arith.constant 0 : index
      %161 = vector.load %arg7[%c128_122, %c0_123] : memref<640x128xbf16, #tpu.memory_space<vmem>>, vector<128x128xbf16>
      %cst_124 = arith.constant dense<0.000000e+00> : vector<180x128xf32>
      %162 = tpu.matmul %160, %161, %cst_124 {dimension_numbers = #tpu.dot_dimension_numbers<[1], [0], [0], [1], [0, 0, 1, 1], [], []>} : vector<180x128xbf16>, vector<128x128xbf16>, vector<180x128xf32> -> vector<180x128xf32>
      %163 = arith.addf %159, %162 : vector<180x128xf32>
      %c2_125 = arith.constant 2 : index
      %c0_126 = arith.constant 0 : index
      %164 = vector.load %arg22[%c2_125, %c0_126] : memref<192x128xbf16, #tpu.memory_space<vmem>>, vector<180x128xbf16>
      %c256_127 = arith.constant 256 : index
      %c0_128 = arith.constant 0 : index
      %165 = vector.load %arg7[%c256_127, %c0_128] : memref<640x128xbf16, #tpu.memory_space<vmem>>, vector<128x128xbf16>
      %cst_129 = arith.constant dense<0.000000e+00> : vector<180x128xf32>
      %166 = tpu.matmul %164, %165, %cst_129 {dimension_numbers = #tpu.dot_dimension_numbers<[1], [0], [0], [1], [0, 0, 1, 1], [], []>} : vector<180x128xbf16>, vector<128x128xbf16>, vector<180x128xf32> -> vector<180x128xf32>
      %167 = arith.addf %163, %166 : vector<180x128xf32>
      %c3_130 = arith.constant 3 : index
      %c0_131 = arith.constant 0 : index
      %168 = vector.load %arg22[%c3_130, %c0_131] : memref<192x128xbf16, #tpu.memory_space<vmem>>, vector<180x128xbf16>
      %c384_132 = arith.constant 384 : index
      %c0_133 = arith.constant 0 : index
      %169 = vector.load %arg7[%c384_132, %c0_133] : memref<640x128xbf16, #tpu.memory_space<vmem>>, vector<128x128xbf16>
      %cst_134 = arith.constant dense<0.000000e+00> : vector<180x128xf32>
      %170 = tpu.matmul %168, %169, %cst_134 {dimension_numbers = #tpu.dot_dimension_numbers<[1], [0], [0], [1], [0, 0, 1, 1], [], []>} : vector<180x128xbf16>, vector<128x128xbf16>, vector<180x128xf32> -> vector<180x128xf32>
      %171 = arith.addf %167, %170 : vector<180x128xf32>
      %c4_135 = arith.constant 4 : index
      %c0_136 = arith.constant 0 : index
      %172 = vector.load %arg22[%c4_135, %c0_136] : memref<192x128xbf16, #tpu.memory_space<vmem>>, vector<180x128xbf16>
      %c512_137 = arith.constant 512 : index
      %c0_138 = arith.constant 0 : index
      %173 = vector.load %arg7[%c512_137, %c0_138] : memref<640x128xbf16, #tpu.memory_space<vmem>>, vector<128x128xbf16>
      %cst_139 = arith.constant dense<0.000000e+00> : vector<180x128xf32>
      %174 = tpu.matmul %172, %173, %cst_139 {dimension_numbers = #tpu.dot_dimension_numbers<[1], [0], [0], [1], [0, 0, 1, 1], [], []>} : vector<180x128xbf16>, vector<128x128xbf16>, vector<180x128xf32> -> vector<180x128xf32>
      %175 = arith.addf %171, %174 : vector<180x128xf32>
      %c0_140 = arith.constant 0 : index
      %c0_141 = arith.constant 0 : index
      %176 = vector.load %arg13[%c0_140, %c0_141] : memref<96x180xbf16, #tpu.memory_space<vmem>>, vector<96x180xbf16>
      %c0_142 = arith.constant 0 : index
      %c0_143 = arith.constant 0 : index
      %177 = vector.load %arg14[%c0_142, %c0_143] : memref<96x180xbf16, #tpu.memory_space<vmem>>, vector<96x180xbf16>
      %c0_144 = arith.constant 0 : index
      %c0_145 = arith.constant 0 : index
      %178 = vector.load %arg8[%c0_144, %c0_145] : memref<1x128xf32, #tpu.memory_space<vmem>>, vector<1x128xf32>
      %179 = arith.truncf %175 : vector<180x128xf32> to vector<180x128xbf16>
      %cst_146 = arith.constant dense<0.000000e+00> : vector<96x128xf32>
      %180 = tpu.matmul %176, %179, %cst_146 {dimension_numbers = #tpu.dot_dimension_numbers<[1], [0], [0], [1], [0, 0, 1, 1], [], []>} : vector<96x180xbf16>, vector<180x128xbf16>, vector<96x128xf32> -> vector<96x128xf32>
      %cst_147 = arith.constant dense<0.000000e+00> : vector<96x128xf32>
      %181 = tpu.matmul %177, %179, %cst_147 {dimension_numbers = #tpu.dot_dimension_numbers<[1], [0], [0], [1], [0, 0, 1, 1], [], []>} : vector<96x180xbf16>, vector<180x128xbf16>, vector<96x128xf32> -> vector<96x128xf32>
      %182 = arith.maximumf %180, %181 : vector<96x128xf32>
      %183 = vector.broadcast %178 : vector<1x128xf32> to vector<96x128xf32>
      %184 = arith.addf %182, %183 : vector<96x128xf32>
      %cst_148 = arith.constant 0.000000e+00 : f32
      %185 = vector.broadcast %cst_148 : f32 to vector<96x128xf32>
      %186 = arith.maximumf %184, %185 : vector<96x128xf32>
      %187 = arith.truncf %186 : vector<96x128xf32> to vector<96x128xbf16>
      %c0_149 = arith.constant 0 : index
      %c0_150 = arith.constant 0 : index
      %188 = vector.load %arg23[%c0_149, %c0_150] : memref<96x128xbf16, #tpu.memory_space<vmem>>, vector<96x128xbf16>
      tpu.vector_store %arg23[%c0_149, %c0_150], %187 {strides = array<i32>} : memref<96x128xbf16, #tpu.memory_space<vmem>>, vector<96x128xbf16>,
      %c0_151 = arith.constant 0 : index
      %c0_152 = arith.constant 0 : index
      %189 = vector.load %arg23[%c0_151, %c0_152] : memref<96x128xbf16, #tpu.memory_space<vmem>>, vector<86x128xbf16>
      %c0_153 = arith.constant 0 : index
      %c0_154 = arith.constant 0 : index
      %190 = vector.load %arg9[%c0_153, %c0_154] : memref<640x256xbf16, #tpu.memory_space<vmem>>, vector<128x256xbf16>
      %cst_155 = arith.constant dense<0.000000e+00> : vector<86x256xf32>
      %191 = tpu.matmul %189, %190, %cst_155 {dimension_numbers = #tpu.dot_dimension_numbers<[1], [0], [0], [1], [0, 0, 1, 1], [], []>} : vector<86x128xbf16>, vector<128x256xbf16>, vector<86x256xf32> -> vector<86x256xf32>
      %c1_156 = arith.constant 1 : index
      %c0_157 = arith.constant 0 : index
      %192 = vector.load %arg23[%c1_156, %c0_157] : memref<96x128xbf16, #tpu.memory_space<vmem>>, vector<86x128xbf16>
      %c128_158 = arith.constant 128 : index
      %c0_159 = arith.constant 0 : index
      %193 = vector.load %arg9[%c128_158, %c0_159] : memref<640x256xbf16, #tpu.memory_space<vmem>>, vector<128x256xbf16>
      %cst_160 = arith.constant dense<0.000000e+00> : vector<86x256xf32>
      %194 = tpu.matmul %192, %193, %cst_160 {dimension_numbers = #tpu.dot_dimension_numbers<[1], [0], [0], [1], [0, 0, 1, 1], [], []>} : vector<86x128xbf16>, vector<128x256xbf16>, vector<86x256xf32> -> vector<86x256xf32>
      %195 = arith.addf %191, %194 : vector<86x256xf32>
      %c2_161 = arith.constant 2 : index
      %c0_162 = arith.constant 0 : index
      %196 = vector.load %arg23[%c2_161, %c0_162] : memref<96x128xbf16, #tpu.memory_space<vmem>>, vector<86x128xbf16>
      %c256_163 = arith.constant 256 : index
      %c0_164 = arith.constant 0 : index
      %197 = vector.load %arg9[%c256_163, %c0_164] : memref<640x256xbf16, #tpu.memory_space<vmem>>, vector<128x256xbf16>
      %cst_165 = arith.constant dense<0.000000e+00> : vector<86x256xf32>
      %198 = tpu.matmul %196, %197, %cst_165 {dimension_numbers = #tpu.dot_dimension_numbers<[1], [0], [0], [1], [0, 0, 1, 1], [], []>} : vector<86x128xbf16>, vector<128x256xbf16>, vector<86x256xf32> -> vector<86x256xf32>
      %199 = arith.addf %195, %198 : vector<86x256xf32>
      %c3_166 = arith.constant 3 : index
      %c0_167 = arith.constant 0 : index
      %200 = vector.load %arg23[%c3_166, %c0_167] : memref<96x128xbf16, #tpu.memory_space<vmem>>, vector<86x128xbf16>
      %c384_168 = arith.constant 384 : index
      %c0_169 = arith.constant 0 : index
      %201 = vector.load %arg9[%c384_168, %c0_169] : memref<640x256xbf16, #tpu.memory_space<vmem>>, vector<128x256xbf16>
      %cst_170 = arith.constant dense<0.000000e+00> : vector<86x256xf32>
      %202 = tpu.matmul %200, %201, %cst_170 {dimension_numbers = #tpu.dot_dimension_numbers<[1], [0], [0], [1], [0, 0, 1, 1], [], []>} : vector<86x128xbf16>, vector<128x256xbf16>, vector<86x256xf32> -> vector<86x256xf32>
      %203 = arith.addf %199, %202 : vector<86x256xf32>
      %c4_171 = arith.constant 4 : index
      %c0_172 = arith.constant 0 : index
      %204 = vector.load %arg23[%c4_171, %c0_172] : memref<96x128xbf16, #tpu.memory_space<vmem>>, vector<86x128xbf16>
      %c512_173 = arith.constant 512 : index
      %c0_174 = arith.constant 0 : index
      %205 = vector.load %arg9[%c512_173, %c0_174] : memref<640x256xbf16, #tpu.memory_space<vmem>>, vector<128x256xbf16>
      %cst_175 = arith.constant dense<0.000000e+00> : vector<86x256xf32>
      %206 = tpu.matmul %204, %205, %cst_175 {dimension_numbers = #tpu.dot_dimension_numbers<[1], [0], [0], [1], [0, 0, 1, 1], [], []>} : vector<86x128xbf16>, vector<128x256xbf16>, vector<86x256xf32> -> vector<86x256xf32>
      %207 = arith.addf %203, %206 : vector<86x256xf32>
      %c0_176 = arith.constant 0 : index
      %c0_177 = arith.constant 0 : index
      %208 = vector.load %arg15[%c0_176, %c0_177] : memref<48x86xbf16, #tpu.memory_space<vmem>>, vector<48x86xbf16>
      %c0_178 = arith.constant 0 : index
      %c0_179 = arith.constant 0 : index
      %209 = vector.load %arg16[%c0_178, %c0_179] : memref<48x86xbf16, #tpu.memory_space<vmem>>, vector<48x86xbf16>
      %c0_180 = arith.constant 0 : index
      %c0_181 = arith.constant 0 : index
      %210 = vector.load %arg10[%c0_180, %c0_181] : memref<1x256xf32, #tpu.memory_space<vmem>>, vector<1x256xf32>
      %211 = arith.truncf %207 : vector<86x256xf32> to vector<86x256xbf16>
      %cst_182 = arith.constant dense<0.000000e+00> : vector<48x256xf32>
      %212 = tpu.matmul %208, %211, %cst_182 {dimension_numbers = #tpu.dot_dimension_numbers<[1], [0], [0], [1], [0, 0, 1, 1], [], []>} : vector<48x86xbf16>, vector<86x256xbf16>, vector<48x256xf32> -> vector<48x256xf32>
      %cst_183 = arith.constant dense<0.000000e+00> : vector<48x256xf32>
      %213 = tpu.matmul %209, %211, %cst_183 {dimension_numbers = #tpu.dot_dimension_numbers<[1], [0], [0], [1], [0, 0, 1, 1], [], []>} : vector<48x86xbf16>, vector<86x256xbf16>, vector<48x256xf32> -> vector<48x256xf32>
      %214 = arith.maximumf %212, %213 : vector<48x256xf32>
      %215 = vector.broadcast %210 : vector<1x256xf32> to vector<48x256xf32>
      %216 = arith.addf %214, %215 : vector<48x256xf32>
      %cst_184 = arith.constant 0.000000e+00 : f32
      %217 = vector.broadcast %cst_184 : f32 to vector<48x256xf32>
      %218 = arith.maximumf %216, %217 : vector<48x256xf32>
      %c0_185 = arith.constant 0 : index
      %c0_186 = arith.constant 0 : index
      %219 = vector.load %arg17[%c0_185, %c0_186] : memref<48x256xf32, #tpu.memory_space<vmem>>, vector<48x256xf32>
      %220 = arith.mulf %218, %219 : vector<48x256xf32>
      %cst_187 = arith.constant dense<0.000000e+00> : vector<256xf32>
      %221 = vector.multi_reduction <add>, %220, %cst_187 [0] : vector<48x256xf32> to vector<256xf32>
      %222 = vector.shape_cast %221 : vector<256xf32> to vector<1x256xf32>
      %c0_188 = arith.constant 0 : index
      %c0_189 = arith.constant 0 : index
      %223 = vector.load %arg18[%c0_188, %c0_189] : memref<48x256xf32, #tpu.memory_space<vmem>>, vector<48x256xf32>
      %224 = arith.mulf %218, %223 : vector<48x256xf32>
      %cst_190 = arith.constant dense<0.000000e+00> : vector<256xf32>
      %225 = vector.multi_reduction <add>, %224, %cst_190 [0] : vector<48x256xf32> to vector<256xf32>
      %226 = vector.shape_cast %225 : vector<256xf32> to vector<1x256xf32>
      %cst_191 = arith.constant dense<0.000000e+00> : vector<1xf32>
      %227 = vector.multi_reduction <add>, %222, %cst_191 [1] : vector<1x256xf32> to vector<1xf32>
      %228 = vector.shape_cast %227 : vector<1xf32> to vector<1x1xf32>
      %cst_192 = arith.constant dense<0.000000e+00> : vector<1xf32>
      %229 = vector.multi_reduction <add>, %226, %cst_192 [1] : vector<1x256xf32> to vector<1xf32>
      %230 = vector.shape_cast %229 : vector<1xf32> to vector<1x1xf32>
      %231 = vector.broadcast %228 : vector<1x1xf32> to vector<1x128xf32>
      %232 = arith.mulf %231, %6 : vector<1x128xf32>
      %233 = vector.broadcast %230 : vector<1x1xf32> to vector<1x128xf32>
      %234 = arith.mulf %233, %10 : vector<1x128xf32>
      %235 = arith.addf %232, %234 : vector<1x128xf32>
      %c0_193 = arith.constant 0 : index
      %c0_194 = arith.constant 0 : index
      %236 = vector.load %arg19[%c0_193, %c0_194] : memref<1x128xf32, #tpu.memory_space<vmem>>, vector<1x128xf32>
      %237 = arith.addf %235, %236 : vector<1x128xf32>
      %c0_195 = arith.constant 0 : index
      %238 = arith.index_cast %arg24 : i32 to index
      %c0_196 = arith.constant 0 : index
      %239 = vector.load %arg20[%c0_195, %238, %c0_196] : memref<1x2x128xf32, #tpu.memory_space<vmem>>, vector<1x1x128xf32>
      %240 = vector.shape_cast %239 : vector<1x1x128xf32> to vector<1x128xf32>
      %241 = vector.shape_cast %237 : vector<1x128xf32> to vector<1x1x128xf32>
      tpu.vector_store %arg20[%c0_195, %238, %c0_196], %241 {strides = array<i32>} : memref<1x2x128xf32, #tpu.memory_space<vmem>>, vector<1x1x128xf32>,
    }
    %c2_i32_2 = arith.constant 2 : i32
    return
  }
  func.func @transform_0(%arg0: i32) -> (i32, i32, i32) {
    %c0_i32 = arith.constant 0 : i32
    %c0_i32_0 = arith.constant 0 : i32
    %c0_i32_1 = arith.constant 0 : i32
    return %arg0, %c0_i32, %c0_i32_0 : i32, i32, i32
  }
  func.func @transform_1(%arg0: i32) -> (i32, i32, i32) {
    %c0_i32 = arith.constant 0 : i32
    %c0_i32_0 = arith.constant 0 : i32
    %c0_i32_1 = arith.constant 0 : i32
    return %arg0, %c0_i32, %c0_i32_0 : i32, i32, i32
  }
  func.func @transform_2(%arg0: i32) -> (i32, i32) {
    %c0_i32 = arith.constant 0 : i32
    %c0_i32_0 = arith.constant 0 : i32
    %c0_i32_1 = arith.constant 0 : i32
    return %c0_i32, %c0_i32_0 : i32, i32
  }
  func.func @transform_3(%arg0: i32) -> (i32, i32) {
    %c0_i32 = arith.constant 0 : i32
    %c0_i32_0 = arith.constant 0 : i32
    %c0_i32_1 = arith.constant 0 : i32
    return %c0_i32, %c0_i32_0 : i32, i32
  }
  func.func @transform_4(%arg0: i32) -> (i32, i32) {
    %c0_i32 = arith.constant 0 : i32
    %c0_i32_0 = arith.constant 0 : i32
    %c0_i32_1 = arith.constant 0 : i32
    return %c0_i32, %c0_i32_0 : i32, i32
  }
  func.func @transform_5(%arg0: i32) -> (i32, i32) {
    %c0_i32 = arith.constant 0 : i32
    %c0_i32_0 = arith.constant 0 : i32
    %c0_i32_1 = arith.constant 0 : i32
    return %c0_i32, %c0_i32_0 : i32, i32
  }
  func.func @transform_6(%arg0: i32) -> (i32, i32) {
    %c0_i32 = arith.constant 0 : i32
    %c0_i32_0 = arith.constant 0 : i32
    %c0_i32_1 = arith.constant 0 : i32
    return %c0_i32, %c0_i32_0 : i32, i32
  }
  func.func @transform_7(%arg0: i32) -> (i32, i32) {
    %c0_i32 = arith.constant 0 : i32
    %c0_i32_0 = arith.constant 0 : i32
    %c0_i32_1 = arith.constant 0 : i32
    return %c0_i32, %c0_i32_0 : i32, i32
  }
  func.func @transform_8(%arg0: i32) -> (i32, i32) {
    %c0_i32 = arith.constant 0 : i32
    %c0_i32_0 = arith.constant 0 : i32
    %c0_i32_1 = arith.constant 0 : i32
    return %c0_i32, %c0_i32_0 : i32, i32
  }
  func.func @transform_9(%arg0: i32) -> (i32, i32) {
    %c0_i32 = arith.constant 0 : i32
    %c0_i32_0 = arith.constant 0 : i32
    %c0_i32_1 = arith.constant 0 : i32
    return %c0_i32, %c0_i32_0 : i32, i32
  }
  func.func @transform_10(%arg0: i32) -> (i32, i32) {
    %c0_i32 = arith.constant 0 : i32
    %c0_i32_0 = arith.constant 0 : i32
    %c0_i32_1 = arith.constant 0 : i32
    return %c0_i32, %c0_i32_0 : i32, i32
  }
  func.func @transform_11(%arg0: i32) -> (i32, i32) {
    %c0_i32 = arith.constant 0 : i32
    %c0_i32_0 = arith.constant 0 : i32
    %c0_i32_1 = arith.constant 0 : i32
    return %c0_i32, %c0_i32_0 : i32, i32
  }
  func.func @transform_12(%arg0: i32) -> (i32, i32) {
    %c0_i32 = arith.constant 0 : i32
    %c0_i32_0 = arith.constant 0 : i32
    %c0_i32_1 = arith.constant 0 : i32
    return %c0_i32, %c0_i32_0 : i32, i32
  }
  func.func @transform_13(%arg0: i32) -> (i32, i32) {
    %c0_i32 = arith.constant 0 : i32
    %c0_i32_0 = arith.constant 0 : i32
    %c0_i32_1 = arith.constant 0 : i32
    return %c0_i32, %c0_i32_0 : i32, i32
  }
  func.func @transform_14(%arg0: i32) -> (i32, i32) {
    %c0_i32 = arith.constant 0 : i32
    %c0_i32_0 = arith.constant 0 : i32
    %c0_i32_1 = arith.constant 0 : i32
    return %c0_i32, %c0_i32_0 : i32, i32
  }
  func.func @transform_15(%arg0: i32) -> (i32, i32) {
    %c0_i32 = arith.constant 0 : i32
    %c0_i32_0 = arith.constant 0 : i32
    %c0_i32_1 = arith.constant 0 : i32
    return %c0_i32, %c0_i32_0 : i32, i32
  }
  func.func @transform_16(%arg0: i32) -> (i32, i32) {
    %c0_i32 = arith.constant 0 : i32
    %c0_i32_0 = arith.constant 0 : i32
    %c0_i32_1 = arith.constant 0 : i32
    return %c0_i32, %c0_i32_0 : i32, i32
  }
  func.func @transform_17(%arg0: i32) -> (i32, i32) {
    %c0_i32 = arith.constant 0 : i32
    %c0_i32_0 = arith.constant 0 : i32
    %c0_i32_1 = arith.constant 0 : i32
    return %c0_i32, %c0_i32_0 : i32, i32
  }
  func.func @transform_18(%arg0: i32) -> (i32, i32) {
    %c0_i32 = arith.constant 0 : i32
    %c0_i32_0 = arith.constant 0 : i32
    %c0_i32_1 = arith.constant 0 : i32
    return %c0_i32, %c0_i32_0 : i32, i32
  }
  func.func @transform_19(%arg0: i32) -> (i32, i32, i32) {
    %c0_i32 = arith.constant 0 : i32
    %c0_i32_0 = arith.constant 0 : i32
    %c0_i32_1 = arith.constant 0 : i32
    return %arg0, %c0_i32, %c0_i32_0 : i32, i32, i32
  }
}

</mosaic_0001>

<bundles_post_ra>
// kernel: deepconvnet_forward.1
= control target key start
LH: loop header
LB: loop body
LE: loop exit
PB: predicated region body
PF: predicated region fallthrough
CT: control target
= control target key end

     0   :  { %s14055_s0 = inlined_call_operand.vmem [shape: bf16[2,768,10], index: 0, kind: input, shape index: {}]   ;;  %s14056_s1 = inlined_call_operand.vmem [shape: bf16[2,768,10], index: 1, kind: input, shape index: {}]   ;;  %s14057_s2 = inlined_call_operand.vmem [shape: bf16[10,128], index: 2, kind: input, shape index: {}]   ;;  %s14058_s3 = inlined_call_operand.vmem [shape: f32[1,128], index: 3, kind: input, shape index: {}]   ;;  %s14059_s4 = inlined_call_operand.vmem [shape: bf16[640,128], index: 4, kind: input, shape index: {}]   ;;  %s14060_s5 = inlined_call_operand.vmem [shape: f32[1,128], index: 5, kind: input, shape index: {}]   ;;  %s14061_s6 = inlined_call_operand.vmem [shape: bf16[640,128], index: 6, kind: input, shape index: {}]   ;;  %s14062_s7 = inlined_call_operand.vmem [shape: f32[1,128], index: 7, kind: input, shape index: {}]   ;;  %s14063_s8 = inlined_call_operand.vmem [shape: bf16[640,256], index: 8, kind: input, shape index: {}]   ;;  %s14064_s9 = inlined_call_operand.vmem [shape: f32[1,256], index: 9, kind: input, shape index: {}]   ;;  %s14065_s10 = inlined_call_operand.vmem [shape: bf16[64,128], index: 10, kind: input, shape index: {}]   ;;  %s14066_s11 = inlined_call_operand.vmem [shape: bf16[64,128], index: 11, kind: input, shape index: {}]   ;;  %s14067_s12 = inlined_call_operand.vmem [shape: bf16[96,180], index: 12, kind: input, shape index: {}]   ;;  %s14068_s13 = inlined_call_operand.vmem [shape: bf16[96,180], index: 13, kind: input, shape index: {}]   ;;  %s14069_s14 = inlined_call_operand.vmem [shape: bf16[48,86], index: 14, kind: input, shape index: {}]   ;;  %s14070_s15 = inlined_call_operand.vmem [shape: bf16[48,86], index: 15, kind: input, shape index: {}]   ;;  %s14071_s16 = inlined_call_operand.vmem [shape: f32[48,256], index: 16, kind: input, shape index: {}]   ;;  %s14072_s17 = inlined_call_operand.vmem [shape: f32[48,256], index: 17, kind: input, shape index: {}]   ;;  %s14073_s18 = inlined_call_operand.vmem [shape: f32[1,128], index: 18, kind: input, shape index: {}]   ;;  %s14074_s19 = inlined_call_operand.vmem [shape: f32[2,2,128], index: 19, kind: output, shape index: {}]  }
   0x1   :  { %14091 = sst [smem:[#allocation5_spill]] %s14055_s0  ;;  %s11729_s0 = smov 0  }
   0x2   :  { %14092 = sst [smem:[#allocation6_spill]] %s14056_s1 }
   0x3   :  { %14093 = sst [smem:[#allocation7_spill]] %s14057_s2 }
   0x4   :  { %14094 = sst [smem:[#allocation8_spill]] %s14058_s3 }
   0x5 LB: > { %s8983_s30 = sadd.s32 4294967295, %s11620_s0   ;;  %p8987_p0 = scmp.ge.s32.totalorder %s11620_s0, 1  ;;  %s11620_s0 = sphi %s11729_s0, %s29_s0  }
   0x6   : > { %p547_p1 = scmp.lt.s32.totalorder %s11620_s0, 3 }
   0x8   : > { %p548_p2 = pnand %p8987_p0, %p547_p1 }
   0x9   : > { %p607_p3 = scmp.lt.s32.totalorder (!%p548_p2), %s8983_s30, 1  ;;  %v14075_v0 = vlaneseq (!%p548_p2)  ;;  %v11626_v1 = vmov (!%p548_p2), 0   ;;  %v11627_v3 = vmov (!%p548_p2), 0.0   ;;  %s14095_s25 = sld [smem:[#allocation5_spill]] (!%p548_p2) }
   0xa   : > { %551 = sbr.rel (%p548_p2) target bundleno = 3386 (0xd3a), region = 96  ;;  %622 = vst [vmem:[#allocation2 + $0xc0] sm:$0xff] (!%p548_p2), %v11626_v1  ;;  %s14096_s28 = sld [smem:[#allocation6_spill]] (!%p548_p2) }
   0xb   : > { %v624_v2 = vand.u32 (!%p548_p2), 127, %v14075_v0 }
   0xd   : > { %vm625_vm0 = vcmp.eq.s32.totalorder (!%p548_p2), %v624_v2, 0  ;;  %vm628_vm1 = vcmp.eq.s32.totalorder (!%p548_p2), %v624_v2, 1 }
   0xe   : > { %v11743_v4 = vsel (!%p548_p2), %vm625_vm0, 1.0, %v11627_v3  ;;  %v11745_v5 = vsel (!%p548_p2), %vm628_vm1, 1.0, %v11627_v3 }
  0x11   : > { %s14116_s30 = smov (!%p607_p3, %s8983_s30), 1 }
  0x12   : > { %s11187_s20 = smul.u32 384, %s14116_s30  ;;  %s8990_s21 = sshll.u32 %s14116_s30, 1 }
  0x13   : > { %s11741_s2 = scalar_lea.vmem %s14074_s19, %s8990_s21  ;;  %s11757_s30 = smov 0  }
  0x14   : > { %s11750_s3 = scalar_lea.vmem %s14095_s25, %s11187_s20  ;;  %s11755_s29 = scalar_lea.vmem %s14096_s28, %s11187_s20 }
  0x15 LB: >> { %s14097_s22 = sld [smem:[#allocation7_spill]]  ;;  %vm731_vm2 = vcmask 1044480   ;;  %s11770_s20 = smul.u32 384, %s11624_s30  ;;  %vm706_vm3 = vcmask 80896   ;;  %v11248_v44 = vld [vmem:[%s14059_s4 + $0x40] sm:$0xff]   ;;  %v11251_v49 = vld [vmem:[%s14059_s4 + $0x48] sm:$0xff]   ;;  %s11624_s30 = sphi %s11757_s30, %s636_s30  }
  0x16   : >> { %v11254_v50 = vld [vmem:[%s14059_s4 + $0x50] sm:$0xff]   ;;  %v11257_v53 = vld [vmem:[%s14059_s4 + $0x58] sm:$0xff]   ;;  %v11260_v56 = vld [vmem:[%s14059_s4 + $0x60] sm:$0xff]   ;;  %vm1989_vm4 = vsmask.f32 7424  ;;  %vm2382_vm5 = vcmask 1046528  }
  0x17   : >> { %s641_s23 = sshra.s32 %s11770_s20, 3  ;;  %s1081_s26 = sadd.s32 128, %s11770_s20  ;;  %v11261_v59 = vld [vmem:[%s14059_s4 + $0x68] sm:$0xff]   ;;  %v11262_v62 = vld [vmem:[%s14059_s4 + $0x70] sm:$0xff]   ;;  %v11263_v63 = vld [vmem:[%s14059_s4 + $0x78] sm:$0xff]   ;;  %vm2820_vm7 = vcmask 1045504  }
  0x18   : >> { %s8993_s24 = sshll.u32 %s641_s23, 2  ;;  %s1082_s28 = sshra.s32 %s1081_s26, 3  ;;  %v11917_v1 = vld [vmem:[%s14059_s4] sm:$0xff]   ;;  %vm2586_vm6 = vsmask.f32 6400  ;;  %vm7085_vm8 = vcmask 424960  }
  0x19   : >> { %s644_s25 = scalar_lea.vmem %s11750_s3, %s8993_s24  ;;  %s11786_s27 = scalar_lea.vmem %s11755_s29, %s8993_s24  ;;  %vm7104_vm9 = vcmask 1041408   ;;  %vm8591_vm10 = vcmask 1042432   ;;  %vm8581_vm11 = vcmask 703488  }
  0x1a   : >> { %v11208_v8 = vld [vmem:[%s644_s25] sm:$0xff]   ;;  %v11209_v9 = vld [vmem:[%s644_s25 + $0x8] sm:$0xff]   ;;  %v11210_v10 = vld [vmem:[%s644_s25 + $0x10] sm:$0xff]   ;;  %s9029_s21 = sshll.u32 %s1082_s28, 2  ;;  %s1506_s23 = sadd.s32 256, %s11770_s20 }
  0x1b   : >> { %v11207_v6 = vld [vmem:[%s14097_s22] sm:$0x1f]   ;;  %9867 = vmatprep.mubr.msk.bf16.mxu1 %vm706_vm3, %v11208_v8  ;;  %v11211_v11 = vld [vmem:[%s644_s25 + $0x18] sm:$0xff]   ;;  %s11791_s1 = scalar_lea.vmem %s11750_s3, %s9029_s21  ;;  %v11213_v13 = vld [vmem:[%s644_s25 + $0x28] sm:$0xff]   ;;  %s11795_s22 = scalar_lea.vmem %s11755_s29, %s9029_s21 }
  0x1c   : >> { %11181 = vmatprep.subr.msk.bf16.mxu1 %vm731_vm2, %v11207_v6  ;;  %v11767_v7 = vsel %vm731_vm2, %v11207_v6, 0  ;;  %11183 = vmatprep.subr.msk.bf16.mxu0 %vm731_vm2, %v11207_v6  ;;  %v11212_v12 = vld [vmem:[%s644_s25 + $0x20] sm:$0xff]   ;;  %v11214_v14 = vld [vmem:[%s644_s25 + $0x30] sm:$0xff]   ;;  %v11225_v16 = vld [vmem:[%s11791_s1 + $0x8] sm:$0xff]   ;;  %s1507_s24 = sshra.s32 %s1506_s23, 3  ;;  %s14098_s21 = sld [smem:[#allocation8_spill]] }
  0x1d   : >> { %9866 = vmatpush3.bf16.msra.mxu1 %v11767_v7  ;;  %9902 = vmatpush3.bf16.msra.mxu0 %v11767_v7  ;;  %v11224_v15 = vld [vmem:[%s11791_s1] sm:$0xff]   ;;  %v11228_v17 = vld [vmem:[%s11791_s1 + $0x10] sm:$0xff]   ;;  %v11215_v18 = vld [vmem:[%s644_s25 + $0x38] sm:$0xff]   ;;  %s9063_s25 = sshll.u32 %s1507_s24, 2 }
  0x1e   : >> { %11182 = vmatprep.subr.msk.bf16.mxu1 %vm731_vm2, %v11207_v6  ;;  %11185 = vmatprep.subr.msk.bf16.mxu0 %vm731_vm2, %v11207_v6  ;;  %v11216_v19 = vld [vmem:[%s11786_s27] sm:$0xff]   ;;  %v11230_v20 = vld [vmem:[%s11791_s1 + $0x18] sm:$0xff]   ;;  %v11217_v21 = vld [vmem:[%s11786_s27 + $0x8] sm:$0xff]   ;;  %s11853_s26 = scalar_lea.vmem %s11750_s3, %s9063_s25 }
  0x1f   : >> { %9903 = vmatprep.mubr.msk.bf16.mxu0 %vm706_vm3, %v11224_v15  ;;  %v11218_v22 = vld [vmem:[%s11786_s27 + $0x10] sm:$0xff]   ;;  %v11219_v23 = vld [vmem:[%s11786_s27 + $0x18] sm:$0xff]   ;;  %v11220_v24 = vld [vmem:[%s11786_s27 + $0x20] sm:$0xff]  }
  0x20   : >> { %9868 = vmatmul.mubr.msk.bf16.vlgmr.msra.gmra.mrb[0].mxu1 %vm706_vm3, %v11209_v9  ;;  %9904 = vmatmul.mubr.msk.bf16.vlgmr.msra.gmra.mrb[0].mxu0 %vm706_vm3, %v11225_v16  ;;  %v11221_v25 = vld [vmem:[%s11786_s27 + $0x28] sm:$0xff]   ;;  %v11222_v26 = vld [vmem:[%s11786_s27 + $0x30] sm:$0xff]   ;;  %v11223_v27 = vld [vmem:[%s11786_s27 + $0x38] sm:$0xff]   ;;  %s11856_s27 = scalar_lea.vmem %s11755_s29, %s9063_s25 }
  0x21   : >> { %9871 = vmatprep.mubr.msk.bf16.mxu1 %vm706_vm3, %v11210_v10  ;;  %9884 = vmatpush3.bf16.msra.mxu1 %v11767_v7  ;;  %v11226_v28 = vld [vmem:[%s11795_s22] sm:$0xff]   ;;  %v11227_v29 = vld [vmem:[%s11795_s22 + $0x8] sm:$0xff]   ;;  %v11229_v30 = vld [vmem:[%s11795_s22 + $0x10] sm:$0xff]  }
  0x22   : >> { %11184 = vmatprep.subr.msk.bf16.mxu1 %vm731_vm2, %v11207_v6  ;;  %9938 = vmatpush3.bf16.msra.mxu0 %v11767_v7  ;;  %v11231_v31 = vld [vmem:[%s11795_s22 + $0x18] sm:$0xff]   ;;  %v11232_v32 = vld [vmem:[%s11791_s1 + $0x20] sm:$0xff]   ;;  %v11234_v34 = vld [vmem:[%s11791_s1 + $0x28] sm:$0xff]  }
  0x23   : >> { %9907 = vmatprep.mubr.msk.bf16.mxu0 %vm706_vm3, %v11228_v17  ;;  %v11233_v33 = vld [vmem:[%s11795_s22 + $0x20] sm:$0xff]   ;;  %v11235_v35 = vld [vmem:[%s11795_s22 + $0x28] sm:$0xff]   ;;  %v11236_v36 = vld [vmem:[%s11791_s1 + $0x30] sm:$0xff]   ;;  %9973 = vmatprep.subr.bf16.mxu0 %v11248_v44 }
  0x24   : >> { %v11237_v37 = vld [vmem:[%s11795_s22 + $0x30] sm:$0xff]   ;;  %v11238_v38 = vld [vmem:[%s11791_s1 + $0x38] sm:$0xff]   ;;  %v11240_v40 = vld [vmem:[%s11853_s26] sm:$0xff]   ;;  %s8898_s1 = scalar_lea.vmem %s11741_s2, %s11624_s30  ;;  %s636_s30 = sadd.s32 1, %s11624_s30  }
  0x25   : >> { %v11239_v39 = vld [vmem:[%s11795_s22 + $0x38] sm:$0xff]   ;;  %v11241_v41 = vld [vmem:[%s11856_s27] sm:$0xff]   ;;  %v11242_v42 = vld [vmem:[%s11853_s26 + $0x8] sm:$0xff]   ;;  %p633_p4 = scmp.ge.s32.totalorder %s636_s30, 2  }
  0x26   : >> { %v11243_v43 = vld [vmem:[%s11856_s27 + $0x8] sm:$0xff]   ;;  %v11244_v45 = vld [vmem:[%s11853_s26 + $0x10] sm:$0xff]   ;;  %v11246_v47 = vld [vmem:[%s11853_s26 + $0x18] sm:$0xff]  }
  0x27   : >> { %v11245_v46 = vld [vmem:[%s11856_s27 + $0x10] sm:$0xff]   ;;  %v11247_v48 = vld [vmem:[%s11856_s27 + $0x18] sm:$0xff]   ;;  %v11249_v51 = vld [vmem:[%s11853_s26 + $0x20] sm:$0xff]  }
  0x28   : >> { %9872 = vmatmul.mubr.msk.bf16.gmra.mrb[4].mxu1 %vm706_vm3, %v11211_v11  ;;  %9908 = vmatmul.mubr.msk.bf16.gmra.mrb[4].mxu0 %vm706_vm3, %v11230_v20  ;;  %v11250_v52 = vld [vmem:[%s11856_s27 + $0x20] sm:$0xff]   ;;  %v11252_v54 = vld [vmem:[%s11853_s26 + $0x28] sm:$0xff]   ;;  %v11255_v57 = vld [vmem:[%s11853_s26 + $0x30] sm:$0xff]  }
  0x29   : >> { %9875 = vmatprep.mubr.msk.bf16.mxu1 %vm706_vm3, %v11212_v12  ;;  %9911 = vmatprep.mubr.msk.bf16.mxu0 %vm706_vm3, %v11232_v32  ;;  %v11253_v55 = vld [vmem:[%s11856_s27 + $0x28] sm:$0xff]   ;;  %v11256_v58 = vld [vmem:[%s11856_s27 + $0x30] sm:$0xff]   ;;  %v11258_v60 = vld [vmem:[%s11853_s26 + $0x38] sm:$0xff]  }
  0x2a   : >> { %v11259_v61 = vld [vmem:[%s11856_s27 + $0x38] sm:$0xff]  }
  0x30   : >> { %9876 = vmatmul.mubr.msk.bf16.gmra.mrb[8].mxu1 %vm706_vm3, %v11213_v13  ;;  %9912 = vmatmul.mubr.msk.bf16.gmra.mrb[8].mxu0 %vm706_vm3, %v11234_v34 }
  0x31   : >> { %9879 = vmatprep.mubr.msk.bf16.mxu1 %vm706_vm3, %v11214_v14  ;;  %9915 = vmatprep.mubr.msk.bf16.mxu0 %vm706_vm3, %v11236_v36 }
  0x38   : >> { %9880 = vmatmul.mubr.msk.bf16.gmra.mrb[12].mxu1 %vm706_vm3, %v11215_v18  ;;  %9916 = vmatmul.mubr.msk.bf16.gmra.mrb[12].mxu0 %vm706_vm3, %v11238_v38 }
  0x39   : >> { %9885 = vmatprep.mubr.msk.bf16.mxu1 %vm706_vm3, %v11216_v19  ;;  %9939 = vmatprep.mubr.msk.bf16.mxu0 %vm706_vm3, %v11240_v40 }
  0x40   : >> { %9886 = vmatmul.mubr.msk.bf16.vlgmr.msra.gmra.mrb[16].mxu1 %vm706_vm3, %v11217_v21  ;;  %9940 = vmatmul.mubr.msk.bf16.vlgmr.msra.gmra.mrb[16].mxu0 %vm706_vm3, %v11242_v42 }
  0x41   : >> { %9889 = vmatprep.mubr.msk.bf16.mxu1 %vm706_vm3, %v11218_v22  ;;  %9920 = vmatpush3.bf16.msra.mxu1 %v11767_v7 }
  0x42   : >> { %11186 = vmatprep.subr.msk.bf16.mxu1 %vm731_vm2, %v11207_v6  ;;  %9974 = vmatpush3.bf16.msra.mxu0 %v11248_v44 }
  0x43   : >> { %9943 = vmatprep.mubr.msk.bf16.mxu0 %vm706_vm3, %v11244_v45  ;;  %9975 = vmatprep.subr.bf16.mxu0 %v11251_v49 }
  0x46   : >> { %9976 = vmatpush3.bf16.msra.mxu0 %v11251_v49 }
  0x47   : >> { %9977 = vmatprep.subr.bf16.mxu0 %v11254_v50 }
  0x48   : >> { %9890 = vmatmul.mubr.msk.bf16.gmra.mrb[20].mxu1 %vm706_vm3, %v11219_v23  ;;  %9944 = vmatmul.mubr.msk.bf16.gmra.mrb[20].mxu0 %vm706_vm3, %v11246_v47 }
  0x49   : >> { %9893 = vmatprep.mubr.msk.bf16.mxu1 %vm706_vm3, %v11220_v24  ;;  %9947 = vmatprep.mubr.msk.bf16.mxu0 %vm706_vm3, %v11249_v51 }
  0x4a   : >> { %9978 = vmatpush3.bf16.msra.mxu0 %v11254_v50 }
  0x4b   : >> { %9979 = vmatprep.subr.bf16.mxu0 %v11257_v53 }
  0x4e   : >> { %9980 = vmatpush3.bf16.msra.mxu0 %v11257_v53 }
  0x4f   : >> { %9981 = vmatprep.subr.bf16.mxu0 %v11260_v56 }
  0x50   : >> { %9894 = vmatmul.mubr.msk.bf16.gmra.mrb[24].mxu1 %vm706_vm3, %v11221_v25  ;;  %9948 = vmatmul.mubr.msk.bf16.gmra.mrb[24].mxu0 %vm706_vm3, %v11252_v54 }
  0x51   : >> { %9897 = vmatprep.mubr.msk.bf16.mxu1 %vm706_vm3, %v11222_v26  ;;  %9951 = vmatprep.mubr.msk.bf16.mxu0 %vm706_vm3, %v11255_v57 }
  0x52   : >> { %9982 = vmatpush3.bf16.msra.mxu0 %v11260_v56 }
  0x53   : >> { %9983 = vmatprep.subr.bf16.mxu0 %v11261_v59 }
  0x56   : >> { %9984 = vmatpush3.bf16.msra.mxu0 %v11261_v59 }
  0x57   : >> { %9985 = vmatprep.subr.bf16.mxu0 %v11262_v62 }
  0x58   : >> { %9898 = vmatmul.mubr.msk.bf16.gmra.mrb[28].mxu1 %vm706_vm3, %v11223_v27  ;;  %9952 = vmatmul.mubr.msk.bf16.gmra.mrb[28].mxu0 %vm706_vm3, %v11258_v60 }
  0x59   : >> { %9921 = vmatprep.mubr.msk.bf16.mxu1 %vm706_vm3, %v11226_v28  ;;  %v11955_v28 = vld [vmem:[%s14098_s21] ss:$0 sm:$0xff] }
  0x5a   : >> { %9986 = vmatpush3.bf16.msra.mxu0 %v11262_v62 }
  0x5b   : >> { %9987 = vmatprep.subr.bf16.mxu0 %v11263_v63 }
  0x5e   : >> { %9988 = vmatpush3.bf16.msra.mxu0 %v11263_v63 }
  0x5f   : >> { %10005 = vmatprep.subr.bf16.mxu0 %v11917_v1 }
  0x60   : >> { %9922 = vmatmul.mubr.msk.bf16.vlgmr.msra.gmra.mrb[32].mxu1 %vm706_vm3, %v11227_v29 }
  0x61   : >> { %9925 = vmatprep.mubr.msk.bf16.mxu1 %vm706_vm3, %v11229_v30  ;;  %9956 = vmatpush3.bf16.msra.mxu1 %v11767_v7 }
  0x68   : >> { %9926 = vmatmul.mubr.msk.bf16.gmra.mrb[36].mxu1 %vm706_vm3, %v11231_v31 }
  0x69   : >> { %9929 = vmatprep.mubr.msk.bf16.mxu1 %vm706_vm3, %v11233_v33 }
  0x70   : >> { %9930 = vmatmul.mubr.msk.bf16.gmra.mrb[40].mxu1 %vm706_vm3, %v11235_v35 }
  0x71   : >> { %9933 = vmatprep.mubr.msk.bf16.mxu1 %vm706_vm3, %v11237_v37 }
  0x78   : >> { %9934 = vmatmul.mubr.msk.bf16.gmra.mrb[44].mxu1 %vm706_vm3, %v11239_v39 }
  0x79   : >> { %9957 = vmatprep.mubr.msk.bf16.mxu1 %vm706_vm3, %v11241_v41 }
  0x80   : >> { %9958 = vmatmul.mubr.msk.bf16.vlgmr.msra.gmra.mrb[48].mxu1 %vm706_vm3, %v11243_v43 }
  0x81   : >> { %9961 = vmatprep.mubr.msk.bf16.mxu1 %vm706_vm3, %v11245_v46 }
  0x88   : >> { %9962 = vmatmul.mubr.msk.bf16.gmra.mrb[52].mxu1 %vm706_vm3, %v11247_v48 }
  0x89   : >> { %9965 = vmatprep.mubr.msk.bf16.mxu1 %vm706_vm3, %v11250_v52 }
  0x90   : >> { %9966 = vmatmul.mubr.msk.bf16.gmra.mrb[56].mxu1 %vm706_vm3, %v11253_v55 }
  0x91   : >> { %9969 = vmatprep.mubr.msk.bf16.mxu1 %vm706_vm3, %v11256_v58 }
  0x98   : >> { %9970 = vmatmul.mubr.msk.bf16.gmra.mrb[60].mxu1 %vm706_vm3, %v11259_v61 }
  0xf3   : >> { %v9869_v2 = vpop.f32.mrb[0].mxu1  ;;  %v11922_v13 = vpop.f32.mrb[0].mxu0 }
  0xf4   : >> { %v769_v3 = vpop.f32.mrb[1].mxu1  ;;  %v11926_v15 = vpop.f32.mrb[1].mxu0 }
  0xf5   : >> { %v9870_v6 = vpop.f32.mrb[2].mxu1  ;;  %v11930_v17 = vpop.f32.mrb[2].mxu0 }
  0xf6   : >> { %v772_v7 = vpop.f32.mrb[3].mxu1  ;;  %v11934_v19 = vpop.f32.mrb[3].mxu0 }
  0xfb   : >> { %v9873_v8 = vpop.f32.mrb[4].mxu1  ;;  %v11938_v21 = vpop.f32.mrb[4].mxu0 }
  0xfc   : >> { %v785_v9 = vpop.f32.mrb[5].mxu1  ;;  %v11942_v23 = vpop.f32.mrb[5].mxu0 }
  0xfd   : >> { %v9874_v10 = vpop.f32.mrb[6].mxu1  ;;  %v11946_v25 = vpop.f32.mrb[6].mxu0 }
  0xfe   : >> { %v788_v11 = vpop.f32.mrb[7].mxu1  ;;  %v11950_v27 = vpop.f32.mrb[7].mxu0 }
 0x103   : >> { %v11920_v12 = vpop.f32.mrb[8].mxu1 }
 0x104   : >> { %v11924_v14 = vpop.f32.mrb[9].mxu1 }
 0x105   : >> { %v11928_v16 = vpop.f32.mrb[10].mxu1 }
 0x106   : >> { %v11932_v18 = vpop.f32.mrb[11].mxu1 }
 0x10b   : >> { %v11936_v20 = vpop.f32.mrb[12].mxu1 }
 0x10c   : >> { %v11940_v22 = vpop.f32.mrb[13].mxu1 }
 0x10d   : >> { %v11944_v24 = vpop.f32.mrb[14].mxu1 }
 0x10e   : >> { %v11948_v26 = vpop.f32.mrb[15].mxu1 }
 0x113   : >> { %v9887_v29 = vpop.f32.mrb[16].mxu1 }
 0x114   : >> { %v1013_v30 = vmax.f32 %v9869_v2, %v9887_v29  ;;  %v948_v31 = vpop.f32.mrb[17].mxu1 }
 0x115   : >> { %v1011_v32 = vmax.f32 %v769_v3, %v948_v31  ;;  %v9888_v33 = vpop.f32.mrb[18].mxu1 }
 0x116   : >> { %v1035_v34 = vadd.f32 %v11955_v28, %v1013_v30  ;;  %v1014_v35 = vmax.f32 %v9870_v6, %v9888_v33  ;;  %v951_v36 = vpop.f32.mrb[19].mxu1 }
 0x117   : >> { %v1033_v37 = vadd.f32 %v11955_v28, %v1011_v32  ;;  %v1012_v38 = vmax.f32 %v772_v7, %v951_v36 }
 0x118   : >> { %v1036_v39 = vadd.f32 %v11955_v28, %v1014_v35  ;;  %v1051_v41 = vmax.f32 %v1035_v34, 0.0 }
 0x119   : >> { %v1034_v40 = vadd.f32 %v11955_v28, %v1012_v38  ;;  %v1049_v43 = vmax.f32 %v1033_v37, 0.0 }
 0x11a   : >> { %v1052_v42 = vmax.f32 %v1036_v39, 0.0 }
 0x11b   : >> { %v1050_v44 = vmax.f32 %v1034_v40, 0.0  ;;  %v9891_v45 = vpop.f32.mrb[20].mxu1 }
 0x11c   : >> { %v11961_v46 = vpack.c.bf16 %v1052_v42, %v1051_v41  ;;  %v1017_v47 = vmax.f32 %v9873_v8, %v9891_v45  ;;  %v964_v48 = vpop.f32.mrb[21].mxu1 }
 0x11d   : >> { %v11963_v49 = vpack.c.bf16 %v1050_v44, %v1049_v43  ;;  %v1015_v50 = vmax.f32 %v785_v9, %v964_v48  ;;  %v9892_v51 = vpop.f32.mrb[22].mxu1 }
 0x11e   : >> { %v1039_v52 = vadd.f32 %v11955_v28, %v1017_v47  ;;  %v1018_v53 = vmax.f32 %v9874_v10, %v9892_v51  ;;  %v967_v54 = vpop.f32.mrb[23].mxu1  ;;  %v1998_v55 = vshll.u32 %v11961_v46, 16  ;;  %v2002_v56 = vshrl.u32 %v11961_v46, 16 }
 0x11f   : >> { %1073 = vst [vmem:[#allocation2] sm:$0xff] %v11963_v49  ;;  %v1037_v57 = vadd.f32 %v11955_v28, %v1015_v50  ;;  %v1016_v58 = vmax.f32 %v788_v11, %v967_v54  ;;  %v1993_v59 = vshll.u32 %v11963_v49, 16  ;;  %v1991_v62 = vshrl.u32 %v11963_v49, 16 }
 0x120   : >> { %v1040_v60 = vadd.f32 %v11955_v28, %v1018_v53  ;;  %v2595_v2 = vrot.slane %v2002_v56, 1  ;;  %v1055_v3 = vmax.f32 %v1039_v52, 0.0  ;;  %v2596_v7 = vrot.slane %v1998_v55, 2  ;;  %v11265_v53 = vld [vmem:[%s14059_s4 + $0x8] sm:$0xff]  }
 0x121   : >> { %v1038_v61 = vadd.f32 %v11955_v28, %v1016_v58  ;;  %v1995_v63 = vrot.slane %v1993_v59, 1  ;;  %v1053_v8 = vmax.f32 %v1037_v57, 0.0  ;;  %v2000_v30 = vrot.slane %v1998_v55, 1 }
 0x122   : >> { %v1056_v6 = vmax.f32 %v1040_v60, 0.0  ;;  %v11977_v33 = vor.u32 %v2596_v7, %v2595_v2  ;;  %v2384_v45 = vrot.slane %v11961_v46, 1 }
 0x123   : >> { %v1054_v9 = vmax.f32 %v1038_v61, 0.0  ;;  %v9895_v10 = vpop.f32.mrb[24].mxu1  ;;  %v1996_v29 = vor.u32 %v1995_v63, %v1991_v62 }
 0x124   : >> { %v11974_v11 = vpack.c.bf16 %v1056_v6, %v1055_v3  ;;  %v1021_v31 = vmax.f32 %v11920_v12, %v9895_v10  ;;  %v980_v32 = vpop.f32.mrb[25].mxu1 }
 0x125   : >> { %v11979_v34 = vpack.c.bf16 %v1054_v9, %v1053_v8  ;;  %v1019_v35 = vmax.f32 %v11924_v14, %v980_v32  ;;  %v9896_v36 = vpop.f32.mrb[26].mxu1  ;;  %v2001_v37 = vsel %vm1989_vm4, %v1996_v29, %v2000_v30  ;;  %v2004_v14 = vor.u32 %v2002_v56, %v2000_v30 }
 0x126   : >> { %v1043_v38 = vadd.f32 %v11955_v28, %v1021_v31  ;;  %v1022_v39 = vmax.f32 %v11928_v16, %v9896_v36  ;;  %v983_v40 = vpop.f32.mrb[27].mxu1  ;;  %9989 = vmatprep.mubr.bf16.mxu0 %v2001_v37  ;;  %v2014_v41 = vshll.u32 %v11974_v11, 16  ;;  %v2388_v59 = vrot.slane %v11974_v11, 1 }
 0x127   : >> { %v1041_v12 = vadd.f32 %v11955_v28, %v1019_v35  ;;  %v1020_v42 = vmax.f32 %v11932_v18, %v983_v40  ;;  %v2006_v43 = vshll.u32 %v11979_v34, 16  ;;  %v2010_v50 = vshrl.u32 %v11979_v34, 16 }
 0x128   : >> { %v1044_v44 = vadd.f32 %v11955_v28, %v1022_v39  ;;  %v1059_v47 = vmax.f32 %v1043_v38, 0.0  ;;  %v2016_v18 = vrot.slane %v2014_v41, 1  ;;  %v2386_v54 = vrot.slane %v11979_v34, 1 }
 0x129   : >> { %v1042_v48 = vadd.f32 %v11955_v28, %v1020_v42  ;;  %v2008_v16 = vrot.slane %v2006_v43, 1  ;;  %v1057_v51 = vmax.f32 %v1041_v12, 0.0  ;;  %v2018_v29 = vshrl.u32 %v11974_v11, 16 }
 0x12a   : >> { %v1060_v52 = vmax.f32 %v1044_v44, 0.0  ;;  %v12009_v63 = vsel %vm2382_vm5, %v2384_v45, %v2386_v54  ;;  %v12017_v8 = vsel %vm2382_vm5, %v2386_v54, %v2388_v59 }
 0x12b   : >> { %v1058_v55 = vmax.f32 %v1042_v48, 0.0  ;;  %v9899_v56 = vpop.f32.mrb[28].mxu1  ;;  %v2009_v57 = vsel %vm1989_vm4, %v2004_v14, %v2008_v16  ;;  %v2012_v58 = vor.u32 %v2010_v50, %v2008_v16  ;;  %v11267_v14 = vld [vmem:[%s14059_s4 + $0x18] sm:$0xff]  }
 0x12c   : >> { %v12003_v60 = vpack.c.bf16 %v1060_v52, %v1059_v47  ;;  %v1025_v61 = vmax.f32 %v11936_v20, %v9899_v56  ;;  %v996_v62 = vpop.f32.mrb[29].mxu1  ;;  %9990 = vmatmul.mubr.bf16.vlgmr.msra.gmra.mrb[32].mxu0 %v2009_v57 }
 0x12d   : >> { %v12011_v2 = vpack.c.bf16 %v1058_v55, %v1057_v51  ;;  %v1023_v3 = vmax.f32 %v11940_v22, %v996_v62  ;;  %v9900_v6 = vpop.f32.mrb[30].mxu1  ;;  %10006 = vmatpush3.bf16.msra.mxu0 %v11917_v1  ;;  %v2017_v7 = vsel %vm1989_vm4, %v2012_v58, %v2016_v18  ;;  %v11266_v22 = vld [vmem:[%s14059_s4 + $0x10] sm:$0xff]  }
 0x12e   : >> { %v1047_v20 = vadd.f32 %v11955_v28, %v1025_v61  ;;  %v1026_v9 = vmax.f32 %v11944_v24, %v9900_v6  ;;  %v999_v10 = vpop.f32.mrb[31].mxu1  ;;  %9993 = vmatprep.mubr.bf16.mxu0 %v2017_v7  ;;  %10007 = vmatprep.subr.bf16.mxu0 %v11265_v53  ;;  %v2030_v1 = vshll.u32 %v12003_v60, 16  ;;  %v2020_v24 = vor.u32 %v2018_v29, %v2016_v18 }
 0x12f   : >> { %v1045_v30 = vadd.f32 %v11955_v28, %v1023_v3  ;;  %v1024_v31 = vmax.f32 %v11948_v26, %v999_v10  ;;  %v2022_v32 = vshll.u32 %v12011_v2, 16  ;;  %v2026_v36 = vshrl.u32 %v12011_v2, 16 }
 0x130   : >> { %v1048_v35 = vadd.f32 %v11955_v28, %v1026_v9  ;;  %v2390_v37 = vrot.slane %v12011_v2, 1  ;;  %v1063_v38 = vmax.f32 %v1047_v20, 0.0  ;;  %v2392_v12 = vrot.slane %v12003_v60, 1  ;;  %v11268_v20 = vld [vmem:[%s14059_s4 + $0x20] sm:$0xff]  }
 0x131   : >> { %v1046_v39 = vadd.f32 %v11955_v28, %v1024_v31  ;;  %10008 = vmatpush3.bf16.msra.mxu0 %v11265_v53  ;;  %v2024_v40 = vrot.slane %v2022_v32, 1  ;;  %v1061_v42 = vmax.f32 %v1045_v30, 0.0  ;;  %v2032_v44 = vrot.slane %v2030_v1, 1 }
 0x132   : >> { %v1064_v26 = vmax.f32 %v1048_v35, 0.0  ;;  %10009 = vmatprep.subr.bf16.mxu0 %v11266_v22  ;;  %v12042_v47 = vsel %vm2382_vm5, %v2388_v59, %v2390_v37  ;;  %v12048_v18 = vsel %vm2382_vm5, %v2390_v37, %v2392_v12  ;;  %v2034_v56 = vshrl.u32 %v12003_v60, 16 }
 0x133   : >> { %v1062_v48 = vmax.f32 %v1046_v39, 0.0  ;;  %v9923_v16 = vpop.f32.mrb[32].mxu1  ;;  %v2025_v51 = vsel %vm1989_vm4, %v2020_v24, %v2024_v40  ;;  %v2028_v52 = vor.u32 %v2026_v36, %v2024_v40  ;;  %v2599_v61 = vrot.slane %v2010_v50, 1 }
 0x134   : >> { %v12050_v53 = vpack.c.bf16 %v1064_v26, %v1063_v38  ;;  %v1444_v54 = vmax.f32 %v11922_v13, %v9923_v16  ;;  %v1379_v55 = vpop.f32.mrb[33].mxu1  ;;  %9994 = vmatmul.mubr.bf16.gmra.mrb[36].mxu0 %v2025_v51  ;;  %v2036_v13 = vor.u32 %v2034_v56, %v2032_v44  ;;  %v2603_v35 = vrot.slane %v2018_v29, 1 }
 0x135   : >> { %v12054_v57 = vpack.c.bf16 %v1062_v48, %v1061_v42  ;;  %v1442_v58 = vmax.f32 %v11926_v15, %v1379_v55  ;;  %v9924_v59 = vpop.f32.mrb[34].mxu1  ;;  %10010 = vmatpush3.bf16.msra.mxu0 %v11266_v22  ;;  %v2033_v62 = vsel %vm1989_vm4, %v2028_v52, %v2032_v44  ;;  %v11269_v42 = vld [vmem:[%s14059_s4 + $0x28] sm:$0xff]  }
 0x136   : >> { %v1460_v3 = vadd.f32 %v11955_v28, %v1444_v54  ;;  %v1445_v6 = vmax.f32 %v11930_v17, %v9924_v59  ;;  %v1382_v7 = vpop.f32.mrb[35].mxu1  ;;  %9997 = vmatprep.mubr.bf16.mxu0 %v2033_v62  ;;  %10011 = vmatprep.subr.bf16.mxu0 %v11267_v14  ;;  %v2046_v15 = vshll.u32 %v12050_v53, 16  ;;  %v2600_v17 = vrot.slane %v2006_v43, 2 }
 0x137   : >> { %v1458_v50 = vadd.f32 %v11955_v28, %v1442_v58  ;;  %v1443_v9 = vmax.f32 %v11934_v19, %v1382_v7  ;;  %v2038_v10 = vshll.u32 %v12054_v57, 16  ;;  %v2042_v30 = vshrl.u32 %v12054_v57, 16 }
 0x138   : >> { %v1461_v22 = vadd.f32 %v11955_v28, %v1445_v6  ;;  %v2394_v31 = vrot.slane %v12054_v57, 1  ;;  %v1476_v24 = vmax.f32 %v1460_v3, 0.0  ;;  %v2396_v39 = vrot.slane %v12050_v53, 1 }
 0x139   : >> { %v1459_v37 = vadd.f32 %v11955_v28, %v1443_v9  ;;  %10012 = vmatpush3.bf16.msra.mxu0 %v11267_v14  ;;  %v2040_v38 = vrot.slane %v2038_v10, 1  ;;  %v1474_v19 = vmax.f32 %v1458_v50, 0.0  ;;  %v12078_v43 = vrot.slane %v2046_v15, 1 }
 0x13a   : >> { %v1477_v40 = vmax.f32 %v1461_v22, 0.0  ;;  %10013 = vmatprep.subr.bf16.mxu0 %v11268_v20  ;;  %v12084_v29 = vsel %vm2382_vm5, %v2392_v12, %v2394_v31  ;;  %v12090_v16 = vsel %vm2382_vm5, %v2394_v31, %v2396_v39  ;;  %v2601_v55 = vor.u32 %v2600_v17, %v2599_v61 }
 0x13b   : >> { %v1475_v26 = vmax.f32 %v1459_v37, 0.0  ;;  %v9927_v44 = vpop.f32.mrb[36].mxu1  ;;  %v2041_v14 = vsel %vm1989_vm4, %v2036_v13, %v2040_v38  ;;  %v2044_v48 = vor.u32 %v2042_v30, %v2040_v38  ;;  %v2604_v3 = vrot.slane %v2014_v41, 2  ;;  %v11271_v38 = vld [vmem:[%s14059_s4 + $0x38] sm:$0xff]  }
 0x13c   : >> { %v1491_v51 = vpack.c.bf16 %v1477_v40, %v1476_v24  ;;  %v1448_v52 = vmax.f32 %v11938_v21, %v9927_v44  ;;  %v1395_v54 = vpop.f32.mrb[37].mxu1  ;;  %9998 = vmatmul.mubr.bf16.gmra.mrb[40].mxu0 %v2041_v14  ;;  %v2050_v61 = vshrl.u32 %v12050_v53, 16  ;;  %v2607_v13 = vrot.slane %v2026_v36, 1 }
 0x13d   : >> { %v1490_v58 = vpack.c.bf16 %v1475_v26, %v1474_v19  ;;  %v1446_v12 = vmax.f32 %v11942_v23, %v1395_v54  ;;  %v9928_v59 = vpop.f32.mrb[38].mxu1  ;;  %10014 = vmatpush3.bf16.msra.mxu0 %v11268_v20  ;;  %v2049_v62 = vsel %vm1989_vm4, %v2044_v48, %v12078_v43  ;;  %v11270_v23 = vld [vmem:[%s14059_s4 + $0x30] sm:$0xff]   ;;  %v2605_v50 = vor.u32 %v2604_v3, %v2603_v35 }
 0x13e   : >> { %1499 = vst [vmem:[#allocation2 + $0x48] sm:$0xff] %v1491_v51  ;;  %v1464_v6 = vadd.f32 %v11955_v28, %v1448_v52  ;;  %v1449_v21 = vmax.f32 %v11946_v25, %v9928_v59  ;;  %v1398_v7 = vpop.f32.mrb[39].mxu1  ;;  %10001 = vmatprep.mubr.bf16.mxu0 %v2049_v62  ;;  %10015 = vmatprep.subr.bf16.mxu0 %v11269_v42  ;;  %v2608_v22 = vrot.slane %v2022_v32, 2  ;;  %v2611_v31 = vrot.slane %v2034_v56, 1 }
 0x13f   : >> { %1498 = vst [vmem:[#allocation2 + $0x40] sm:$0xff] %v1490_v58  ;;  %v1462_v41 = vadd.f32 %v11955_v28, %v1446_v12  ;;  %v1447_v20 = vmax.f32 %v11950_v27, %v1398_v7  ;;  %v12110_v25 = vsel %vm2586_vm6, %v11977_v33, %v2601_v55  ;;  %v12119_v27 = vsel %vm2586_vm6, %v2601_v55, %v2605_v50 }
 0x140   : >> { %v1480_v9 = vmax.f32 %v1464_v6, 0.0  ;;  %v1465_v17 = vadd.f32 %v11955_v28, %v1449_v21  ;;  %v2612_v37 = vrot.slane %v2030_v1, 2  ;;  %v2609_v32 = vor.u32 %v2608_v22, %v2607_v13 }
 0x141   : >> { %v1478_v36 = vmax.f32 %v1462_v41, 0.0  ;;  %v1463_v24 = vadd.f32 %v11955_v28, %v1447_v20  ;;  %10016 = vmatpush3.bf16.msra.mxu0 %v11269_v42  ;;  %v2615_v19 = vrot.slane %v2042_v30, 1  ;;  %v2616_v40 = vrot.slane %v2038_v10, 2  ;;  %v9913_v30 = vpop.f32.mrb[8].mxu0 }
 0x142   : >> { %v1481_v35 = vmax.f32 %v1465_v17, 0.0  ;;  %10017 = vmatprep.subr.bf16.mxu0 %v11270_v23  ;;  %v2613_v26 = vor.u32 %v2612_v37, %v2611_v31  ;;  %v2619_v44 = vrot.slane %v2050_v61, 1  ;;  %v2620_v42 = vrot.slane %v2046_v15, 2  ;;  %v12140_v15 = vld [vmem:[%s14059_s4 + $0x80] sm:$0xff]  }
 0x143   : >> { %v1479_v56 = vmax.f32 %v1463_v24, 0.0  ;;  %v12129_v48 = vsel %vm2586_vm6, %v2605_v50, %v2609_v32  ;;  %v2617_v1 = vor.u32 %v2616_v40, %v2615_v19  ;;  %v2824_v10 = vrot.slane %v11979_v34, 2  ;;  %v9931_v55 = vpop.f32.mrb[40].mxu1 }
 0x144   : >> { %v1493_v14 = vpack.c.bf16 %v1481_v35, %v1480_v9  ;;  %v12132_v52 = vsel %vm2586_vm6, %v2609_v32, %v2613_v26  ;;  %v12134_v54 = vor.u32 %v2620_v42, %v2619_v44  ;;  %v2822_v59 = vrot.slane %v11961_v46, 2  ;;  %v1232_v35 = vpop.f32.mrb[9].mxu0 }
 0x145   : >> { %v1492_v51 = vpack.c.bf16 %v1479_v56, %v1478_v36  ;;  %10018 = vmatpush3.bf16.msra.mxu0 %v11270_v23  ;;  %v12143_v12 = vsel %vm2586_vm6, %v2613_v26, %v2617_v1  ;;  %v2826_v62 = vrot.slane %v11974_v11, 2  ;;  %v2828_v3 = vrot.slane %v12011_v2, 2  ;;  %v9914_v19 = vpop.f32.mrb[10].mxu0 }
 0x146   : >> { %1501 = vst [vmem:[#allocation2 + $0x58] sm:$0xff] %v1493_v14  ;;  %v1972_v58 = vld [vmem:[#allocation2 + $0x40] sm:$0x1]  ;;  %10019 = vmatprep.subr.bf16.mxu0 %v11271_v38  ;;  %v12150_v7 = vsel %vm2586_vm6, %v2617_v1, %v12134_v54  ;;  %v12155_v23 = vsel %vm2820_vm7, %v2822_v59, %v2824_v10  ;;  %v2052_v20 = vor.u32 %v2050_v61, %v12078_v43  ;;  %v2830_v17 = vrot.slane %v12003_v60, 2  ;;  %v1235_v26 = vpop.f32.mrb[11].mxu0 }
 0x147   : >> { %1500 = vst [vmem:[#allocation2 + $0x50] sm:$0xff] %v1492_v51  ;;  %v2054_v6 = vshll.u32 %v1972_v58, 16  ;;  %v2398_v21 = vrot.slane %v1972_v58, 1  ;;  %v12158_v13 = vsel %vm2820_vm7, %v2824_v10, %v2826_v62  ;;  %v12161_v41 = vsel %vm2820_vm7, %v2826_v62, %v2828_v3  ;;  %v9917_v1 = vpop.f32.mrb[12].mxu0 }
 0x148   : >> { %v2832_v22 = vrot.slane %v12054_v57, 2  ;;  %v2834_v31 = vrot.slane %v12050_v53, 2  ;;  %v1452_v36 = vmax.f32 %v9913_v30, %v9931_v55  ;;  %v12175_v43 = vsel %vm2820_vm7, %v2828_v3, %v2830_v17  ;;  %v1248_v58 = vpop.f32.mrb[13].mxu0 }
 0x149   : >> { %v2056_v50 = vrot.slane %v2054_v6, 1  ;;  %10020 = vmatpush3.bf16.msra.mxu0 %v11271_v38  ;;  %v12167_v9 = vsel %vm2382_vm5, %v2396_v39, %v2398_v21  ;;  %v1411_v38 = vpop.f32.mrb[41].mxu1  ;;  %v9918_v21 = vpop.f32.mrb[14].mxu0 }
 0x14a   : >> { %10037 = vmatprep.subr.bf16.mxu0 %v12140_v15  ;;  %v12178_v61 = vsel %vm2820_vm7, %v2830_v17, %v2832_v22  ;;  %v12183_v39 = vsel %vm2820_vm7, %v2832_v22, %v2834_v31  ;;  %v1468_v37 = vadd.f32 %v11955_v28, %v1452_v36  ;;  %v1450_v32 = vmax.f32 %v1232_v35, %v1411_v38  ;;  %v9932_v40 = vpop.f32.mrb[42].mxu1 }
 0x14b   : >> { %v2057_v24 = vsel %vm1989_vm4, %v2052_v20, %v2056_v50  ;;  %v1453_v56 = vmax.f32 %v9914_v19, %v9932_v40  ;;  %v1414_v44 = vpop.f32.mrb[43].mxu1  ;;  %v11273_v50 = vld [vmem:[%s14059_s4 + $0x88] sm:$0xff]  }
 0x14c   : >> { %10002 = vmatmul.mubr.bf16.gmra.mrb[44].mxu0 %v2057_v24  ;;  %v1466_v42 = vadd.f32 %v11955_v28, %v1450_v32  ;;  %v1451_v14 = vmax.f32 %v1235_v26, %v1414_v44  ;;  %v9935_v51 = vpop.f32.mrb[44].mxu1  ;;  %v1484_v10 = vmax.f32 %v1468_v37, 0.0  ;;  %v1251_v24 = vpop.f32.mrb[15].mxu0  ;;  %v12201_v44 = vld [vmem:[#allocation2 + $0x48] sm:$0xff] }
 0x14d   : >> { %10021 = vmatprep.mubr.bf16.mxu0 %v11963_v49  ;;  %v1469_v30 = vadd.f32 %v11955_v28, %v1453_v56  ;;  %v1456_v55 = vmax.f32 %v9917_v1, %v9935_v51  ;;  %v1427_v62 = vpop.f32.mrb[45].mxu1  ;;  %v9941_v51 = vpop.f32.mrb[16].mxu0 }
 0x14e   : >> { %v1482_v3 = vmax.f32 %v1466_v42, 0.0  ;;  %v1467_v49 = vadd.f32 %v11955_v28, %v1451_v14  ;;  %v1454_v6 = vmax.f32 %v1248_v58, %v1427_v62  ;;  %v9936_v20 = vpop.f32.mrb[46].mxu1  ;;  %v12195_v19 = vld [vmem:[#allocation2 + $0x50] sm:$0xff]  ;;  %v1625_v58 = vpop.f32.mrb[17].mxu0 }
 0x14f   : >> { %v1485_v17 = vmax.f32 %v1469_v30, 0.0  ;;  %v1472_v22 = vadd.f32 %v11955_v28, %v1456_v55  ;;  %v1457_v36 = vmax.f32 %v9918_v21, %v9936_v20  ;;  %v1430_v37 = vpop.f32.mrb[47].mxu1  ;;  %v3284_v21 = vshrl.u32 %v12201_v44, 16 }
 0x150   : >> { %v1483_v35 = vmax.f32 %v1467_v49, 0.0  ;;  %v1470_v38 = vadd.f32 %v11955_v28, %v1454_v6  ;;  %v1455_v32 = vmax.f32 %v1251_v24, %v1430_v37  ;;  %v9942_v49 = vpop.f32.mrb[18].mxu0  ;;  %v3280_v6 = vshll.u32 %v12201_v44, 16 }
 0x151   : >> { %v12198_v40 = vpack.c.bf16 %v1485_v17, %v1484_v10  ;;  %v1488_v56 = vmax.f32 %v1472_v22, 0.0  ;;  %v1473_v26 = vadd.f32 %v11955_v28, %v1457_v36  ;;  %v11274_v10 = vld [vmem:[%s14059_s4 + $0x90] sm:$0xff]   ;;  %v1628_v36 = vpop.f32.mrb[19].mxu0  ;;  %v3288_v24 = vshll.u32 %v12195_v19, 16 }
 0x152   : >> { %v12205_v42 = vpack.c.bf16 %v1483_v35, %v1482_v3  ;;  %v1486_v14 = vmax.f32 %v1470_v38, 0.0  ;;  %v1471_v1 = vadd.f32 %v11955_v28, %v1455_v32 }
 0x153   : >> { %1503 = vst [vmem:[#allocation2 + $0x68] sm:$0xff] %v12198_v40  ;;  %v1489_v30 = vmax.f32 %v1473_v26, 0.0  ;;  %v9959_v55 = vpop.f32.mrb[48].mxu1  ;;  %v11275_v26 = vld [vmem:[%s14059_s4 + $0x98] sm:$0xff]  }
 0x154   : >> { %10022 = vmatmul.mubr.bf16.vlgmr.msra.gmra.mrb[32].mxu0 %v11961_v46  ;;  %1502 = vst [vmem:[#allocation2 + $0x60] sm:$0xff] %v12205_v42  ;;  %v1869_v62 = vmax.f32 %v9941_v51, %v9959_v55  ;;  %v1804_v3 = vpop.f32.mrb[49].mxu1  ;;  %v3876_v55 = vrot.slane %v3280_v6, 2 }
 0x155   : >> { %10025 = vmatprep.mubr.bf16.mxu0 %v11979_v34  ;;  %10038 = vmatpush3.bf16.msra.mxu0 %v12140_v15  ;;  %v3292_v34 = vshrl.u32 %v12195_v19, 16  ;;  %v1487_v15 = vmax.f32 %v1471_v1, 0.0  ;;  %v12216_v20 = vpack.c.bf16 %v1489_v30, %v1488_v56  ;;  %v1867_v17 = vmax.f32 %v1625_v58, %v1804_v3  ;;  %v9960_v22 = vpop.f32.mrb[50].mxu1 }
 0x156   : >> { %10039 = vmatprep.subr.bf16.mxu0 %v11273_v50  ;;  %v1885_v35 = vadd.f32 %v11955_v28, %v1869_v62  ;;  %v1870_v38 = vmax.f32 %v9942_v49, %v9960_v22  ;;  %v1807_v32 = vpop.f32.mrb[51].mxu1  ;;  %v3875_v30 = vrot.slane %v3284_v21, 1  ;;  %v3880_v62 = vrot.slane %v3288_v24, 2 }
 0x157   : >> { %v12219_v37 = vpack.c.bf16 %v1487_v15, %v1486_v14  ;;  %1505 = vst [vmem:[#allocation2 + $0x78] sm:$0xff] %v12216_v20  ;;  %v1883_v56 = vadd.f32 %v11955_v28, %v1867_v17  ;;  %v1868_v1 = vmax.f32 %v1628_v36, %v1807_v32  ;;  %v3879_v51 = vrot.slane %v3292_v34, 1  ;;  %v11276_v17 = vld [vmem:[%s14059_s4 + $0xa0] sm:$0xff]  }
 0x158   : >> { %v1886_v14 = vadd.f32 %v11955_v28, %v1870_v38  ;;  %v12240_v49 = vor.u32 %v3876_v55, %v3875_v30 }
 0x159   : >> { %10040 = vmatpush3.bf16.msra.mxu0 %v11273_v50  ;;  %1504 = vst [vmem:[#allocation2 + $0x70] sm:$0xff] %v12219_v37  ;;  %v1901_v50 = vmax.f32 %v1885_v35, 0.0  ;;  %v1899_v58 = vmax.f32 %v1883_v56, 0.0  ;;  %v1884_v15 = vadd.f32 %v11955_v28, %v1868_v1  ;;  %v12245_v36 = vor.u32 %v3880_v62, %v3879_v51  ;;  %v12257_v56 = vld [vmem:[#allocation2] sm:$0xfe] }
 0x15a   : >> { %10041 = vmatprep.subr.bf16.mxu0 %v11274_v10  ;;  %v1902_v3 = vmax.f32 %v1886_v14, 0.0 }
 0x15b   : >> { %v1900_v22 = vmax.f32 %v1884_v15, 0.0  ;;  %v12250_v38 = vsel %vm2586_vm6, %v12240_v49, %v12245_v36  ;;  %v9963_v32 = vpop.f32.mrb[52].mxu1 }
 0x15c   : >> { %10026 = vmatmul.mubr.bf16.gmra.mrb[36].mxu0 %v11974_v11  ;;  %v1916_v11 = vpack.c.bf16 %v1902_v3, %v1901_v50  ;;  %v1820_v50 = vpop.f32.mrb[53].mxu1 }
 0x15d   : >> { %10029 = vmatprep.mubr.bf16.mxu0 %v12011_v2  ;;  %10042 = vmatpush3.bf16.msra.mxu0 %v11274_v10  ;;  %v1915_v35 = vpack.c.bf16 %v1900_v22, %v1899_v58  ;;  %v11277_v2 = vld [vmem:[%s14059_s4 + $0xa8] sm:$0xff]   ;;  %v9945_v10 = vpop.f32.mrb[20].mxu0  ;;  %v9964_v55 = vpop.f32.mrb[54].mxu1 }
 0x15e   : >> { %10043 = vmatprep.subr.bf16.mxu0 %v11275_v26  ;;  %1924 = vst [vmem:[#allocation2 + $0x88] sm:$0xff] %v1916_v11  ;;  %v1873_v1 = vmax.f32 %v9945_v10, %v9963_v32  ;;  %v1641_v51 = vpop.f32.mrb[21].mxu0  ;;  %v1823_v62 = vpop.f32.mrb[55].mxu1 }
 0x15f   : >> { %1923 = vst [vmem:[#allocation2 + $0x80] sm:$0xff] %v1915_v35  ;;  %v1871_v14 = vmax.f32 %v1641_v51, %v1820_v50  ;;  %v9946_v30 = vpop.f32.mrb[22].mxu0  ;;  %v11279_v35 = vld [vmem:[%s14059_s4 + $0xb8] sm:$0xff]  }
 0x160   : >> { %v1874_v58 = vmax.f32 %v9946_v30, %v9964_v55  ;;  %v1644_v15 = vpop.f32.mrb[23].mxu0 }
 0x161   : >> { %10044 = vmatpush3.bf16.msra.mxu0 %v11275_v26  ;;  %v11278_v26 = vld [vmem:[%s14059_s4 + $0xb0] sm:$0xff]   ;;  %v1887_v3 = vadd.f32 %v11955_v28, %v1871_v14 }
 0x162   : >> { %10045 = vmatprep.subr.bf16.mxu0 %v11276_v17  ;;  %v1890_v11 = vadd.f32 %v11955_v28, %v1874_v58 }
 0x163   : >> { %v1903_v10 = vmax.f32 %v1887_v3, 0.0  ;;  %v9967_v14 = vpop.f32.mrb[56].mxu1 }
 0x164   : >> { %10030 = vmatmul.mubr.bf16.gmra.mrb[40].mxu0 %v12003_v60  ;;  %v1889_v60 = vadd.f32 %v11955_v28, %v1873_v1  ;;  %v1906_v1 = vmax.f32 %v1890_v11, 0.0  ;;  %v1836_v58 = vpop.f32.mrb[57].mxu1 }
 0x165   : >> { %10033 = vmatprep.mubr.bf16.mxu0 %v12054_v57  ;;  %10046 = vmatpush3.bf16.msra.mxu0 %v11276_v17  ;;  %v2383_v57 = vrot.slane %v12257_v56, 1  ;;  %v1872_v17 = vmax.f32 %v1644_v15, %v1823_v62  ;;  %v11280_v15 = vld [vmem:[%s14059_s4 + $0xc0] sm:$0xff]   ;;  %v9968_v11 = vpop.f32.mrb[58].mxu1 }
 0x166   : >> { %10047 = vmatprep.subr.bf16.mxu0 %v11277_v2  ;;  %v1905_v22 = vmax.f32 %v1889_v60, 0.0 }
 0x167   : >> { %v1888_v32 = vadd.f32 %v11955_v28, %v1872_v17  ;;  %v2385_v51 = vsel %vm2382_vm5, %v2383_v57, %v2384_v45 }
 0x168   : >> { %v1918_v30 = vpack.c.bf16 %v1906_v1, %v1905_v22 }
 0x169   : >> { %10048 = vmatpush3.bf16.msra.mxu0 %v11277_v2  ;;  %v1904_v50 = vmax.f32 %v1888_v32, 0.0  ;;  %v9949_v2 = vpop.f32.mrb[24].mxu0 }
 0x16a   : >> { %10049 = vmatprep.subr.bf16.mxu0 %v11278_v26  ;;  %v1877_v55 = vmax.f32 %v9949_v2, %v9967_v14  ;;  %v1657_v60 = vpop.f32.mrb[25].mxu0  ;;  %1926 = vst [vmem:[#allocation2 + $0x98] sm:$0xff] %v1918_v30 }
 0x16b   : >> { %v1917_v62 = vpack.c.bf16 %v1904_v50, %v1903_v10  ;;  %v1875_v3 = vmax.f32 %v1657_v60, %v1836_v58  ;;  %v9950_v17 = vpop.f32.mrb[26].mxu0  ;;  %v11281_v10 = vld [vmem:[%s14059_s4 + $0xc8] sm:$0xff]  }
 0x16c   : >> { %10034 = vmatmul.mubr.bf16.gmra.mrb[44].mxu0 %v12050_v53  ;;  %v1893_v45 = vadd.f32 %v11955_v28, %v1877_v55  ;;  %v1878_v57 = vmax.f32 %v9950_v17, %v9968_v11  ;;  %v1660_v32 = vpop.f32.mrb[27].mxu0  ;;  %v11282_v11 = vld [vmem:[%s14059_s4 + $0xd0] sm:$0xff]  }
 0x16d   : >> { %10050 = vmatpush3.bf16.msra.mxu0 %v11278_v26  ;;  %10053 = vmatprep.mubr.bf16.mxu0 %v2385_v51  ;;  %v1839_v26 = vpop.f32.mrb[59].mxu1  ;;  %1925 = vst [vmem:[#allocation2 + $0x90] sm:$0xff] %v1917_v62  ;;  %v1891_v22 = vadd.f32 %v11955_v28, %v1875_v3  ;;  %v9953_v60 = vpop.f32.mrb[28].mxu0 }
 0x16e   : >> { %10051 = vmatprep.subr.bf16.mxu0 %v11279_v35  ;;  %v1876_v1 = vmax.f32 %v1660_v32, %v1839_v26  ;;  %v1909_v51 = vmax.f32 %v1893_v45, 0.0  ;;  %v1894_v2 = vadd.f32 %v11955_v28, %v1878_v57  ;;  %v9971_v58 = vpop.f32.mrb[60].mxu1  ;;  %v1673_v3 = vpop.f32.mrb[29].mxu0 }
 0x16f   : >> { %v1907_v50 = vmax.f32 %v1891_v22, 0.0  ;;  %v1881_v62 = vmax.f32 %v9953_v60, %v9971_v58  ;;  %v1852_v17 = vpop.f32.mrb[61].mxu1  ;;  %v9954_v32 = vpop.f32.mrb[30].mxu0 }
 0x170   : >> { %v1892_v14 = vadd.f32 %v11955_v28, %v1876_v1  ;;  %v1910_v30 = vmax.f32 %v1894_v2, 0.0  ;;  %v1879_v57 = vmax.f32 %v1673_v3, %v1852_v17  ;;  %v9972_v26 = vpop.f32.mrb[62].mxu1  ;;  %v1676_v1 = vpop.f32.mrb[31].mxu0  ;;  %v2588_v3 = vshrl.u32 %v12257_v56, 16 }
 0x171   : >> { %10052 = vmatpush3.bf16.msra.mxu0 %v11279_v35  ;;  %v1882_v22 = vmax.f32 %v9954_v32, %v9972_v26  ;;  %v2591_v17 = vshll.u32 %v12257_v56, 16  ;;  %v3304_v26 = vshll.u32 %v12205_v42, 16 }
 0x172   : >> { %10069 = vmatprep.subr.bf16.mxu0 %v11280_v15  ;;  %v1908_v55 = vmax.f32 %v1892_v14, 0.0  ;;  %v1920_v35 = vpack.c.bf16 %v1910_v30, %v1909_v51 }
 0x173   : >> { %v1898_v14 = vadd.f32 %v11955_v28, %v1882_v22  ;;  %v2593_v32 = vrot.slane %v2591_v17, 2  ;;  %v11286_v22 = vld [vmem:[%s14059_s4 + $0xf0] sm:$0xff]  }
 0x174   : >> { %10054 = vmatmul.mubr.bf16.vlgmr.msra.gmra.mrb[32].mxu0 %v12009_v63  ;;  %v1919_v45 = vpack.c.bf16 %v1908_v55, %v1907_v50  ;;  %1928 = vst [vmem:[#allocation2 + $0xa8] sm:$0xff] %v1920_v35  ;;  %v1897_v63 = vadd.f32 %v11955_v28, %v1881_v62  ;;  %v11283_v50 = vld [vmem:[%s14059_s4 + $0xd8] sm:$0xff]  }
 0x175   : >> { %10057 = vmatprep.mubr.bf16.mxu0 %v12017_v8  ;;  %10070 = vmatpush3.bf16.msra.mxu0 %v11280_v15  ;;  %v1855_v8 = vpop.f32.mrb[63].mxu1  ;;  %v1895_v15 = vadd.f32 %v11955_v28, %v1879_v57  ;;  %v1914_v60 = vmax.f32 %v1898_v14, 0.0  ;;  %v2590_v57 = vrot.slane %v2588_v3, 1  ;;  %v14088_v14 = vshll.u32 %v12219_v37, 16 }
 0x176   : >> { %10071 = vmatprep.subr.bf16.mxu0 %v11281_v10  ;;  %1927 = vst [vmem:[#allocation2 + $0xa0] sm:$0xff] %v1919_v45  ;;  %v1880_v51 = vmax.f32 %v1676_v1, %v1855_v8  ;;  %v1913_v2 = vmax.f32 %v1897_v63, 0.0  ;;  %v14083_v45 = vshrl.u32 %v12198_v40, 16  ;;  %v3312_v63 = vshll.u32 %v12198_v40, 16 }
 0x177   : >> { %v1911_v30 = vmax.f32 %v1895_v15, 0.0 }
 0x178   : >> { %v1896_v55 = vadd.f32 %v11955_v28, %v1880_v51  ;;  %v1922_v35 = vpack.c.bf16 %v1914_v60, %v1913_v2  ;;  %v12303_v28 = vld [vmem:[#allocation2 + $0x58] sm:$0xff]  ;;  %v3891_v15 = vrot.slane %v14083_v45, 1  ;;  %v3892_v51 = vrot.slane %v3312_v63, 2 }
 0x179   : >> { %10072 = vmatpush3.bf16.msra.mxu0 %v11281_v10  ;;  %v11284_v10 = vld [vmem:[%s14059_s4 + $0xe0] sm:$0xff]   ;;  %v3296_v56 = vshll.u32 %v12303_v28, 16  ;;  %v2594_v2 = vor.u32 %v2593_v32, %v2590_v57  ;;  %v3896_v32 = vrot.slane %v14088_v14, 2 }
 0x17a   : >> { %10073 = vmatprep.subr.bf16.mxu0 %v11282_v11  ;;  %v1912_v58 = vmax.f32 %v1896_v55, 0.0  ;;  %1930 = vst [vmem:[#allocation2 + $0xb8] sm:$0xff] %v1922_v35  ;;  %v11287_v35 = vld [vmem:[%s14059_s4 + $0xf8] sm:$0xff]  }
 0x17c   : >> { %10058 = vmatmul.mubr.bf16.gmra.mrb[36].mxu0 %v12042_v47  ;;  %v1921_v62 = vpack.c.bf16 %v1912_v58, %v1911_v30  ;;  %v11285_v47 = vld [vmem:[%s14059_s4 + $0xe8] sm:$0xff]   ;;  %v14080_v30 = vshrl.u32 %v12216_v20, 16  ;;  %v3893_v58 = vor.u32 %v3892_v51, %v3891_v15  ;;  %v11290_v15 = vld [vmem:[%s14059_s4 + $0x110] sm:$0xff]  }
 0x17d   : >> { %10061 = vmatprep.mubr.bf16.mxu0 %v12048_v18  ;;  %10074 = vmatpush3.bf16.msra.mxu0 %v11282_v11  ;;  %v3300_v18 = vshrl.u32 %v12303_v28, 16  ;;  %v3308_v11 = vshrl.u32 %v12205_v42, 16  ;;  %v12379_v51 = vld [vmem:[#allocation2 + $0x88] sm:$0xff] }
 0x17e   : >> { %10075 = vmatprep.subr.bf16.mxu0 %v11283_v50  ;;  %1929 = vst [vmem:[#allocation2 + $0xb0] sm:$0xff] %v1921_v62 }
 0x17f   : >> { %v3883_v1 = vrot.slane %v3300_v18, 1  ;;  %v3887_v8 = vrot.slane %v3308_v11, 1 }
 0x181   : >> { %10076 = vmatpush3.bf16.msra.mxu0 %v11283_v50  ;;  %v14082_v50 = vshrl.u32 %v12219_v37, 16 }
 0x182   : >> { %10077 = vmatprep.subr.bf16.mxu0 %v11284_v10 }
 0x183   : >> { %v3895_v57 = vrot.slane %v14082_v50, 1  ;;  %v2801_v50 = vld [vmem:[#allocation2] sm:$0xfc] }
 0x184   : >> { %10062 = vmatmul.mubr.bf16.gmra.mrb[40].mxu0 %v12084_v29  ;;  %v3884_v29 = vrot.slane %v3296_v56, 2 }
 0x185   : >> { %10065 = vmatprep.mubr.bf16.mxu0 %v12090_v16  ;;  %10078 = vmatpush3.bf16.msra.mxu0 %v11284_v10  ;;  %v3888_v16 = vrot.slane %v3304_v26, 2  ;;  %v14081_v10 = vshll.u32 %v12216_v20, 16 }
 0x186   : >> { %10079 = vmatprep.subr.bf16.mxu0 %v11285_v47  ;;  %v3885_v55 = vor.u32 %v3884_v29, %v3883_v1 }
 0x187   : >> { %v3889_v60 = vor.u32 %v3888_v16, %v3887_v8  ;;  %v3900_v1 = vrot.slane %v14081_v10, 2  ;;  %v11289_v16 = vld [vmem:[%s14059_s4 + $0x108] sm:$0xff]  }
 0x188   : >> { %v12340_v62 = vsel %vm2586_vm6, %v12245_v36, %v3885_v55  ;;  %v3899_v36 = vrot.slane %v14080_v30, 1 }
 0x189   : >> { %10080 = vmatpush3.bf16.msra.mxu0 %v11285_v47  ;;  %v12343_v3 = vsel %vm2586_vm6, %v3885_v55, %v3889_v60  ;;  %v12346_v17 = vsel %vm2586_vm6, %v3889_v60, %v3893_v58  ;;  %v2598_v47 = vsel %vm2586_vm6, %v2594_v2, %v11977_v33  ;;  %v3897_v33 = vor.u32 %v3896_v32, %v3895_v57  ;;  %v12381_v2 = vld [vmem:[#allocation2 + $0x90] sm:$0xff] }
 0x18a   : >> { %10081 = vmatprep.subr.bf16.mxu0 %v11286_v22  ;;  %v12362_v29 = vor.u32 %v3900_v1, %v3899_v36  ;;  %v14077_v55 = vshrl.u32 %v12379_v51, 16  ;;  %v14078_v60 = vshll.u32 %v12381_v2, 16  ;;  %v11292_v1 = vld [vmem:[%s14059_s4 + $0x120] sm:$0xff]  }
 0x18b   : >> { %v12365_v8 = vsel %vm2586_vm6, %v3893_v58, %v3897_v33  ;;  %v14076_v58 = vshrl.u32 %v12381_v2, 16 }
 0x18c   : >> { %10066 = vmatmul.mubr.bf16.gmra.mrb[44].mxu0 %v12167_v9  ;;  %v11288_v9 = vld [vmem:[%s14059_s4 + $0x100] sm:$0xff]   ;;  %v5108_v57 = vrot.slane %v14077_v55, 1  ;;  %v5113_v36 = vrot.slane %v14078_v60, 2 }
 0x18d   : >> { %10082 = vmatpush3.bf16.msra.mxu0 %v11286_v22  ;;  %10085 = vmatprep.mubr.bf16.mxu0 %v2598_v47  ;;  %v12369_v22 = vsel %vm2586_vm6, %v3897_v33, %v12362_v29  ;;  %v12393_v47 = vld [vmem:[#allocation2 + $0x40] sm:$0x3] }
 0x18e   : >> { %10083 = vmatprep.subr.bf16.mxu0 %v11287_v35  ;;  %v2627_v33 = vshll.u32 %v12393_v47, 16 }
 0x191   : >> { %10084 = vmatpush3.bf16.msra.mxu0 %v11287_v35  ;;  %v5112_v35 = vrot.slane %v14076_v58, 1 }
 0x192   : >> { %10101 = vmatprep.subr.bf16.mxu0 %v11288_v9 }
 0x194   : >> { %10086 = vmatmul.mubr.bf16.vlgmr.msra.gmra.mrb[32].mxu0 %v12110_v25  ;;  %v11291_v25 = vld [vmem:[%s14059_s4 + $0x118] sm:$0xff]  }
 0x195   : >> { %10089 = vmatprep.mubr.bf16.mxu0 %v12119_v27  ;;  %10102 = vmatpush3.bf16.msra.mxu0 %v11288_v9  ;;  %v14079_v27 = vshll.u32 %v12379_v51, 16  ;;  %v2624_v9 = vshrl.u32 %v12393_v47, 16 }
 0x196   : >> { %10103 = vmatprep.subr.bf16.mxu0 %v11289_v16 }
 0x197   : >> { %v5109_v32 = vrot.slane %v14079_v27, 2 }
 0x199   : >> { %10104 = vmatpush3.bf16.msra.mxu0 %v11289_v16  ;;  %v12409_v16 = vld [vmem:[#allocation2 + $0xa0] sm:$0xff] }
 0x19a   : >> { %10105 = vmatprep.subr.bf16.mxu0 %v11290_v15  ;;  %v14087_v58 = vshll.u32 %v12409_v16, 16  ;;  %v14086_v55 = vshrl.u32 %v12409_v16, 16 }
 0x19c   : >> { %10090 = vmatmul.mubr.bf16.gmra.mrb[36].mxu0 %v12129_v48  ;;  %v12405_v48 = vld [vmem:[#allocation2 + $0x98] sm:$0xff]  ;;  %v5121_v10 = vrot.slane %v14087_v58, 2  ;;  %v2821_v58 = vrot.slane %v2801_v50, 2 }
 0x19d   : >> { %10093 = vmatprep.mubr.bf16.mxu0 %v12132_v52  ;;  %10106 = vmatpush3.bf16.msra.mxu0 %v11290_v15  ;;  %v12411_v52 = vor.u32 %v5109_v32, %v5108_v57  ;;  %v5114_v15 = vor.u32 %v5113_v36, %v5112_v35  ;;  %v14084_v0 = vshrl.u32 %v12405_v48, 16  ;;  %v14085_v60 = vshll.u32 %v12405_v48, 16  ;;  %v11293_v57 = vld [vmem:[%s14059_s4 + $0x128] sm:$0xff]  }
 0x19e   : >> { %10107 = vmatprep.subr.bf16.mxu0 %v11291_v25  ;;  %v2626_v32 = vrot.slane %v2624_v9, 1  ;;  %v2629_v36 = vrot.slane %v2627_v33, 2  ;;  %v11294_v9 = vld [vmem:[%s14059_s4 + $0x130] sm:$0xff]   ;;  %v12437_v33 = vld [vmem:[#allocation2 + $0xa8] sm:$0xff] }
 0x19f   : >> { %v12419_v27 = vsel %vm2586_vm6, %v12411_v52, %v5114_v15  ;;  %v5116_v35 = vrot.slane %v14084_v0, 1  ;;  %v5117_v30 = vrot.slane %v14085_v60, 2 }
 0x1a0   : >> { %v2630_v60 = vor.u32 %v2629_v36, %v2626_v32 }
 0x1a1   : >> { %10108 = vmatpush3.bf16.msra.mxu0 %v11291_v25  ;;  %v5120_v25 = vrot.slane %v14086_v55, 1  ;;  %v5118_v45 = vor.u32 %v5117_v30, %v5116_v35  ;;  %v12439_v55 = vld [vmem:[#allocation2 + $0xb0] sm:$0xff]  ;;  %v4545_v35 = vshll.u32 %v12437_v33, 16 }
 0x1a2   : >> { %10109 = vmatprep.subr.bf16.mxu0 %v11292_v1  ;;  %v14090_v30 = vshrl.u32 %v12439_v55, 16 }
 0x1a3   : >> { %v5122_v0 = vor.u32 %v5121_v10, %v5120_v25  ;;  %v11295_v10 = vld [vmem:[%s14059_s4 + $0x138] sm:$0xff]   ;;  %v5125_v32 = vrot.slane %v4545_v35, 2 }
 0x1a4   : >> { %10094 = vmatmul.mubr.bf16.gmra.mrb[40].mxu0 %v12143_v12  ;;  %v12442_v12 = vsel %vm2586_vm6, %v5114_v15, %v5118_v45  ;;  %v2631_v15 = vsel %vm2586_vm6, %v12134_v54, %v2630_v60 }
 0x1a5   : >> { %10097 = vmatprep.mubr.bf16.mxu0 %v12150_v7  ;;  %10110 = vmatpush3.bf16.msra.mxu0 %v11292_v1  ;;  %v14089_v7 = vshrl.u32 %v12437_v33, 16  ;;  %v4553_v1 = vshll.u32 %v12439_v55, 16  ;;  %v12449_v14 = vsel %vm2586_vm6, %v5118_v45, %v5122_v0  ;;  %v2823_v45 = vsel %vm2820_vm7, %v2821_v58, %v2822_v59 }
 0x1a6   : >> { %10111 = vmatprep.subr.bf16.mxu0 %v11293_v57 }
 0x1a7   : >> { %v5124_v50 = vrot.slane %v14089_v7, 1  ;;  %v5129_v36 = vrot.slane %v4553_v1, 2  ;;  %v12467_v7 = vld [vmem:[#allocation2 + $0xb8] sm:$0xff] }
 0x1a8   : >> { %v4561_v46 = vshll.u32 %v12467_v7, 16 }
 0x1a9   : >> { %10112 = vmatpush3.bf16.msra.mxu0 %v11293_v57  ;;  %v5128_v57 = vrot.slane %v14090_v30, 1  ;;  %v5126_v25 = vor.u32 %v5125_v32, %v5124_v50  ;;  %v4565_v30 = vshrl.u32 %v12467_v7, 16  ;;  %v2836_v50 = vrot.slane %v12393_v47, 2  ;;  %v11361_v7 = vld [vmem:[%s14059_s4 + $0x88] sm:$0xff]  }
 0x1aa   : >> { %10113 = vmatprep.subr.bf16.mxu0 %v11294_v9 }
 0x1ab   : >> { %v5130_v54 = vor.u32 %v5129_v36, %v5128_v57  ;;  %v12470_v60 = vsel %vm2586_vm6, %v5122_v0, %v5126_v25  ;;  %v5132_v58 = vrot.slane %v4565_v30, 1 }
 0x1ac   : >> { %10098 = vmatmul.mubr.bf16.gmra.mrb[44].mxu0 %v2631_v15 }
 0x1ad   : >> { %10114 = vmatpush3.bf16.msra.mxu0 %v11294_v9  ;;  %10117 = vmatprep.mubr.bf16.mxu0 %v2823_v45  ;;  %v12475_v59 = vsel %vm2586_vm6, %v5126_v25, %v5130_v54  ;;  %v5133_v9 = vrot.slane %v4561_v46, 2 }
 0x1ae   : >> { %10115 = vmatprep.subr.bf16.mxu0 %v11295_v10 }
 0x1af   : >> { %v12483_v0 = vor.u32 %v5133_v9, %v5132_v58 }
 0x1b1   : >> { %10116 = vmatpush3.bf16.msra.mxu0 %v11295_v10  ;;  %v12487_v10 = vsel %vm2586_vm6, %v5130_v54, %v12483_v0 }
 0x1b4   : >> { %10118 = vmatmul.mubr.bf16.vlgmr.msra.gmra.mrb[32].mxu0 %v12155_v23  ;;  %v2837_v23 = vsel %vm2820_vm7, %v2834_v31, %v2836_v50 }
 0x1b5   : >> { %10121 = vmatprep.mubr.bf16.mxu0 %v12158_v13  ;;  %v12500_v13 = vld [vmem:[%s14065_s10] sm:$0xff]  }
 0x1b6   : >> { %10149 = vmatprep.mubr.bf16.mxu1 %v12500_v13 }
 0x1bc   : >> { %10122 = vmatmul.mubr.bf16.gmra.mrb[36].mxu0 %v12161_v41 }
 0x1bd   : >> { %10125 = vmatprep.mubr.bf16.mxu0 %v12175_v43 }
 0x1c4   : >> { %10126 = vmatmul.mubr.bf16.gmra.mrb[40].mxu0 %v12178_v61 }
 0x1c5   : >> { %10129 = vmatprep.mubr.bf16.mxu0 %v12183_v39 }
 0x1cc   : >> { %10130 = vmatmul.mubr.bf16.gmra.mrb[44].mxu0 %v2837_v23 }
 0x1cd   : >> { %10357 = vmatprep.mubr.bf16.mxu0 %v12500_v13 }
 0x287   : >> { %v10119_v41 = vpop.f32.mrb[32].mxu0 }
 0x288   : >> { %v2928_v43 = vpop.f32.mrb[33].mxu0 }
 0x289   : >> { %v10120_v61 = vpop.f32.mrb[34].mxu0 }
 0x28a   : >> { %v3008_v39 = vpack.c.bf16 %v10120_v61, %v10119_v41  ;;  %v2931_v15 = vpop.f32.mrb[35].mxu0 }
 0x28b   : >> { %v3007_v47 = vpack.c.bf16 %v2931_v15, %v2928_v43 }
 0x28d   : >> { %10133 = vmatprep.subr.bf16.mxu1 %v3007_v47 }
 0x28e   : >> { %10134 = vmatpush3.bf16.msra.mxu1 %v3007_v47 }
 0x28f   : >> { %v10123_v53 = vpop.f32.mrb[36].mxu0  ;;  %10135 = vmatprep.subr.bf16.mxu1 %v3008_v39 }
 0x290   : >> { %v2944_v31 = vpop.f32.mrb[37].mxu0 }
 0x291   : >> { %v10124_v32 = vpop.f32.mrb[38].mxu0 }
 0x292   : >> { %v3010_v57 = vpack.c.bf16 %v10124_v32, %v10123_v53  ;;  %v2947_v45 = vpop.f32.mrb[39].mxu0  ;;  %10136 = vmatpush3.bf16.msra.mxu1 %v3008_v39  ;;  %v12507_v32 = vld [vmem:[%s14065_s10 + $0x8] sm:$0xff]  }
 0x293   : >> { %v3009_v36 = vpack.c.bf16 %v2947_v45, %v2944_v31  ;;  %v12512_v45 = vld [vmem:[%s14065_s10 + $0x10] sm:$0xff]  }
 0x295   : >> { %10137 = vmatprep.subr.bf16.mxu1 %v3009_v36 }
 0x296   : >> { %10138 = vmatpush3.bf16.msra.mxu1 %v3009_v36 }
 0x297   : >> { %v10127_v25 = vpop.f32.mrb[40].mxu0  ;;  %10139 = vmatprep.subr.bf16.mxu1 %v3010_v57 }
 0x298   : >> { %v2960_v54 = vpop.f32.mrb[41].mxu0 }
 0x299   : >> { %v10128_v58 = vpop.f32.mrb[42].mxu0 }
 0x29a   : >> { %v3012_v9 = vpack.c.bf16 %v10128_v58, %v10127_v25  ;;  %v2963_v50 = vpop.f32.mrb[43].mxu0  ;;  %10140 = vmatpush3.bf16.msra.mxu1 %v3010_v57  ;;  %v12519_v25 = vld [vmem:[%s14065_s10 + $0x18] sm:$0xff]   ;;  %v12542_v58 = vld [vmem:[%s14066_s11 + $0x10] sm:$0xff]  }
 0x29b   : >> { %v3011_v23 = vpack.c.bf16 %v2963_v50, %v2960_v54  ;;  %v12524_v54 = vld [vmem:[%s14066_s11] sm:$0xff]  }
 0x29d   : >> { %10141 = vmatprep.subr.bf16.mxu1 %v3011_v23 }
 0x29e   : >> { %10142 = vmatpush3.bf16.msra.mxu1 %v3011_v23 }
 0x29f   : >> { %v10131_v41 = vpop.f32.mrb[44].mxu0  ;;  %10143 = vmatprep.subr.bf16.mxu1 %v3012_v9 }
 0x2a0   : >> { %v2976_v43 = vpop.f32.mrb[45].mxu0 }
 0x2a1   : >> { %v10132_v61 = vpop.f32.mrb[46].mxu0 }
 0x2a2   : >> { %v3014_v15 = vpack.c.bf16 %v10132_v61, %v10131_v41  ;;  %v2979_v53 = vpop.f32.mrb[47].mxu0  ;;  %10144 = vmatpush3.bf16.msra.mxu1 %v3012_v9 }
 0x2a3   : >> { %v3013_v31 = vpack.c.bf16 %v2979_v53, %v2976_v43  ;;  %v12556_v43 = vld [vmem:[%s14066_s11 + $0x18] sm:$0xff]  }
 0x2a4   : >> { %v11307_v53 = vld [vmem:[%s14059_s4 + $0x58] sm:$0xff]  }
 0x2a5   : >> { %10145 = vmatprep.subr.bf16.mxu1 %v3013_v31 }
 0x2a6   : >> { %10146 = vmatpush3.bf16.msra.mxu1 %v3013_v31 }
 0x2a7   : >> { %10147 = vmatprep.subr.bf16.mxu1 %v3014_v15 }
 0x2aa   : >> { %10148 = vmatpush3.bf16.msra.mxu1 %v3014_v15 }
 0x2ab   : >> { %10157 = vmatprep.subr.bf16.mxu1 %v3007_v47 }
 0x2ad   : >> { %10150 = vmatmul.mubr.bf16.vlgmr.msra.gmra.mrb[64].mxu1 %v12507_v32 }
 0x2ae   : >> { %10158 = vmatpush3.bf16.msra.mxu1 %v3007_v47  ;;  %10153 = vmatprep.mubr.bf16.mxu1 %v12512_v45  ;;  %v11302_v47 = vld [vmem:[%s14059_s4 + $0x40] sm:$0xff]  }
 0x2af   : >> { %10159 = vmatprep.subr.bf16.mxu1 %v3008_v39 }
 0x2b2   : >> { %10160 = vmatpush3.bf16.msra.mxu1 %v3008_v39  ;;  %v12528_v39 = vld [vmem:[#allocation2 + $0x40] sm:$0xff] }
 0x2b3   : >> { %10161 = vmatprep.subr.bf16.mxu1 %v3009_v36  ;;  %v3273_v41 = vshrl.u32 %v12528_v39, 16 }
 0x2b5   : >> { %10154 = vmatmul.mubr.bf16.gmra.mrb[68].mxu1 %v12519_v25 }
 0x2b6   : >> { %10162 = vmatpush3.bf16.msra.mxu1 %v3009_v36  ;;  %10173 = vmatprep.mubr.bf16.mxu1 %v12524_v54  ;;  %v12536_v36 = vld [vmem:[%s14066_s11 + $0x8] sm:$0xff]  }
 0x2b7   : >> { %10163 = vmatprep.subr.bf16.mxu1 %v3010_v57 }
 0x2ba   : >> { %10164 = vmatpush3.bf16.msra.mxu1 %v3010_v57  ;;  %v3275_v57 = vshll.u32 %v12528_v39, 16 }
 0x2bb   : >> { %10165 = vmatprep.subr.bf16.mxu1 %v3011_v23 }
 0x2bc   : >> { %v3277_v50 = vrot.slane %v3275_v57, 1  ;;  %v11310_v57 = vld [vmem:[%s14059_s4 + $0x70] sm:$0xff]  }
 0x2be   : >> { %10166 = vmatpush3.bf16.msra.mxu1 %v3011_v23  ;;  %v11306_v23 = vld [vmem:[%s14059_s4 + $0x50] sm:$0xff]   ;;  %v3278_v61 = vor.u32 %v3277_v50, %v3273_v41  ;;  %v3290_v50 = vrot.slane %v3288_v24, 1 }
 0x2bf   : >> { %10167 = vmatprep.subr.bf16.mxu1 %v3012_v9 }
 0x2c0   : >> { %v3294_v41 = vor.u32 %v3292_v34, %v3290_v50  ;;  %v3306_v34 = vrot.slane %v3304_v26, 1  ;;  %v11315_v26 = vld [vmem:[%s14059_s4 + $0x18] sm:$0xff]  }
 0x2c2   : >> { %10168 = vmatpush3.bf16.msra.mxu1 %v3012_v9  ;;  %v11303_v9 = vld [vmem:[%s14059_s4 + $0x48] sm:$0xff]  }
 0x2c3   : >> { %10169 = vmatprep.subr.bf16.mxu1 %v3013_v31 }
 0x2c6   : >> { %10170 = vmatpush3.bf16.msra.mxu1 %v3013_v31 }
 0x2c7   : >> { %10171 = vmatprep.subr.bf16.mxu1 %v3014_v15 }
 0x2ca   : >> { %10172 = vmatpush3.bf16.msra.mxu1 %v3014_v15  ;;  %v3282_v15 = vrot.slane %v3280_v6, 1  ;;  %v11309_v6 = vld [vmem:[%s14059_s4 + $0x68] sm:$0xff]  }
 0x2cb   : >> { %10181 = vmatprep.subr.bf16.mxu1 %v11302_v47 }
 0x2cc   : >> { %v3283_v31 = vsel %vm1989_vm4, %v3278_v61, %v3282_v15  ;;  %v3286_v61 = vor.u32 %v3284_v21, %v3282_v15  ;;  %v11314_v21 = vld [vmem:[%s14059_s4 + $0x10] sm:$0xff]   ;;  %v3310_v15 = vor.u32 %v3308_v11, %v3306_v34 }
 0x2cd   : >> { %10174 = vmatmul.mubr.bf16.vlgmr.msra.gmra.mrb[72].mxu1 %v12536_v36 }
 0x2ce   : >> { %10182 = vmatpush3.bf16.msra.mxu1 %v11302_v47  ;;  %10177 = vmatprep.mubr.bf16.mxu1 %v12542_v58  ;;  %v11308_v47 = vld [vmem:[%s14059_s4 + $0x60] sm:$0xff]   ;;  %v3291_v24 = vsel %vm1989_vm4, %v3286_v61, %v3290_v50 }
 0x2cf   : >> { %10183 = vmatprep.subr.bf16.mxu1 %v11303_v9  ;;  %v11316_v50 = vld [vmem:[%s14059_s4 + $0x20] sm:$0xff]  }
 0x2d2   : >> { %10184 = vmatpush3.bf16.msra.mxu1 %v11303_v9  ;;  %v11311_v9 = vld [vmem:[%s14059_s4 + $0x78] sm:$0xff]  }
 0x2d3   : >> { %10185 = vmatprep.subr.bf16.mxu1 %v11306_v23 }
 0x2d5   : >> { %10178 = vmatmul.mubr.bf16.gmra.mrb[76].mxu1 %v12556_v43 }
 0x2d6   : >> { %10186 = vmatpush3.bf16.msra.mxu1 %v11306_v23  ;;  %10197 = vmatprep.mubr.bf16.mxu1 %v3283_v31  ;;  %v11312_v23 = vld [vmem:[%s14059_s4] sm:$0xff]   ;;  %v11313_v31 = vld [vmem:[%s14059_s4 + $0x8] sm:$0xff]  }
 0x2d7   : >> { %10187 = vmatprep.subr.bf16.mxu1 %v11307_v53 }
 0x2da   : >> { %10188 = vmatpush3.bf16.msra.mxu1 %v11307_v53  ;;  %v3298_v53 = vrot.slane %v3296_v56, 1 }
 0x2db   : >> { %10189 = vmatprep.subr.bf16.mxu1 %v11308_v47 }
 0x2dc   : >> { %v3302_v56 = vor.u32 %v3300_v18, %v3298_v53  ;;  %v14099_v18 = vshll.u32 %v12219_v37, 16 }
 0x2de   : >> { %10190 = vmatpush3.bf16.msra.mxu1 %v11308_v47  ;;  %v3299_v47 = vsel %vm1989_vm4, %v3294_v41, %v3298_v53  ;;  %v3322_v11 = vrot.slane %v14099_v18, 1  ;;  %v14101_v41 = vshrl.u32 %v12219_v37, 16  ;;  %v12618_v53 = vld [vmem:[#allocation2 + $0x80] sm:$0x1] }
 0x2df   : >> { %10191 = vmatprep.subr.bf16.mxu1 %v11309_v6 }
 0x2e0   : >> { %v3326_v61 = vor.u32 %v14101_v41, %v3322_v11  ;;  %v3638_v41 = vld [vmem:[#allocation2 + $0x40] sm:$0xfe] }
 0x2e2   : >> { %10192 = vmatpush3.bf16.msra.mxu1 %v11309_v6  ;;  %v3314_v6 = vrot.slane %v3312_v63, 1  ;;  %v14100_v63 = vshrl.u32 %v12198_v40, 16 }
 0x2e3   : >> { %10193 = vmatprep.subr.bf16.mxu1 %v11310_v57 }
 0x2e6   : >> { %10194 = vmatpush3.bf16.msra.mxu1 %v11310_v57  ;;  %v3307_v57 = vsel %vm1989_vm4, %v3302_v56, %v3306_v34 }
 0x2e7   : >> { %10195 = vmatprep.subr.bf16.mxu1 %v11311_v9 }
 0x2ea   : >> { %10196 = vmatpush3.bf16.msra.mxu1 %v11311_v9  ;;  %v3315_v9 = vsel %vm1989_vm4, %v3310_v15, %v3314_v6  ;;  %v11318_v15 = vld [vmem:[%s14059_s4 + $0x30] sm:$0xff]  }
 0x2eb   : >> { %10213 = vmatprep.subr.bf16.mxu1 %v11312_v23 }
 0x2ed   : >> { %10198 = vmatmul.mubr.bf16.vlgmr.msra.gmra.mrb[80].mxu1 %v3291_v24 }
 0x2ee   : >> { %10201 = vmatprep.mubr.bf16.mxu1 %v3299_v47  ;;  %10214 = vmatpush3.bf16.msra.mxu1 %v11312_v23  ;;  %v3318_v23 = vor.u32 %v14100_v63, %v3314_v6  ;;  %v11317_v47 = vld [vmem:[%s14059_s4 + $0x28] sm:$0xff]   ;;  %v14103_v6 = vshrl.u32 %v12216_v20, 16  ;;  %v11323_v63 = vld [vmem:[%s14059_s4 + $0x98] sm:$0xff]  }
 0x2ef   : >> { %10215 = vmatprep.subr.bf16.mxu1 %v11313_v31 }
 0x2f0   : >> { %v3323_v34 = vsel %vm1989_vm4, %v3318_v23, %v3322_v11  ;;  %v11320_v11 = vld [vmem:[%s14059_s4 + $0x80] sm:$0xff]   ;;  %v11325_v23 = vld [vmem:[%s14059_s4 + $0xa8] sm:$0xff]  }
 0x2f2   : >> { %10216 = vmatpush3.bf16.msra.mxu1 %v11313_v31  ;;  %v14102_v31 = vshll.u32 %v12216_v20, 16 }
 0x2f3   : >> { %10217 = vmatprep.subr.bf16.mxu1 %v11314_v21 }
 0x2f4   : >> { %v3330_v24 = vrot.slane %v14102_v31, 1  ;;  %v3665_v31 = vrot.slane %v12201_v44, 1 }
 0x2f5   : >> { %10202 = vmatmul.mubr.bf16.gmra.mrb[84].mxu1 %v3307_v57 }
 0x2f6   : >> { %10205 = vmatprep.mubr.bf16.mxu1 %v3315_v9  ;;  %10218 = vmatpush3.bf16.msra.mxu1 %v11314_v21  ;;  %v3336_v21 = vshll.u32 %v12618_v53, 16  ;;  %v3331_v56 = vsel %vm1989_vm4, %v3326_v61, %v3330_v24  ;;  %v11319_v9 = vld [vmem:[%s14059_s4 + $0x38] sm:$0xff]   ;;  %v3664_v61 = vrot.slane %v3638_v41, 1 }
 0x2f7   : >> { %10219 = vmatprep.subr.bf16.mxu1 %v11315_v26 }
 0x2f8   : >> { %v3338_v57 = vrot.slane %v3336_v21, 1  ;;  %v3669_v21 = vrot.slane %v12303_v28, 1 }
 0x2fa   : >> { %10220 = vmatpush3.bf16.msra.mxu1 %v11315_v26  ;;  %v3334_v26 = vor.u32 %v14103_v6, %v3330_v24  ;;  %v11327_v24 = vld [vmem:[%s14059_s4 + $0xb8] sm:$0xff]  }
 0x2fb   : >> { %10221 = vmatprep.subr.bf16.mxu1 %v11316_v50 }
 0x2fc   : >> { %v3339_v18 = vsel %vm1989_vm4, %v3334_v26, %v3338_v57  ;;  %v11330_v26 = vld [vmem:[%s14059_s4 + $0xd0] sm:$0xff]   ;;  %v12686_v57 = vld [vmem:[#allocation2 + $0x60] sm:$0xff] }
 0x2fd   : >> { %10206 = vmatmul.mubr.bf16.gmra.mrb[88].mxu1 %v3323_v34  ;;  %v12674_v34 = vld [vmem:[#allocation2 + $0x50] sm:$0xff] }
 0x2fe   : >> { %10209 = vmatprep.mubr.bf16.mxu1 %v3331_v56  ;;  %10222 = vmatpush3.bf16.msra.mxu1 %v11316_v50  ;;  %v11321_v50 = vld [vmem:[%s14059_s4 + $0x88] sm:$0xff]  }
 0x2ff   : >> { %10223 = vmatprep.subr.bf16.mxu1 %v11317_v47  ;;  %v11329_v56 = vld [vmem:[%s14059_s4 + $0xc8] sm:$0xff]  }
 0x302   : >> { %10224 = vmatpush3.bf16.msra.mxu1 %v11317_v47  ;;  %v11328_v47 = vld [vmem:[%s14059_s4 + $0xc0] sm:$0xff]  }
 0x303   : >> { %10225 = vmatprep.subr.bf16.mxu1 %v11318_v15 }
 0x305   : >> { %10210 = vmatmul.mubr.bf16.gmra.mrb[92].mxu1 %v3339_v18  ;;  %v12689_v18 = vld [vmem:[#allocation2 + $0x68] sm:$0xff] }
 0x306   : >> { %10226 = vmatpush3.bf16.msra.mxu1 %v11318_v15  ;;  %10229 = vmatprep.mubr.bf16.mxu1 %v12528_v39  ;;  %v11322_v39 = vld [vmem:[%s14059_s4 + $0x90] sm:$0xff]  }
 0x307   : >> { %10227 = vmatprep.subr.bf16.mxu1 %v11319_v9 }
 0x30a   : >> { %10228 = vmatpush3.bf16.msra.mxu1 %v11319_v9  ;;  %v3671_v9 = vrot.slane %v12686_v57, 1 }
 0x30b   : >> { %10245 = vmatprep.subr.bf16.mxu1 %v11320_v11 }
 0x30d   : >> { %10230 = vmatmul.mubr.bf16.vlgmr.msra.gmra.mrb[80].mxu1 %v12201_v44  ;;  %v3667_v44 = vrot.slane %v12674_v34, 1 }
 0x30e   : >> { %10233 = vmatprep.mubr.bf16.mxu1 %v12195_v19  ;;  %10246 = vmatpush3.bf16.msra.mxu1 %v11320_v11  ;;  %v11324_v19 = vld [vmem:[%s14059_s4 + $0xa0] sm:$0xff]   ;;  %v3673_v11 = vrot.slane %v12689_v18, 1 }
 0x30f   : >> { %10247 = vmatprep.subr.bf16.mxu1 %v11321_v50  ;;  %v3668_v15 = vsel %vm2382_vm5, %v3665_v31, %v3667_v44  ;;  %v3670_v6 = vsel %vm2382_vm5, %v3667_v44, %v3669_v21 }
 0x312   : >> { %10248 = vmatpush3.bf16.msra.mxu1 %v11321_v50  ;;  %v11331_v50 = vld [vmem:[%s14059_s4 + $0xd8] sm:$0xff]  }
 0x313   : >> { %10249 = vmatprep.subr.bf16.mxu1 %v11322_v39 }
 0x315   : >> { %10234 = vmatmul.mubr.bf16.gmra.mrb[84].mxu1 %v12303_v28 }
 0x316   : >> { %10237 = vmatprep.mubr.bf16.mxu1 %v12205_v42  ;;  %10250 = vmatpush3.bf16.msra.mxu1 %v11322_v39  ;;  %v11326_v42 = vld [vmem:[%s14059_s4 + $0xb0] sm:$0xff]   ;;  %v3672_v39 = vsel %vm2382_vm5, %v3669_v21, %v3671_v9 }
 0x317   : >> { %10251 = vmatprep.subr.bf16.mxu1 %v11323_v63 }
 0x31a   : >> { %10252 = vmatpush3.bf16.msra.mxu1 %v11323_v63  ;;  %v3674_v63 = vsel %vm2382_vm5, %v3671_v9, %v3673_v11  ;;  %v11339_v9 = vld [vmem:[%s14059_s4 + $0x118] sm:$0xff]  }
 0x31b   : >> { %10253 = vmatprep.subr.bf16.mxu1 %v11324_v19 }
 0x31d   : >> { %10238 = vmatmul.mubr.bf16.gmra.mrb[88].mxu1 %v12198_v40  ;;  %v3666_v40 = vsel %vm2382_vm5, %v3664_v61, %v3665_v31  ;;  %v3868_v61 = vshrl.u32 %v3638_v41, 16  ;;  %v3871_v31 = vshll.u32 %v3638_v41, 16 }
 0x31e   : >> { %10241 = vmatprep.mubr.bf16.mxu1 %v12219_v37  ;;  %10254 = vmatpush3.bf16.msra.mxu1 %v11324_v19  ;;  %v11332_v19 = vld [vmem:[%s14059_s4 + $0xe0] sm:$0xff]  }
 0x31f   : >> { %10255 = vmatprep.subr.bf16.mxu1 %v11325_v23  ;;  %v3870_v44 = vrot.slane %v3868_v61, 1  ;;  %v3873_v21 = vrot.slane %v3871_v31, 2  ;;  %v11589_v61 = vld [vmem:[#allocation2 + $0x48] sm:$0xff] }
 0x320   : >> { %v4101_v31 = vrot.slane %v11589_v61, 2 }
 0x321   : >> { %v3874_v41 = vor.u32 %v3873_v21, %v3870_v44 }
 0x322   : >> { %10256 = vmatpush3.bf16.msra.mxu1 %v11325_v23  ;;  %v3675_v23 = vrot.slane %v12219_v37, 1  ;;  %v3679_v37 = vrot.slane %v12618_v53, 1  ;;  %v11336_v53 = vld [vmem:[%s14059_s4 + $0x100] sm:$0xff]  }
 0x323   : >> { %10257 = vmatprep.subr.bf16.mxu1 %v11326_v42 }
 0x325   : >> { %10242 = vmatmul.mubr.bf16.gmra.mrb[92].mxu1 %v12216_v20 }
 0x326   : >> { %10258 = vmatpush3.bf16.msra.mxu1 %v11326_v42  ;;  %10261 = vmatprep.mubr.bf16.mxu1 %v3666_v40  ;;  %v3677_v42 = vrot.slane %v12216_v20, 1  ;;  %v3676_v40 = vsel %vm2382_vm5, %v3673_v11, %v3675_v23  ;;  %v11334_v20 = vld [vmem:[%s14059_s4 + $0xf0] sm:$0xff]   ;;  %v3850_v11 = vld [vmem:[#allocation2 + $0x80] sm:$0x3] }
 0x327   : >> { %10259 = vmatprep.subr.bf16.mxu1 %v11327_v24 }
 0x32a   : >> { %10260 = vmatpush3.bf16.msra.mxu1 %v11327_v24  ;;  %v11333_v24 = vld [vmem:[%s14059_s4 + $0xe8] sm:$0xff]  }
 0x32b   : >> { %10277 = vmatprep.subr.bf16.mxu1 %v11328_v47 }
 0x32d   : >> { %10262 = vmatmul.mubr.bf16.vlgmr.msra.gmra.mrb[80].mxu1 %v3668_v15  ;;  %v3680_v15 = vsel %vm2382_vm5, %v3677_v42, %v3679_v37 }
 0x32e   : >> { %10265 = vmatprep.mubr.bf16.mxu1 %v3670_v6  ;;  %10278 = vmatpush3.bf16.msra.mxu1 %v11328_v47  ;;  %v3678_v47 = vsel %vm2382_vm5, %v3675_v23, %v3677_v42  ;;  %v3878_v6 = vsel %vm2586_vm6, %v3874_v41, %v12240_v49  ;;  %v11338_v49 = vld [vmem:[%s14059_s4 + $0x110] sm:$0xff]  }
 0x32f   : >> { %10279 = vmatprep.subr.bf16.mxu1 %v11329_v56 }
 0x332   : >> { %10280 = vmatpush3.bf16.msra.mxu1 %v11329_v56  ;;  %v11335_v56 = vld [vmem:[%s14059_s4 + $0xf8] sm:$0xff]  }
 0x333   : >> { %10281 = vmatprep.subr.bf16.mxu1 %v11330_v26 }
 0x335   : >> { %10266 = vmatmul.mubr.bf16.gmra.mrb[84].mxu1 %v3672_v39  ;;  %v11341_v39 = vld [vmem:[%s14059_s4 + $0x128] sm:$0xff]  }
 0x336   : >> { %10269 = vmatprep.mubr.bf16.mxu1 %v3674_v63  ;;  %10282 = vmatpush3.bf16.msra.mxu1 %v11330_v26  ;;  %v11337_v26 = vld [vmem:[%s14059_s4 + $0x108] sm:$0xff]  }
 0x337   : >> { %10283 = vmatprep.subr.bf16.mxu1 %v11331_v50 }
 0x33a   : >> { %10284 = vmatpush3.bf16.msra.mxu1 %v11331_v50  ;;  %v3907_v50 = vshll.u32 %v3850_v11, 16 }
 0x33b   : >> { %10285 = vmatprep.subr.bf16.mxu1 %v11332_v19 }
 0x33d   : >> { %10270 = vmatmul.mubr.bf16.gmra.mrb[88].mxu1 %v3676_v40  ;;  %v4103_v40 = vrot.slane %v12674_v34, 2  ;;  %v11590_v34 = vld [vmem:[#allocation2 + $0x70] sm:$0xff] }
 0x33e   : >> { %10273 = vmatprep.mubr.bf16.mxu1 %v3678_v47  ;;  %10286 = vmatpush3.bf16.msra.mxu1 %v11332_v19  ;;  %v3909_v19 = vrot.slane %v3907_v50, 2  ;;  %v4105_v47 = vrot.slane %v12303_v28, 2  ;;  %v11591_v28 = vld [vmem:[#allocation2 + $0x78] sm:$0xff] }
 0x33f   : >> { %10287 = vmatprep.subr.bf16.mxu1 %v11333_v24  ;;  %v4104_v44 = vsel %vm2820_vm7, %v4101_v31, %v4103_v40 }
 0x340   : >> { %v4106_v21 = vsel %vm2820_vm7, %v4103_v40, %v4105_v47 }
 0x342   : >> { %10288 = vmatpush3.bf16.msra.mxu1 %v11333_v24  ;;  %v11343_v24 = vld [vmem:[%s14059_s4 + $0x138] sm:$0xff]  }
 0x343   : >> { %10289 = vmatprep.subr.bf16.mxu1 %v11334_v20 }
 0x345   : >> { %10274 = vmatmul.mubr.bf16.gmra.mrb[92].mxu1 %v3680_v15  ;;  %v4113_v15 = vrot.slane %v11591_v28, 2 }
 0x346   : >> { %10290 = vmatpush3.bf16.msra.mxu1 %v11334_v20  ;;  %10293 = vmatprep.mubr.bf16.mxu1 %v3878_v6  ;;  %v4107_v20 = vrot.slane %v12686_v57, 2  ;;  %v4115_v57 = vrot.slane %v3850_v11, 2 }
 0x347   : >> { %10291 = vmatprep.subr.bf16.mxu1 %v11335_v56 }
 0x348   : >> { %v4108_v37 = vsel %vm2820_vm7, %v4105_v47, %v4107_v20 }
 0x34a   : >> { %10292 = vmatpush3.bf16.msra.mxu1 %v11335_v56  ;;  %v4111_v56 = vrot.slane %v11590_v34, 2 }
 0x34b   : >> { %10309 = vmatprep.subr.bf16.mxu1 %v11336_v53 }
 0x34d   : >> { %10294 = vmatmul.mubr.bf16.vlgmr.msra.gmra.mrb[80].mxu1 %v12250_v38  ;;  %v11340_v38 = vld [vmem:[%s14059_s4 + $0x120] sm:$0xff]  }
 0x34e   : >> { %10297 = vmatprep.mubr.bf16.mxu1 %v12340_v62  ;;  %10310 = vmatpush3.bf16.msra.mxu1 %v11336_v53  ;;  %v3904_v62 = vshrl.u32 %v3850_v11, 16  ;;  %v4114_v53 = vsel %vm2820_vm7, %v4111_v56, %v4113_v15 }
 0x34f   : >> { %10311 = vmatprep.subr.bf16.mxu1 %v11337_v26 }
 0x350   : >> { %v3906_v63 = vrot.slane %v3904_v62, 1 }
 0x352   : >> { %10312 = vmatpush3.bf16.msra.mxu1 %v11337_v26  ;;  %v3910_v23 = vor.u32 %v3909_v19, %v3906_v63  ;;  %v12765_v19 = vld [vmem:[%s14060_s5] ss:$0 sm:$0xff] }
 0x353   : >> { %10313 = vmatprep.subr.bf16.mxu1 %v11338_v49 }
 0x355   : >> { %10298 = vmatmul.mubr.bf16.gmra.mrb[84].mxu1 %v12343_v3  ;;  %v4081_v3 = vld [vmem:[#allocation2 + $0x40] sm:$0xfc] }
 0x356   : >> { %10301 = vmatprep.mubr.bf16.mxu1 %v12346_v17  ;;  %10314 = vmatpush3.bf16.msra.mxu1 %v11338_v49  ;;  %v11342_v17 = vld [vmem:[%s14059_s4 + $0x130] sm:$0xff]   ;;  %v4100_v42 = vrot.slane %v4081_v3, 2 }
 0x357   : >> { %10315 = vmatprep.subr.bf16.mxu1 %v11339_v9 }
 0x35a   : >> { %10316 = vmatpush3.bf16.msra.mxu1 %v11339_v9 }
 0x35b   : >> { %10317 = vmatprep.subr.bf16.mxu1 %v11340_v38 }
 0x35d   : >> { %10302 = vmatmul.mubr.bf16.gmra.mrb[88].mxu1 %v12365_v8  ;;  %v3911_v8 = vsel %vm2586_vm6, %v12362_v29, %v3910_v23  ;;  %v4109_v29 = vrot.slane %v12689_v18, 2 }
 0x35e   : >> { %10305 = vmatprep.mubr.bf16.mxu1 %v12369_v22  ;;  %10318 = vmatpush3.bf16.msra.mxu1 %v11340_v38  ;;  %v4102_v22 = vsel %vm2820_vm7, %v4100_v42, %v4101_v31  ;;  %v4116_v38 = vsel %vm2820_vm7, %v4113_v15, %v4115_v57 }
 0x35f   : >> { %10319 = vmatprep.subr.bf16.mxu1 %v11341_v39  ;;  %v4110_v41 = vsel %vm2820_vm7, %v4107_v20, %v4109_v29  ;;  %v4112_v6 = vsel %vm2820_vm7, %v4109_v29, %v4111_v56 }
 0x362   : >> { %10320 = vmatpush3.bf16.msra.mxu1 %v11341_v39 }
 0x363   : >> { %10321 = vmatprep.subr.bf16.mxu1 %v11342_v17 }
 0x365   : >> { %10306 = vmatmul.mubr.bf16.gmra.mrb[92].mxu1 %v3911_v8 }
 0x366   : >> { %10322 = vmatpush3.bf16.msra.mxu1 %v11342_v17  ;;  %10325 = vmatprep.mubr.bf16.mxu1 %v4102_v22 }
 0x367   : >> { %10323 = vmatprep.subr.bf16.mxu1 %v11343_v24 }
 0x36a   : >> { %10324 = vmatpush3.bf16.msra.mxu1 %v11343_v24 }
 0x36d   : >> { %10326 = vmatmul.mubr.bf16.vlgmr.msra.gmra.mrb[80].mxu1 %v4104_v44 }
 0x36e   : >> { %10329 = vmatprep.mubr.bf16.mxu1 %v4106_v21 }
 0x375   : >> { %10330 = vmatmul.mubr.bf16.gmra.mrb[84].mxu1 %v4108_v37 }
 0x376   : >> { %10333 = vmatprep.mubr.bf16.mxu1 %v4110_v41 }
 0x37d   : >> { %10334 = vmatmul.mubr.bf16.gmra.mrb[88].mxu1 %v4112_v6 }
 0x37e   : >> { %10337 = vmatprep.mubr.bf16.mxu1 %v4114_v53 }
 0x380   : >> { %v10151_v26 = vpop.f32.mrb[64].mxu1 }
 0x381   : >> { %v3073_v49 = vpop.f32.mrb[65].mxu1 }
 0x382   : >> { %v10152_v18 = vpop.f32.mrb[66].mxu1 }
 0x383   : >> { %v3076_v9 = vpop.f32.mrb[67].mxu1 }
 0x385   : >> { %10338 = vmatmul.mubr.bf16.gmra.mrb[92].mxu1 %v4116_v38 }
 0x386   : >> { %10565 = vmatprep.mubr.bf16.mxu1 %v12500_v13 }
 0x388   : >> { %v10155_v62 = vpop.f32.mrb[68].mxu1 }
 0x389   : >> { %v3089_v50 = vpop.f32.mrb[69].mxu1 }
 0x38a   : >> { %v10156_v39 = vpop.f32.mrb[70].mxu1 }
 0x38b   : >> { %v3092_v63 = vpop.f32.mrb[71].mxu1 }
 0x3a0   : >> { %v10175_v3 = vpop.f32.mrb[72].mxu1 }
 0x3a1   : >> { %v3195_v17 = vmax.f32 %v10151_v26, %v10175_v3  ;;  %v3162_v11 = vpop.f32.mrb[73].mxu1 }
 0x3a2   : >> { %v3193_v23 = vmax.f32 %v3073_v49, %v3162_v11  ;;  %v10176_v42 = vpop.f32.mrb[74].mxu1 }
 0x3a3   : >> { %v3209_v61 = vadd.f32 %v12765_v19, %v3195_v17  ;;  %v3196_v31 = vmax.f32 %v10152_v18, %v10176_v42  ;;  %v3165_v24 = vpop.f32.mrb[75].mxu1 }
 0x3a4   : >> { %v3207_v13 = vadd.f32 %v12765_v19, %v3193_v23  ;;  %v3194_v8 = vmax.f32 %v3076_v9, %v3165_v24 }
 0x3a5   : >> { %v3210_v22 = vadd.f32 %v12765_v19, %v3196_v31  ;;  %v3217_v47 = vmax.f32 %v3209_v61, 0.0 }
 0x3a6   : >> { %v3208_v40 = vadd.f32 %v12765_v19, %v3194_v8  ;;  %v3215_v21 = vmax.f32 %v3207_v13, 0.0 }
 0x3a7   : >> { %v3218_v44 = vmax.f32 %v3210_v22, 0.0 }
 0x3a8   : >> { %v3216_v20 = vmax.f32 %v3208_v40, 0.0  ;;  %v10179_v29 = vpop.f32.mrb[76].mxu1 }
 0x3a9   : >> { %v3224_v37 = vpack.c.bf16 %v3218_v44, %v3217_v47  ;;  %v3199_v41 = vmax.f32 %v10155_v62, %v10179_v29  ;;  %v3178_v34 = vpop.f32.mrb[77].mxu1 }
 0x3aa   : >> { %v3223_v56 = vpack.c.bf16 %v3216_v20, %v3215_v21  ;;  %v3197_v28 = vmax.f32 %v3089_v50, %v3178_v34  ;;  %v10180_v15 = vpop.f32.mrb[78].mxu1 }
 0x3ab   : >> { %3228 = vst [vmem:[#allocation3 + $0x8] sm:$0xff] %v3224_v37  ;;  %v3213_v6 = vadd.f32 %v12765_v19, %v3199_v41  ;;  %v3200_v53 = vmax.f32 %v10156_v39, %v10180_v15  ;;  %v3181_v26 = vpop.f32.mrb[79].mxu1 }
 0x3ac   : >> { %3227 = vst [vmem:[#allocation3] sm:$0xff] %v3223_v56  ;;  %v3211_v57 = vadd.f32 %v12765_v19, %v3197_v28  ;;  %v3198_v49 = vmax.f32 %v3092_v63, %v3181_v26 }
 0x3ad   : >> { %v3214_v18 = vadd.f32 %v12765_v19, %v3200_v53  ;;  %v3221_v38 = vmax.f32 %v3213_v6, 0.0 }
 0x3ae   : >> { %v3212_v9 = vadd.f32 %v12765_v19, %v3198_v49  ;;  %v3219_v62 = vmax.f32 %v3211_v57, 0.0 }
 0x3af   : >> { %v3222_v3 = vmax.f32 %v3214_v18, 0.0 }
 0x3b0   : >> { %v3220_v17 = vmax.f32 %v3212_v9, 0.0 }
 0x3b1   : >> { %v3226_v11 = vpack.c.bf16 %v3222_v3, %v3221_v38 }
 0x3b2   : >> { %v3225_v50 = vpack.c.bf16 %v3220_v17, %v3219_v62  ;;  %v12775_v23 = vld [vmem:[#allocation3 + $0x8] sm:$0xff] }
 0x3b3   : >> { %3230 = vst [vmem:[#allocation3 + $0x18] sm:$0xff] %v3226_v11  ;;  %v5742_v39 = vshll.u32 %v12775_v23, 16  ;;  %v5746_v42 = vshrl.u32 %v12775_v23, 16 }
 0x3b4   : >> { %3229 = vst [vmem:[#allocation3 + $0x10] sm:$0xff] %v3225_v50 }
 0x3b5   : >> { %v6481_v63 = vrot.slane %v5746_v42, 1  ;;  %v6482_v61 = vrot.slane %v5742_v39, 2 }
 0x3b7   : >> { %v12783_v31 = vor.u32 %v6482_v61, %v6481_v63 }
 0x3ba   : >> { %v12785_v24 = vld [vmem:[#allocation3 + $0x18] sm:$0xff] }
 0x3bb   : >> { %v12787_v13 = vld [vmem:[#allocation3 + $0x10] sm:$0xff]  ;;  %v5758_v8 = vshll.u32 %v12785_v24, 16  ;;  %v5762_v22 = vshrl.u32 %v12785_v24, 16 }
 0x3bc   : >> { %v5750_v40 = vshll.u32 %v12787_v13, 16  ;;  %v5754_v47 = vshrl.u32 %v12787_v13, 16 }
 0x3bd   : >> { %v6489_v44 = vrot.slane %v5762_v22, 1  ;;  %v6490_v21 = vrot.slane %v5758_v8, 2 }
 0x3be   : >> { %v6485_v20 = vrot.slane %v5754_v47, 1  ;;  %v6486_v29 = vrot.slane %v5750_v40, 2 }
 0x3bf   : >> { %v12801_v37 = vor.u32 %v6490_v21, %v6489_v44 }
 0x3c0   : >> { %v6487_v41 = vor.u32 %v6486_v29, %v6485_v20 }
 0x3c2   : >> { %v12805_v34 = vsel %vm2586_vm6, %v12783_v31, %v6487_v41  ;;  %v12809_v56 = vsel %vm2586_vm6, %v6487_v41, %v12801_v37 }
 0x440   : >> { %v10327_v28 = vpop.f32.mrb[80].mxu1 }
 0x441   : >> { %v4207_v15 = vpop.f32.mrb[81].mxu1 }
 0x442   : >> { %v10328_v6 = vpop.f32.mrb[82].mxu1 }
 0x443   : >> { %v4287_v53 = vpack.c.bf16 %v10328_v6, %v10327_v28  ;;  %v4210_v26 = vpop.f32.mrb[83].mxu1 }
 0x444   : >> { %v4286_v57 = vpack.c.bf16 %v4210_v26, %v4207_v15  ;;  %v11346_v26 = vld [vmem:[%s14059_s4 + $0x50] sm:$0xff]  }
 0x446   : >> { %10341 = vmatprep.subr.bf16.mxu0 %v4286_v57 }
 0x447   : >> { %10342 = vmatpush3.bf16.msra.mxu0 %v4286_v57 }
 0x448   : >> { %v10331_v49 = vpop.f32.mrb[84].mxu1  ;;  %10343 = vmatprep.subr.bf16.mxu0 %v4287_v53 }
 0x449   : >> { %v4223_v18 = vpop.f32.mrb[85].mxu1 }
 0x44a   : >> { %v10332_v9 = vpop.f32.mrb[86].mxu1 }
 0x44b   : >> { %v4289_v38 = vpack.c.bf16 %v10332_v9, %v10331_v49  ;;  %v4226_v3 = vpop.f32.mrb[87].mxu1  ;;  %10344 = vmatpush3.bf16.msra.mxu0 %v4287_v53  ;;  %v14104_v49 = vshll.u32 %v12379_v51, 16 }
 0x44c   : >> { %v4288_v62 = vpack.c.bf16 %v4226_v3, %v4223_v18  ;;  %v11351_v3 = vld [vmem:[%s14059_s4 + $0x78] sm:$0xff]  }
 0x44d   : >> { %v4515_v18 = vrot.slane %v14104_v49, 1 }
 0x44e   : >> { %10345 = vmatprep.subr.bf16.mxu0 %v4288_v62 }
 0x44f   : >> { %10346 = vmatpush3.bf16.msra.mxu0 %v4288_v62 }
 0x450   : >> { %v10335_v17 = vpop.f32.mrb[88].mxu1  ;;  %10347 = vmatprep.subr.bf16.mxu0 %v4289_v38 }
 0x451   : >> { %v4239_v11 = vpop.f32.mrb[89].mxu1 }
 0x452   : >> { %v10336_v50 = vpop.f32.mrb[90].mxu1 }
 0x453   : >> { %v4291_v63 = vpack.c.bf16 %v10336_v50, %v10335_v17  ;;  %v4242_v61 = vpop.f32.mrb[91].mxu1  ;;  %10348 = vmatpush3.bf16.msra.mxu0 %v4289_v38  ;;  %v14106_v50 = vshrl.u32 %v12379_v51, 16  ;;  %v14109_v51 = vshll.u32 %v12409_v16, 16 }
 0x454   : >> { %v4290_v44 = vpack.c.bf16 %v4242_v61, %v4239_v11  ;;  %v11352_v11 = vld [vmem:[%s14059_s4] sm:$0xff]   ;;  %v14107_v61 = vshrl.u32 %v12381_v2, 16 }
 0x456   : >> { %10349 = vmatprep.subr.bf16.mxu0 %v4290_v44 }
 0x457   : >> { %10350 = vmatpush3.bf16.msra.mxu0 %v4290_v44 }
 0x458   : >> { %v10339_v21 = vpop.f32.mrb[92].mxu1  ;;  %10351 = vmatprep.subr.bf16.mxu0 %v4291_v63 }
 0x459   : >> { %v4255_v20 = vpop.f32.mrb[93].mxu1 }
 0x45a   : >> { %v10340_v29 = vpop.f32.mrb[94].mxu1 }
 0x45b   : >> { %v4293_v41 = vpack.c.bf16 %v10340_v29, %v10339_v21  ;;  %v4258_v28 = vpop.f32.mrb[95].mxu1  ;;  %10352 = vmatpush3.bf16.msra.mxu0 %v4291_v63  ;;  %v14108_v21 = vshll.u32 %v12405_v48, 16  ;;  %v11353_v29 = vld [vmem:[%s14059_s4 + $0x8] sm:$0xff]  }
 0x45c   : >> { %v4292_v15 = vpack.c.bf16 %v4258_v28, %v4255_v20 }
 0x45d   : >> { %v4531_v20 = vrot.slane %v14108_v21, 1  ;;  %v12931_v21 = vld [vmem:[#allocation2 + $0xa0] sm:$0xff] }
 0x45e   : >> { %10353 = vmatprep.subr.bf16.mxu0 %v4292_v15 }
 0x45f   : >> { %10354 = vmatpush3.bf16.msra.mxu0 %v4292_v15 }
 0x460   : >> { %10355 = vmatprep.subr.bf16.mxu0 %v4293_v41 }
 0x463   : >> { %10356 = vmatpush3.bf16.msra.mxu0 %v4293_v41 }
 0x464   : >> { %10365 = vmatprep.subr.bf16.mxu0 %v4286_v57 }
 0x466   : >> { %10358 = vmatmul.mubr.bf16.vlgmr.msra.gmra.mrb[48].mxu0 %v12507_v32  ;;  %v12815_v32 = vld [vmem:[#allocation2 + $0x80] sm:$0xff] }
 0x467   : >> { %10366 = vmatpush3.bf16.msra.mxu0 %v4286_v57  ;;  %10361 = vmatprep.mubr.bf16.mxu0 %v12512_v45  ;;  %v11344_v45 = vld [vmem:[%s14059_s4 + $0x40] sm:$0xff]   ;;  %v4506_v6 = vshrl.u32 %v12815_v32, 16 }
 0x468   : >> { %10367 = vmatprep.subr.bf16.mxu0 %v4287_v53 }
 0x46b   : >> { %10368 = vmatpush3.bf16.msra.mxu0 %v4287_v53 }
 0x46c   : >> { %10369 = vmatprep.subr.bf16.mxu0 %v4288_v62 }
 0x46e   : >> { %10362 = vmatmul.mubr.bf16.gmra.mrb[52].mxu0 %v12519_v25  ;;  %v4508_v25 = vshll.u32 %v12815_v32, 16 }
 0x46f   : >> { %10370 = vmatpush3.bf16.msra.mxu0 %v4288_v62  ;;  %10381 = vmatprep.mubr.bf16.mxu0 %v12524_v54  ;;  %v11345_v54 = vld [vmem:[%s14059_s4 + $0x48] sm:$0xff]   ;;  %v14105_v62 = vshll.u32 %v12381_v2, 16  ;;  %v4539_v2 = vrot.slane %v14109_v51, 1  ;;  %v4871_v51 = vld [vmem:[#allocation2 + $0x80] sm:$0xfe] }
 0x470   : >> { %10371 = vmatprep.subr.bf16.mxu0 %v4289_v38  ;;  %v4510_v53 = vrot.slane %v4508_v25, 1 }
 0x471   : >> { %v4523_v17 = vrot.slane %v14105_v62, 1 }
 0x472   : >> { %v4511_v57 = vor.u32 %v4510_v53, %v4506_v6  ;;  %v4547_v53 = vrot.slane %v4545_v35, 1  ;;  %v14112_v35 = vshrl.u32 %v12437_v33, 16 }
 0x473   : >> { %10372 = vmatpush3.bf16.msra.mxu0 %v4289_v38  ;;  %v11349_v38 = vld [vmem:[%s14059_s4 + $0x68] sm:$0xff]  }
 0x474   : >> { %10373 = vmatprep.subr.bf16.mxu0 %v4290_v44  ;;  %v4516_v9 = vsel %vm1989_vm4, %v4511_v57, %v4515_v18 }
 0x477   : >> { %10374 = vmatpush3.bf16.msra.mxu0 %v4290_v44  ;;  %v4527_v44 = vor.u32 %v14107_v61, %v4523_v17  ;;  %v11363_v61 = vld [vmem:[%s14059_s4 + $0x98] sm:$0xff]  }
 0x478   : >> { %10375 = vmatprep.subr.bf16.mxu0 %v4291_v63 }
 0x479   : >> { %v4532_v28 = vsel %vm1989_vm4, %v4527_v44, %v4531_v20  ;;  %v12928_v44 = vld [vmem:[#allocation2 + $0x98] sm:$0xff] }
 0x47b   : >> { %10376 = vmatpush3.bf16.msra.mxu0 %v4291_v63  ;;  %v4519_v63 = vor.u32 %v14106_v50, %v4515_v18  ;;  %v4551_v18 = vor.u32 %v14112_v35, %v4547_v53  ;;  %v11360_v50 = vld [vmem:[%s14059_s4 + $0x80] sm:$0xff]   ;;  %v11370_v35 = vld [vmem:[%s14059_s4 + $0xd0] sm:$0xff]  }
 0x47c   : >> { %10377 = vmatprep.subr.bf16.mxu0 %v4292_v15 }
 0x47f   : >> { %10378 = vmatpush3.bf16.msra.mxu0 %v4292_v15  ;;  %v11354_v15 = vld [vmem:[%s14059_s4 + $0x10] sm:$0xff]  }
 0x480   : >> { %10379 = vmatprep.subr.bf16.mxu0 %v4293_v41 }
 0x483   : >> { %10380 = vmatpush3.bf16.msra.mxu0 %v4293_v41  ;;  %v4524_v41 = vsel %vm1989_vm4, %v4519_v63, %v4523_v17  ;;  %v11359_v17 = vld [vmem:[%s14059_s4 + $0x38] sm:$0xff]   ;;  %v12919_v63 = vld [vmem:[#allocation2 + $0x90] sm:$0xff] }
 0x484   : >> { %10389 = vmatprep.subr.bf16.mxu0 %v11344_v45 }
 0x486   : >> { %10382 = vmatmul.mubr.bf16.vlgmr.msra.gmra.mrb[56].mxu0 %v12536_v36  ;;  %v11347_v36 = vld [vmem:[%s14059_s4 + $0x58] sm:$0xff]  }
 0x487   : >> { %10390 = vmatpush3.bf16.msra.mxu0 %v11344_v45  ;;  %10385 = vmatprep.mubr.bf16.mxu0 %v12542_v58  ;;  %v11348_v58 = vld [vmem:[%s14059_s4 + $0x60] sm:$0xff]   ;;  %v14110_v45 = vshrl.u32 %v12405_v48, 16  ;;  %v4555_v48 = vrot.slane %v4553_v1, 1  ;;  %v11357_v1 = vld [vmem:[%s14059_s4 + $0x28] sm:$0xff]  }
 0x488   : >> { %10391 = vmatprep.subr.bf16.mxu0 %v11345_v54 }
 0x489   : >> { %v4535_v25 = vor.u32 %v14110_v45, %v4531_v20  ;;  %v11364_v20 = vld [vmem:[%s14059_s4 + $0xa0] sm:$0xff]  }
 0x48b   : >> { %10392 = vmatpush3.bf16.msra.mxu0 %v11345_v54  ;;  %v14111_v54 = vshrl.u32 %v12409_v16, 16  ;;  %v4540_v57 = vsel %vm1989_vm4, %v4535_v25, %v4539_v2  ;;  %v11356_v16 = vld [vmem:[%s14059_s4 + $0x20] sm:$0xff]   ;;  %v11367_v25 = vld [vmem:[%s14059_s4 + $0xb8] sm:$0xff]  }
 0x48c   : >> { %10393 = vmatprep.subr.bf16.mxu0 %v11346_v26 }
 0x48d   : >> { %v4543_v6 = vor.u32 %v14111_v54, %v4539_v2  ;;  %v11366_v2 = vld [vmem:[%s14059_s4 + $0xb0] sm:$0xff]   ;;  %v12953_v54 = vld [vmem:[#allocation2 + $0xb8] sm:$0xff] }
 0x48e   : >> { %10386 = vmatmul.mubr.bf16.gmra.mrb[60].mxu0 %v12556_v43  ;;  %v11350_v43 = vld [vmem:[%s14059_s4 + $0x70] sm:$0xff]  }
 0x48f   : >> { %10394 = vmatpush3.bf16.msra.mxu0 %v11346_v26  ;;  %10405 = vmatprep.mubr.bf16.mxu0 %v4516_v9  ;;  %v11355_v26 = vld [vmem:[%s14059_s4 + $0x18] sm:$0xff]   ;;  %v4548_v49 = vsel %vm1989_vm4, %v4543_v6, %v4547_v53  ;;  %v11368_v53 = vld [vmem:[%s14059_s4 + $0xc0] sm:$0xff]  }
 0x490   : >> { %10395 = vmatprep.subr.bf16.mxu0 %v11347_v36 }
 0x493   : >> { %10396 = vmatpush3.bf16.msra.mxu0 %v11347_v36  ;;  %v14113_v36 = vshrl.u32 %v12439_v55, 16  ;;  %v11358_v55 = vld [vmem:[%s14059_s4 + $0x30] sm:$0xff]  }
 0x494   : >> { %10397 = vmatprep.subr.bf16.mxu0 %v11348_v58 }
 0x495   : >> { %v4559_v9 = vor.u32 %v14113_v36, %v4555_v48 }
 0x497   : >> { %10398 = vmatpush3.bf16.msra.mxu0 %v11348_v58  ;;  %v12890_v58 = vld [vmem:[#allocation2 + $0xc0] sm:$0x1] }
 0x498   : >> { %10399 = vmatprep.subr.bf16.mxu0 %v11349_v38 }
 0x49b   : >> { %10400 = vmatpush3.bf16.msra.mxu0 %v11349_v38  ;;  %v4563_v38 = vrot.slane %v4561_v46, 1 }
 0x49c   : >> { %10401 = vmatprep.subr.bf16.mxu0 %v11350_v43 }
 0x49d   : >> { %v4564_v33 = vsel %vm1989_vm4, %v4559_v9, %v4563_v38  ;;  %v4567_v46 = vor.u32 %v4565_v30, %v4563_v38  ;;  %v12916_v30 = vld [vmem:[#allocation2 + $0x88] sm:$0xff]  ;;  %v11371_v9 = vld [vmem:[%s14059_s4 + $0xd8] sm:$0xff]  }
 0x49e   : >> { %v4898_v45 = vrot.slane %v12916_v30, 1 }
 0x49f   : >> { %10402 = vmatpush3.bf16.msra.mxu0 %v11350_v43  ;;  %v4556_v43 = vsel %vm1989_vm4, %v4551_v18, %v4555_v48  ;;  %v4904_v18 = vrot.slane %v12931_v21, 1 }
 0x4a0   : >> { %10403 = vmatprep.subr.bf16.mxu0 %v11351_v3 }
 0x4a3   : >> { %10404 = vmatpush3.bf16.msra.mxu0 %v11351_v3  ;;  %v4569_v3 = vshll.u32 %v12890_v58, 16 }
 0x4a4   : >> { %10421 = vmatprep.subr.bf16.mxu0 %v11352_v11 }
 0x4a5   : >> { %v4571_v62 = vrot.slane %v4569_v3, 1 }
 0x4a6   : >> { %10406 = vmatmul.mubr.bf16.vlgmr.msra.gmra.mrb[64].mxu0 %v4524_v41  ;;  %v12940_v41 = vld [vmem:[#allocation2 + $0xa8] sm:$0xff] }
 0x4a7   : >> { %10409 = vmatprep.mubr.bf16.mxu0 %v4532_v28  ;;  %10422 = vmatpush3.bf16.msra.mxu0 %v11352_v11  ;;  %v4572_v11 = vsel %vm1989_vm4, %v4567_v46, %v4571_v62  ;;  %v12943_v28 = vld [vmem:[#allocation2 + $0xb0] sm:$0xff]  ;;  %v4906_v36 = vrot.slane %v12940_v41, 1  ;;  %v5104_v46 = vshll.u32 %v4871_v51, 16  ;;  %v11373_v62 = vld [vmem:[%s14059_s4 + $0xe8] sm:$0xff]  }
 0x4a8   : >> { %10423 = vmatprep.subr.bf16.mxu0 %v11353_v29  ;;  %v4908_v3 = vrot.slane %v12943_v28, 1 }
 0x4ab   : >> { %10424 = vmatpush3.bf16.msra.mxu0 %v11353_v29  ;;  %v11365_v29 = vld [vmem:[%s14059_s4 + $0xa8] sm:$0xff]  }
 0x4ac   : >> { %10425 = vmatprep.subr.bf16.mxu0 %v11354_v15 }
 0x4ae   : >> { %10410 = vmatmul.mubr.bf16.gmra.mrb[68].mxu0 %v4540_v57  ;;  %v4902_v57 = vrot.slane %v12928_v44, 1 }
 0x4af   : >> { %10413 = vmatprep.mubr.bf16.mxu0 %v4548_v49  ;;  %10426 = vmatpush3.bf16.msra.mxu0 %v11354_v15  ;;  %v4897_v15 = vrot.slane %v4871_v51, 1  ;;  %v11369_v49 = vld [vmem:[%s14059_s4 + $0xc8] sm:$0xff]  }
 0x4b0   : >> { %10427 = vmatprep.subr.bf16.mxu0 %v11355_v26  ;;  %v4905_v38 = vsel %vm2382_vm5, %v4902_v57, %v4904_v18 }
 0x4b1   : >> { %v4899_v6 = vsel %vm2382_vm5, %v4897_v15, %v4898_v45  ;;  %v11377_v15 = vld [vmem:[%s14059_s4 + $0x108] sm:$0xff]  }
 0x4b3   : >> { %10428 = vmatpush3.bf16.msra.mxu0 %v11355_v26  ;;  %v4900_v26 = vrot.slane %v12919_v63, 1 }
 0x4b4   : >> { %10429 = vmatprep.subr.bf16.mxu0 %v11356_v16 }
 0x4b5   : >> { %v4901_v48 = vsel %vm2382_vm5, %v4898_v45, %v4900_v26  ;;  %v11379_v45 = vld [vmem:[%s14059_s4 + $0x118] sm:$0xff]  }
 0x4b6   : >> { %10414 = vmatmul.mubr.bf16.gmra.mrb[72].mxu0 %v4556_v43  ;;  %v11372_v43 = vld [vmem:[%s14059_s4 + $0xe0] sm:$0xff]  }
 0x4b7   : >> { %10417 = vmatprep.mubr.bf16.mxu0 %v4564_v33  ;;  %10430 = vmatpush3.bf16.msra.mxu0 %v11356_v16  ;;  %v4903_v16 = vsel %vm2382_vm5, %v4900_v26, %v4902_v57  ;;  %v4910_v33 = vrot.slane %v12953_v54, 1 }
 0x4b8   : >> { %10431 = vmatprep.subr.bf16.mxu0 %v11357_v1 }
 0x4bb   : >> { %10432 = vmatpush3.bf16.msra.mxu0 %v11357_v1  ;;  %v4907_v1 = vsel %vm2382_vm5, %v4904_v18, %v4906_v36  ;;  %v5336_v18 = vrot.slane %v12919_v63, 2 }
 0x4bc   : >> { %10433 = vmatprep.subr.bf16.mxu0 %v11358_v55 }
 0x4be   : >> { %10418 = vmatmul.mubr.bf16.gmra.mrb[76].mxu0 %v4572_v11  ;;  %v4911_v11 = vsel %vm2382_vm5, %v4908_v3, %v4910_v33 }
 0x4bf   : >> { %10434 = vmatpush3.bf16.msra.mxu0 %v11358_v55  ;;  %10437 = vmatprep.mubr.bf16.mxu0 %v12815_v32  ;;  %v11362_v32 = vld [vmem:[%s14059_s4 + $0x90] sm:$0xff]   ;;  %v5101_v55 = vshrl.u32 %v4871_v51, 16 }
 0x4c0   : >> { %10435 = vmatprep.subr.bf16.mxu0 %v11359_v17 }
 0x4c3   : >> { %10436 = vmatpush3.bf16.msra.mxu0 %v11359_v17  ;;  %v4909_v17 = vsel %vm2382_vm5, %v4906_v36, %v4908_v3  ;;  %v5338_v36 = vrot.slane %v12928_v44, 2 }
 0x4c4   : >> { %10453 = vmatprep.subr.bf16.mxu0 %v11360_v50 }
 0x4c6   : >> { %10438 = vmatmul.mubr.bf16.vlgmr.msra.gmra.mrb[64].mxu0 %v12916_v30 }
 0x4c7   : >> { %10441 = vmatprep.mubr.bf16.mxu0 %v12919_v63  ;;  %10454 = vmatpush3.bf16.msra.mxu0 %v11360_v50  ;;  %v5103_v50 = vrot.slane %v5101_v55, 1  ;;  %v5344_v63 = vrot.slane %v12943_v28, 2 }
 0x4c8   : >> { %10455 = vmatprep.subr.bf16.mxu0 %v11361_v7 }
 0x4cb   : >> { %10456 = vmatpush3.bf16.msra.mxu0 %v11361_v7  ;;  %v5106_v7 = vrot.slane %v5104_v46, 2 }
 0x4cc   : >> { %10457 = vmatprep.subr.bf16.mxu0 %v11362_v32 }
 0x4ce   : >> { %10442 = vmatmul.mubr.bf16.gmra.mrb[68].mxu0 %v12928_v44  ;;  %v5346_v44 = vrot.slane %v12953_v54, 2 }
 0x4cf   : >> { %10445 = vmatprep.mubr.bf16.mxu0 %v12931_v21  ;;  %10458 = vmatpush3.bf16.msra.mxu0 %v11362_v32  ;;  %v11374_v32 = vld [vmem:[%s14059_s4 + $0xf0] sm:$0xff]  }
 0x4d0   : >> { %10459 = vmatprep.subr.bf16.mxu0 %v11363_v61 }
 0x4d3   : >> { %10460 = vmatpush3.bf16.msra.mxu0 %v11363_v61  ;;  %v4912_v61 = vrot.slane %v12890_v58, 1  ;;  %v11376_v58 = vld [vmem:[%s14059_s4 + $0x100] sm:$0xff]  }
 0x4d4   : >> { %10461 = vmatprep.subr.bf16.mxu0 %v11364_v20 }
 0x4d5   : >> { %v4913_v51 = vsel %vm2382_vm5, %v4910_v33, %v4912_v61  ;;  %v5347_v33 = vsel %vm2820_vm7, %v5344_v63, %v5346_v44 }
 0x4d6   : >> { %10446 = vmatmul.mubr.bf16.gmra.mrb[72].mxu0 %v12940_v41 }
 0x4d7   : >> { %10449 = vmatprep.mubr.bf16.mxu0 %v12943_v28  ;;  %10462 = vmatpush3.bf16.msra.mxu0 %v11364_v20  ;;  %v5107_v20 = vor.u32 %v5106_v7, %v5103_v50 }
 0x4d8   : >> { %10463 = vmatprep.subr.bf16.mxu0 %v11365_v29 }
 0x4db   : >> { %10464 = vmatpush3.bf16.msra.mxu0 %v11365_v29  ;;  %v11375_v29 = vld [vmem:[%s14059_s4 + $0xf8] sm:$0xff]  }
 0x4dc   : >> { %10465 = vmatprep.subr.bf16.mxu0 %v11366_v2 }
 0x4de   : >> { %10450 = vmatmul.mubr.bf16.gmra.mrb[76].mxu0 %v12953_v54 }
 0x4df   : >> { %10466 = vmatpush3.bf16.msra.mxu0 %v11366_v2  ;;  %10469 = vmatprep.mubr.bf16.mxu0 %v4899_v6  ;;  %v5111_v2 = vsel %vm2586_vm6, %v5107_v20, %v12411_v52  ;;  %v11378_v52 = vld [vmem:[%s14059_s4 + $0x110] sm:$0xff]  }
 0x4e0   : >> { %10467 = vmatprep.subr.bf16.mxu0 %v11367_v25 }
 0x4e3   : >> { %10468 = vmatpush3.bf16.msra.mxu0 %v11367_v25  ;;  %v5083_v25 = vld [vmem:[#allocation2 + $0xc0] sm:$0x3] }
 0x4e4   : >> { %10485 = vmatprep.subr.bf16.mxu0 %v11368_v53  ;;  %v5140_v6 = vshll.u32 %v5083_v25, 16 }
 0x4e6   : >> { %10470 = vmatmul.mubr.bf16.vlgmr.msra.gmra.mrb[64].mxu0 %v4901_v48  ;;  %v5142_v57 = vrot.slane %v5140_v6, 2 }
 0x4e7   : >> { %10473 = vmatprep.mubr.bf16.mxu0 %v4903_v16  ;;  %10486 = vmatpush3.bf16.msra.mxu0 %v11368_v53  ;;  %v11381_v53 = vld [vmem:[%s14059_s4 + $0x128] sm:$0xff]   ;;  %v5334_v16 = vrot.slane %v12916_v30, 2 }
 0x4e8   : >> { %10487 = vmatprep.subr.bf16.mxu0 %v11369_v49 }
 0x4e9   : >> { %v5337_v30 = vsel %vm2820_vm7, %v5334_v16, %v5336_v18 }
 0x4eb   : >> { %10488 = vmatpush3.bf16.msra.mxu0 %v11369_v49 }
 0x4ec   : >> { %10489 = vmatprep.subr.bf16.mxu0 %v11370_v35 }
 0x4ee   : >> { %10474 = vmatmul.mubr.bf16.gmra.mrb[68].mxu0 %v4905_v38  ;;  %v5340_v38 = vrot.slane %v12931_v21, 2  ;;  %v5348_v21 = vrot.slane %v5083_v25, 2 }
 0x4ef   : >> { %10477 = vmatprep.mubr.bf16.mxu0 %v4907_v1  ;;  %10490 = vmatpush3.bf16.msra.mxu0 %v11370_v35  ;;  %v11383_v35 = vld [vmem:[%s14059_s4 + $0x138] sm:$0xff]  }
 0x4f0   : >> { %10491 = vmatprep.subr.bf16.mxu0 %v11371_v9  ;;  %v5341_v1 = vsel %vm2820_vm7, %v5338_v36, %v5340_v38 }
 0x4f3   : >> { %10492 = vmatpush3.bf16.msra.mxu0 %v11371_v9  ;;  %v5339_v9 = vsel %vm2820_vm7, %v5336_v18, %v5338_v36 }
 0x4f4   : >> { %10493 = vmatprep.subr.bf16.mxu0 %v11372_v43 }
 0x4f6   : >> { %10478 = vmatmul.mubr.bf16.gmra.mrb[72].mxu0 %v4909_v17  ;;  %v5349_v17 = vsel %vm2820_vm7, %v5346_v44, %v5348_v21 }
 0x4f7   : >> { %10481 = vmatprep.mubr.bf16.mxu0 %v4911_v11  ;;  %10494 = vmatpush3.bf16.msra.mxu0 %v11372_v43 }
 0x4f8   : >> { %10495 = vmatprep.subr.bf16.mxu0 %v11373_v62 }
 0x4fb   : >> { %10496 = vmatpush3.bf16.msra.mxu0 %v11373_v62 }
 0x4fc   : >> { %10497 = vmatprep.subr.bf16.mxu0 %v11374_v32 }
 0x4fe   : >> { %10482 = vmatmul.mubr.bf16.gmra.mrb[76].mxu0 %v4913_v51 }
 0x4ff   : >> { %10498 = vmatpush3.bf16.msra.mxu0 %v11374_v32  ;;  %10501 = vmatprep.mubr.bf16.mxu0 %v5111_v2 }
 0x500   : >> { %10499 = vmatprep.subr.bf16.mxu0 %v11375_v29 }
 0x503   : >> { %10500 = vmatpush3.bf16.msra.mxu0 %v11375_v29 }
 0x504   : >> { %10517 = vmatprep.subr.bf16.mxu0 %v11376_v58 }
 0x506   : >> { %10502 = vmatmul.mubr.bf16.vlgmr.msra.gmra.mrb[64].mxu0 %v12419_v27  ;;  %v11380_v27 = vld [vmem:[%s14059_s4 + $0x120] sm:$0xff]  }
 0x507   : >> { %10505 = vmatprep.mubr.bf16.mxu0 %v12442_v12  ;;  %10518 = vmatpush3.bf16.msra.mxu0 %v11376_v58  ;;  %v5137_v12 = vshrl.u32 %v5083_v25, 16 }
 0x508   : >> { %10519 = vmatprep.subr.bf16.mxu0 %v11377_v15 }
 0x509   : >> { %v5139_v26 = vrot.slane %v5137_v12, 1 }
 0x50b   : >> { %10520 = vmatpush3.bf16.msra.mxu0 %v11377_v15  ;;  %v5143_v49 = vor.u32 %v5142_v57, %v5139_v26 }
 0x50c   : >> { %10521 = vmatprep.subr.bf16.mxu0 %v11378_v52 }
 0x50e   : >> { %10506 = vmatmul.mubr.bf16.gmra.mrb[68].mxu0 %v12449_v14  ;;  %v5314_v14 = vld [vmem:[#allocation2 + $0x80] sm:$0xfc] }
 0x50f   : >> { %10509 = vmatprep.mubr.bf16.mxu0 %v12470_v60  ;;  %10522 = vmatpush3.bf16.msra.mxu0 %v11378_v52  ;;  %v11382_v60 = vld [vmem:[%s14059_s4 + $0x130] sm:$0xff]   ;;  %v5333_v48 = vrot.slane %v5314_v14, 2 }
 0x510   : >> { %10523 = vmatprep.subr.bf16.mxu0 %v11379_v45 }
 0x513   : >> { %10524 = vmatpush3.bf16.msra.mxu0 %v11379_v45 }
 0x514   : >> { %10525 = vmatprep.subr.bf16.mxu0 %v11380_v27 }
 0x516   : >> { %10510 = vmatmul.mubr.bf16.gmra.mrb[72].mxu0 %v12475_v59  ;;  %v5144_v59 = vsel %vm2586_vm6, %v12483_v0, %v5143_v49  ;;  %v5342_v0 = vrot.slane %v12940_v41, 2 }
 0x517   : >> { %10513 = vmatprep.mubr.bf16.mxu0 %v12487_v10  ;;  %10526 = vmatpush3.bf16.msra.mxu0 %v11380_v27  ;;  %v5335_v10 = vsel %vm2820_vm7, %v5333_v48, %v5334_v16 }
 0x518   : >> { %10527 = vmatprep.subr.bf16.mxu0 %v11381_v53  ;;  %v5343_v43 = vsel %vm2820_vm7, %v5340_v38, %v5342_v0  ;;  %v5345_v3 = vsel %vm2820_vm7, %v5342_v0, %v5344_v63 }
 0x51b   : >> { %10528 = vmatpush3.bf16.msra.mxu0 %v11381_v53 }
 0x51c   : >> { %10529 = vmatprep.subr.bf16.mxu0 %v11382_v60 }
 0x51e   : >> { %10514 = vmatmul.mubr.bf16.gmra.mrb[76].mxu0 %v5144_v59 }
 0x51f   : >> { %10530 = vmatpush3.bf16.msra.mxu0 %v11382_v60  ;;  %10533 = vmatprep.mubr.bf16.mxu0 %v5335_v10 }
 0x520   : >> { %10531 = vmatprep.subr.bf16.mxu0 %v11383_v35 }
 0x523   : >> { %10532 = vmatpush3.bf16.msra.mxu0 %v11383_v35 }
 0x526   : >> { %10534 = vmatmul.mubr.bf16.vlgmr.msra.gmra.mrb[64].mxu0 %v5337_v30 }
 0x527   : >> { %10537 = vmatprep.mubr.bf16.mxu0 %v5339_v9 }
 0x52e   : >> { %10538 = vmatmul.mubr.bf16.gmra.mrb[68].mxu0 %v5341_v1 }
 0x52f   : >> { %10541 = vmatprep.mubr.bf16.mxu0 %v5343_v43 }
 0x536   : >> { %10542 = vmatmul.mubr.bf16.gmra.mrb[72].mxu0 %v5345_v3 }
 0x537   : >> { %10545 = vmatprep.mubr.bf16.mxu0 %v5347_v33 }
 0x539   : >> { %v10359_v55 = vpop.f32.mrb[48].mxu0 }
 0x53a   : >> { %v4328_v46 = vpop.f32.mrb[49].mxu0 }
 0x53b   : >> { %v10360_v41 = vpop.f32.mrb[50].mxu0 }
 0x53c   : >> { %v4331_v62 = vpop.f32.mrb[51].mxu0 }
 0x53e   : >> { %10546 = vmatmul.mubr.bf16.gmra.mrb[76].mxu0 %v5349_v17 }
 0x541   : >> { %v10363_v11 = vpop.f32.mrb[52].mxu0 }
 0x542   : >> { %v4344_v50 = vpop.f32.mrb[53].mxu0 }
 0x543   : >> { %v10364_v7 = vpop.f32.mrb[54].mxu0 }
 0x544   : >> { %v4347_v28 = vpop.f32.mrb[55].mxu0 }
 0x559   : >> { %v10383_v32 = vpop.f32.mrb[56].mxu0 }
 0x55a   : >> { %v4426_v54 = vmax.f32 %v10359_v55, %v10383_v32  ;;  %v4393_v61 = vpop.f32.mrb[57].mxu0 }
 0x55b   : >> { %v4424_v20 = vmax.f32 %v4328_v46, %v4393_v61  ;;  %v10384_v29 = vpop.f32.mrb[58].mxu0 }
 0x55c   : >> { %v4434_v51 = vadd.f32 %v12765_v19, %v4426_v54  ;;  %v4427_v2 = vmax.f32 %v10360_v41, %v10384_v29  ;;  %v4396_v58 = vpop.f32.mrb[59].mxu0 }
 0x55d   : >> { %v4432_v15 = vadd.f32 %v12765_v19, %v4424_v20  ;;  %v4425_v52 = vmax.f32 %v4331_v62, %v4396_v58 }
 0x55e   : >> { %v4435_v45 = vadd.f32 %v12765_v19, %v4427_v2  ;;  %v4442_v27 = vmax.f32 %v4434_v51, 0.0 }
 0x55f   : >> { %v4433_v25 = vadd.f32 %v12765_v19, %v4425_v52  ;;  %v4440_v6 = vmax.f32 %v4432_v15, 0.0 }
 0x560   : >> { %v4443_v12 = vmax.f32 %v4435_v45, 0.0 }
 0x561   : >> { %v4441_v53 = vmax.f32 %v4433_v25, 0.0  ;;  %v10387_v26 = vpop.f32.mrb[60].mxu0 }
 0x562   : >> { %v13048_v57 = vpack.c.bf16 %v4443_v12, %v4442_v27  ;;  %v4430_v14 = vmax.f32 %v10363_v11, %v10387_v26  ;;  %v4409_v60 = vpop.f32.mrb[61].mxu0 }
 0x563   : >> { %v13050_v49 = vpack.c.bf16 %v4441_v53, %v4440_v6  ;;  %v4428_v48 = vmax.f32 %v4344_v50, %v4409_v60  ;;  %v10388_v16 = vpop.f32.mrb[62].mxu0 }
 0x564   : >> { %v4438_v35 = vadd.f32 %v12765_v19, %v4430_v14  ;;  %v4431_v59 = vmax.f32 %v10364_v7, %v10388_v16  ;;  %v4412_v10 = vpop.f32.mrb[63].mxu0  ;;  %v5774_v0 = vshll.u32 %v13048_v57, 16  ;;  %v5778_v1 = vshrl.u32 %v13048_v57, 16 }
 0x565   : >> { %v4436_v18 = vadd.f32 %v12765_v19, %v4428_v48  ;;  %v4429_v36 = vmax.f32 %v4347_v28, %v4412_v10  ;;  %v5770_v30 = vshrl.u32 %v13050_v49, 16  ;;  %v5766_v38 = vshll.u32 %v13050_v49, 16 }
 0x566   : >> { %v4439_v9 = vadd.f32 %v12765_v19, %v4431_v59  ;;  %v4446_v63 = vmax.f32 %v4438_v35, 0.0  ;;  %v6497_v41 = vrot.slane %v5778_v1, 1  ;;  %v6498_v62 = vrot.slane %v5774_v0, 2 }
 0x567   : >> { %v4437_v43 = vadd.f32 %v12765_v19, %v4429_v36  ;;  %v6493_v3 = vrot.slane %v5770_v30, 1  ;;  %v4444_v33 = vmax.f32 %v4436_v18, 0.0  ;;  %v6494_v46 = vrot.slane %v5766_v38, 2 }
 0x568   : >> { %v4447_v44 = vmax.f32 %v4439_v9, 0.0  ;;  %v6499_v32 = vor.u32 %v6498_v62, %v6497_v41  ;;  %v11599_v41 = vld [vmem:[%s14065_s10 + $0x8] sm:$0xff]   ;;  %v11600_v62 = vld [vmem:[%s14065_s10 + $0x10] sm:$0xff]  }
 0x569   : >> { %v4445_v55 = vmax.f32 %v4437_v43, 0.0  ;;  %v6495_v50 = vor.u32 %v6494_v46, %v6493_v3 }
 0x56a   : >> { %v13062_v21 = vpack.c.bf16 %v4447_v44, %v4446_v63 }
 0x56b   : >> { %v13070_v17 = vpack.c.bf16 %v4445_v55, %v4444_v33  ;;  %v13078_v54 = vsel %vm2586_vm6, %v12801_v37, %v6495_v50  ;;  %v13085_v29 = vsel %vm2586_vm6, %v6495_v50, %v6499_v32  ;;  %v11601_v50 = vld [vmem:[%s14065_s10 + $0x18] sm:$0xff]  }
 0x56c   : >> { %v5790_v19 = vshll.u32 %v13062_v21, 16  ;;  %v5794_v11 = vshrl.u32 %v13062_v21, 16 }
 0x56d   : >> { %v5782_v7 = vshll.u32 %v13070_v17, 16  ;;  %v5786_v28 = vshrl.u32 %v13070_v17, 16 }
 0x56e   : >> { %v6505_v61 = vrot.slane %v5794_v11, 1  ;;  %v6506_v20 = vrot.slane %v5790_v19, 2  ;;  %v13180_v24 = vrot.slane %v5790_v19, 1  ;;  %v11394_v19 = vld [vmem:[%s14061_s6 + $0x10] sm:$0xff]  }
 0x56f   : >> { %v6501_v51 = vrot.slane %v5786_v28, 1  ;;  %v6502_v2 = vrot.slane %v5782_v7, 2 }
 0x570   : >> { %v13091_v58 = vor.u32 %v6506_v20, %v6505_v61  ;;  %v13112_v61 = vld [vmem:[#allocation3] sm:$0xff]  ;;  %v11384_v20 = vld [vmem:[%s14061_s6 + $0x40] sm:$0xff]  }
 0x571   : >> { %v6503_v15 = vor.u32 %v6502_v2, %v6501_v51  ;;  %v5737_v51 = vshll.u32 %v13112_v61, 16  ;;  %v11385_v2 = vld [vmem:[%s14061_s6 + $0x48] sm:$0xff]  }
 0x573   : >> { %v13094_v37 = vsel %vm2586_vm6, %v6499_v32, %v6503_v15  ;;  %v13098_v52 = vsel %vm2586_vm6, %v6503_v15, %v13091_v58  ;;  %v11602_v32 = vld [vmem:[%s14066_s11] sm:$0xff]   ;;  %v11603_v15 = vld [vmem:[%s14066_s11 + $0x8] sm:$0xff]  }
 0x5f9   : >> { %v10535_v45 = vpop.f32.mrb[64].mxu0 }
 0x5fa   : >> { %v5440_v25 = vpop.f32.mrb[65].mxu0 }
 0x5fb   : >> { %v10536_v27 = vpop.f32.mrb[66].mxu0 }
 0x5fc   : >> { %v5520_v12 = vpack.c.bf16 %v10536_v27, %v10535_v45  ;;  %v5443_v6 = vpop.f32.mrb[67].mxu0  ;;  %v5739_v45 = vrot.slane %v5737_v51, 1  ;;  %v11386_v27 = vld [vmem:[%s14061_s6 + $0x50] sm:$0xff]  }
 0x5fd   : >> { %v5519_v53 = vpack.c.bf16 %v5443_v6, %v5440_v25  ;;  %v11604_v25 = vld [vmem:[%s14066_s11 + $0x10] sm:$0xff]  }
 0x5ff   : >> { %10549 = vmatprep.subr.bf16.mxu1 %v5519_v53 }
 0x600   : >> { %10550 = vmatpush3.bf16.msra.mxu1 %v5519_v53 }
 0x601   : >> { %v10539_v26 = vpop.f32.mrb[68].mxu0  ;;  %10551 = vmatprep.subr.bf16.mxu1 %v5520_v12 }
 0x602   : >> { %v5456_v14 = vpop.f32.mrb[69].mxu0 }
 0x603   : >> { %v10540_v60 = vpop.f32.mrb[70].mxu0 }
 0x604   : >> { %v5522_v48 = vpack.c.bf16 %v10540_v60, %v10539_v26  ;;  %v5459_v16 = vpop.f32.mrb[71].mxu0  ;;  %10552 = vmatpush3.bf16.msra.mxu1 %v5520_v12  ;;  %v11387_v26 = vld [vmem:[%s14061_s6 + $0x58] sm:$0xff]  }
 0x605   : >> { %v5521_v35 = vpack.c.bf16 %v5459_v16, %v5456_v14  ;;  %v11605_v14 = vld [vmem:[%s14066_s11 + $0x18] sm:$0xff]   ;;  %v11390_v16 = vld [vmem:[%s14061_s6 + $0x70] sm:$0xff]  }
 0x607   : >> { %10553 = vmatprep.subr.bf16.mxu1 %v5521_v35 }
 0x608   : >> { %10554 = vmatpush3.bf16.msra.mxu1 %v5521_v35 }
 0x609   : >> { %v10543_v59 = vpop.f32.mrb[72].mxu0  ;;  %10555 = vmatprep.subr.bf16.mxu1 %v5522_v48 }
 0x60a   : >> { %v5472_v10 = vpop.f32.mrb[73].mxu0 }
 0x60b   : >> { %v10544_v18 = vpop.f32.mrb[74].mxu0 }
 0x60c   : >> { %v5524_v36 = vpack.c.bf16 %v10544_v18, %v10543_v59  ;;  %v5475_v9 = vpop.f32.mrb[75].mxu0  ;;  %10556 = vmatpush3.bf16.msra.mxu1 %v5522_v48  ;;  %v5752_v59 = vrot.slane %v5750_v40, 1  ;;  %v5768_v40 = vrot.slane %v5766_v38, 1 }
 0x60d   : >> { %v5523_v43 = vpack.c.bf16 %v5475_v9, %v5472_v10 }
 0x60e   : >> { %v5756_v10 = vor.u32 %v5754_v47, %v5752_v59  ;;  %v5772_v13 = vor.u32 %v5770_v30, %v5768_v40 }
 0x60f   : >> { %10557 = vmatprep.subr.bf16.mxu1 %v5523_v43 }
 0x610   : >> { %10558 = vmatpush3.bf16.msra.mxu1 %v5523_v43 }
 0x611   : >> { %v10547_v63 = vpop.f32.mrb[76].mxu0  ;;  %10559 = vmatprep.subr.bf16.mxu1 %v5524_v36 }
 0x612   : >> { %v5488_v44 = vpop.f32.mrb[77].mxu0 }
 0x613   : >> { %v10548_v3 = vpop.f32.mrb[78].mxu0 }
 0x614   : >> { %v5526_v33 = vpack.c.bf16 %v10548_v3, %v10547_v63  ;;  %v5491_v55 = vpop.f32.mrb[79].mxu0  ;;  %10560 = vmatpush3.bf16.msra.mxu1 %v5524_v36  ;;  %v5784_v63 = vrot.slane %v5782_v7, 1  ;;  %v11392_v7 = vld [vmem:[%s14061_s6] sm:$0xff]   ;;  %v11397_v3 = vld [vmem:[%s14061_s6 + $0x28] sm:$0xff]  }
 0x615   : >> { %v5525_v46 = vpack.c.bf16 %v5491_v55, %v5488_v44  ;;  %v11396_v44 = vld [vmem:[%s14061_s6 + $0x20] sm:$0xff]   ;;  %v11399_v55 = vld [vmem:[%s14061_s6 + $0x38] sm:$0xff]  }
 0x616   : >> { %v5788_v38 = vor.u32 %v5786_v28, %v5784_v63  ;;  %v11395_v28 = vld [vmem:[%s14061_s6 + $0x18] sm:$0xff]  }
 0x617   : >> { %10561 = vmatprep.subr.bf16.mxu1 %v5525_v46 }
 0x618   : >> { %10562 = vmatpush3.bf16.msra.mxu1 %v5525_v46 }
 0x619   : >> { %10563 = vmatprep.subr.bf16.mxu1 %v5526_v33 }
 0x61c   : >> { %10564 = vmatpush3.bf16.msra.mxu1 %v5526_v33 }
 0x61d   : >> { %10573 = vmatprep.subr.bf16.mxu1 %v5519_v53 }
 0x61f   : >> { %10566 = vmatmul.mubr.bf16.vlgmr.msra.gmra.mrb[96].mxu1 %v11599_v41 }
 0x620   : >> { %10574 = vmatpush3.bf16.msra.mxu1 %v5519_v53  ;;  %10569 = vmatprep.mubr.bf16.mxu1 %v11600_v62  ;;  %v5744_v53 = vrot.slane %v5742_v39, 1  ;;  %v11389_v39 = vld [vmem:[%s14061_s6 + $0x68] sm:$0xff]  }
 0x621   : >> { %10575 = vmatprep.subr.bf16.mxu1 %v5520_v12 }
 0x622   : >> { %v5748_v18 = vor.u32 %v5746_v42, %v5744_v53  ;;  %v5776_v42 = vrot.slane %v5774_v0, 1  ;;  %v5793_v0 = vsel %vm1989_vm4, %v5788_v38, %v13180_v24 }
 0x624   : >> { %10576 = vmatpush3.bf16.msra.mxu1 %v5520_v12  ;;  %v5735_v12 = vshrl.u32 %v13112_v61, 16  ;;  %v5753_v9 = vsel %vm1989_vm4, %v5748_v18, %v5752_v59  ;;  %v5777_v47 = vsel %vm1989_vm4, %v5772_v13, %v5776_v42  ;;  %v5780_v30 = vor.u32 %v5778_v1, %v5776_v42  ;;  %v11393_v1 = vld [vmem:[%s14061_s6 + $0x8] sm:$0xff]  }
 0x625   : >> { %10577 = vmatprep.subr.bf16.mxu1 %v5521_v35 }
 0x626   : >> { %v5740_v6 = vor.u32 %v5739_v45, %v5735_v12 }
 0x627   : >> { %10570 = vmatmul.mubr.bf16.gmra.mrb[100].mxu1 %v11601_v50 }
 0x628   : >> { %10578 = vmatpush3.bf16.msra.mxu1 %v5521_v35  ;;  %10589 = vmatprep.mubr.bf16.mxu1 %v11602_v32  ;;  %v5745_v60 = vsel %vm1989_vm4, %v5740_v6, %v5744_v53  ;;  %v11391_v35 = vld [vmem:[%s14061_s6 + $0x78] sm:$0xff]   ;;  %v11606_v53 = vld [vmem:[%s14060_s5] ss:$0 sm:$0xff] }
 0x629   : >> { %10579 = vmatprep.subr.bf16.mxu1 %v5522_v48 }
 0x62c   : >> { %10580 = vmatpush3.bf16.msra.mxu1 %v5522_v48  ;;  %v11388_v48 = vld [vmem:[%s14061_s6 + $0x60] sm:$0xff]  }
 0x62d   : >> { %10581 = vmatprep.subr.bf16.mxu1 %v5523_v43 }
 0x630   : >> { %10582 = vmatpush3.bf16.msra.mxu1 %v5523_v43 }
 0x631   : >> { %10583 = vmatprep.subr.bf16.mxu1 %v5524_v36 }
 0x634   : >> { %10584 = vmatpush3.bf16.msra.mxu1 %v5524_v36  ;;  %v5760_v36 = vrot.slane %v5758_v8, 1 }
 0x635   : >> { %10585 = vmatprep.subr.bf16.mxu1 %v5525_v46 }
 0x636   : >> { %v5761_v43 = vsel %vm1989_vm4, %v5756_v10, %v5760_v36  ;;  %v5764_v23 = vor.u32 %v5762_v22, %v5760_v36  ;;  %v5785_v22 = vsel %vm1989_vm4, %v5780_v30, %v5784_v63 }
 0x638   : >> { %10586 = vmatpush3.bf16.msra.mxu1 %v5525_v46  ;;  %v5769_v8 = vsel %vm1989_vm4, %v5764_v23, %v5768_v40  ;;  %v13212_v46 = vld [vmem:[%s14061_s6 + $0x80] sm:$0xff]  }
 0x639   : >> { %10587 = vmatprep.subr.bf16.mxu1 %v5526_v33 }
 0x63c   : >> { %10588 = vmatpush3.bf16.msra.mxu1 %v5526_v33  ;;  %v11398_v33 = vld [vmem:[%s14061_s6 + $0x30] sm:$0xff]  }
 0x63d   : >> { %10597 = vmatprep.subr.bf16.mxu1 %v11384_v20 }
 0x63f   : >> { %10590 = vmatmul.mubr.bf16.vlgmr.msra.gmra.mrb[104].mxu1 %v11603_v15 }
 0x640   : >> { %10598 = vmatpush3.bf16.msra.mxu1 %v11384_v20  ;;  %10593 = vmatprep.mubr.bf16.mxu1 %v11604_v25 }
 0x641   : >> { %10599 = vmatprep.subr.bf16.mxu1 %v11385_v2 }
 0x644   : >> { %10600 = vmatpush3.bf16.msra.mxu1 %v11385_v2 }
 0x645   : >> { %10601 = vmatprep.subr.bf16.mxu1 %v11386_v27 }
 0x647   : >> { %10594 = vmatmul.mubr.bf16.gmra.mrb[108].mxu1 %v11605_v14 }
 0x648   : >> { %10602 = vmatpush3.bf16.msra.mxu1 %v11386_v27  ;;  %10613 = vmatprep.mubr.bf16.mxu1 %v5745_v60 }
 0x649   : >> { %10603 = vmatprep.subr.bf16.mxu1 %v11387_v26 }
 0x64c   : >> { %10604 = vmatpush3.bf16.msra.mxu1 %v11387_v26 }
 0x64d   : >> { %10605 = vmatprep.subr.bf16.mxu1 %v11388_v48 }
 0x650   : >> { %10606 = vmatpush3.bf16.msra.mxu1 %v11388_v48 }
 0x651   : >> { %10607 = vmatprep.subr.bf16.mxu1 %v11389_v39 }
 0x654   : >> { %10608 = vmatpush3.bf16.msra.mxu1 %v11389_v39 }
 0x655   : >> { %10609 = vmatprep.subr.bf16.mxu1 %v11390_v16 }
 0x658   : >> { %10610 = vmatpush3.bf16.msra.mxu1 %v11390_v16 }
 0x659   : >> { %10611 = vmatprep.subr.bf16.mxu1 %v11391_v35 }
 0x65c   : >> { %10612 = vmatpush3.bf16.msra.mxu1 %v11391_v35 }
 0x65d   : >> { %10637 = vmatprep.subr.bf16.mxu1 %v11392_v7 }
 0x65f   : >> { %10614 = vmatmul.mubr.bf16.vlgmr.msra.gmra.mrb[112].mxu1 %v5753_v9 }
 0x660   : >> { %10617 = vmatprep.mubr.bf16.mxu1 %v5761_v43  ;;  %10638 = vmatpush3.bf16.msra.mxu1 %v11392_v7 }
 0x661   : >> { %10639 = vmatprep.subr.bf16.mxu1 %v11393_v1 }
 0x664   : >> { %10640 = vmatpush3.bf16.msra.mxu1 %v11393_v1 }
 0x665   : >> { %10641 = vmatprep.subr.bf16.mxu1 %v11394_v19 }
 0x667   : >> { %10618 = vmatmul.mubr.bf16.gmra.mrb[116].mxu1 %v5769_v8 }
 0x668   : >> { %10621 = vmatprep.mubr.bf16.mxu1 %v5777_v47  ;;  %10642 = vmatpush3.bf16.msra.mxu1 %v11394_v19 }
 0x669   : >> { %10643 = vmatprep.subr.bf16.mxu1 %v11395_v28 }
 0x66c   : >> { %10644 = vmatpush3.bf16.msra.mxu1 %v11395_v28  ;;  %v5796_v28 = vor.u32 %v5794_v11, %v13180_v24 }
 0x66d   : >> { %10645 = vmatprep.subr.bf16.mxu1 %v11396_v44 }
 0x66f   : >> { %10622 = vmatmul.mubr.bf16.gmra.mrb[120].mxu1 %v5785_v22 }
 0x670   : >> { %10625 = vmatprep.mubr.bf16.mxu1 %v5793_v0  ;;  %10646 = vmatpush3.bf16.msra.mxu1 %v11396_v44 }
 0x671   : >> { %10647 = vmatprep.subr.bf16.mxu1 %v11397_v3 }
 0x674   : >> { %10648 = vmatpush3.bf16.msra.mxu1 %v11397_v3 }
 0x675   : >> { %10649 = vmatprep.subr.bf16.mxu1 %v11398_v33 }
 0x678   : >> { %10650 = vmatpush3.bf16.msra.mxu1 %v11398_v33 }
 0x679   : >> { %10651 = vmatprep.subr.bf16.mxu1 %v11399_v55 }
 0x67c   : >> { %10652 = vmatpush3.bf16.msra.mxu1 %v11399_v55 }
 0x67d   : >> { %10677 = vmatprep.subr.bf16.mxu1 %v13212_v46 }
 0x6f2   : >> { %v10567_v41 = vpop.f32.mrb[96].mxu1 }
 0x6f3   : >> { %v5561_v62 = vpop.f32.mrb[97].mxu1 }
 0x6f4   : >> { %v10568_v50 = vpop.f32.mrb[98].mxu1 }
 0x6f5   : >> { %v5564_v32 = vpop.f32.mrb[99].mxu1 }
 0x6fa   : >> { %v10571_v20 = vpop.f32.mrb[100].mxu1 }
 0x6fb   : >> { %v5577_v51 = vpop.f32.mrb[101].mxu1 }
 0x6fc   : >> { %v10572_v2 = vpop.f32.mrb[102].mxu1 }
 0x6fd   : >> { %v5580_v15 = vpop.f32.mrb[103].mxu1 }
 0x712   : >> { %v10591_v45 = vpop.f32.mrb[104].mxu1 }
 0x713   : >> { %v5659_v25 = vmax.f32 %v10567_v41, %v10591_v45  ;;  %v5626_v27 = vpop.f32.mrb[105].mxu1 }
 0x714   : >> { %v5657_v12 = vmax.f32 %v5561_v62, %v5626_v27  ;;  %v10592_v6 = vpop.f32.mrb[106].mxu1 }
 0x715   : >> { %v5667_v26 = vadd.f32 %v11606_v53, %v5659_v25  ;;  %v5660_v14 = vmax.f32 %v10568_v50, %v10592_v6  ;;  %v5629_v60 = vpop.f32.mrb[107].mxu1 }
 0x716   : >> { %v5665_v48 = vadd.f32 %v11606_v53, %v5657_v12  ;;  %v5658_v39 = vmax.f32 %v5564_v32, %v5629_v60 }
 0x717   : >> { %v5668_v16 = vadd.f32 %v11606_v53, %v5660_v14  ;;  %v5675_v59 = vmax.f32 %v5667_v26, 0.0 }
 0x718   : >> { %v5666_v35 = vadd.f32 %v11606_v53, %v5658_v39  ;;  %v5673_v18 = vmax.f32 %v5665_v48, 0.0 }
 0x719   : >> { %v5676_v10 = vmax.f32 %v5668_v16, 0.0 }
 0x71a   : >> { %v5674_v36 = vmax.f32 %v5666_v35, 0.0  ;;  %v10595_v9 = vpop.f32.mrb[108].mxu1 }
 0x71b   : >> { %v13218_v43 = vpack.c.bf16 %v5676_v10, %v5675_v59  ;;  %v5663_v40 = vmax.f32 %v10571_v20, %v10595_v9  ;;  %v5642_v13 = vpop.f32.mrb[109].mxu1 }
 0x71c   : >> { %v13220_v23 = vpack.c.bf16 %v5674_v36, %v5673_v18  ;;  %v5661_v42 = vmax.f32 %v5577_v51, %v5642_v13  ;;  %v10596_v8 = vpop.f32.mrb[110].mxu1 }
 0x71d   : >> { %v5671_v47 = vadd.f32 %v11606_v53, %v5663_v40  ;;  %v5664_v63 = vmax.f32 %v10572_v2, %v10596_v8  ;;  %v5645_v38 = vpop.f32.mrb[111].mxu1  ;;  %v5806_v30 = vshll.u32 %v13218_v43, 16  ;;  %v5810_v44 = vshrl.u32 %v13218_v43, 16 }
 0x71e   : >> { %v5669_v22 = vadd.f32 %v11606_v53, %v5661_v42  ;;  %v5662_v0 = vmax.f32 %v5580_v15, %v5645_v38  ;;  %v5798_v7 = vshll.u32 %v13220_v23, 16  ;;  %v5802_v1 = vshrl.u32 %v13220_v23, 16 }
 0x71f   : >> { %v5672_v19 = vadd.f32 %v11606_v53, %v5664_v63  ;;  %v6237_v3 = vrot.slane %v13220_v23, 1  ;;  %v5679_v33 = vmax.f32 %v5671_v47, 0.0  ;;  %v6239_v62 = vrot.slane %v13218_v43, 1 }
 0x720   : >> { %v5670_v55 = vadd.f32 %v11606_v53, %v5662_v0  ;;  %v5800_v41 = vrot.slane %v5798_v7, 1  ;;  %v5677_v50 = vmax.f32 %v5669_v22, 0.0  ;;  %v5808_v20 = vrot.slane %v5806_v30, 1 }
 0x721   : >> { %v5680_v32 = vmax.f32 %v5672_v19, 0.0  ;;  %v6509_v51 = vrot.slane %v5802_v1, 1  ;;  %v13235_v11 = vsel %vm2382_vm5, %v6237_v3, %v6239_v62  ;;  %v6510_v25 = vrot.slane %v5798_v7, 2 }
 0x722   : >> { %v5678_v2 = vmax.f32 %v5670_v55, 0.0  ;;  %v5801_v15 = vsel %vm1989_vm4, %v5796_v28, %v5800_v41  ;;  %v5804_v45 = vor.u32 %v5802_v1, %v5800_v41  ;;  %v6513_v27 = vrot.slane %v5810_v44, 1  ;;  %v11401_v55 = vld [vmem:[%s14061_s6 + $0x88] sm:$0xff]   ;;  %v13288_v41 = vld [vmem:[#allocation3 + $0x8] sm:$0xff] }
 0x723   : >> { %v5684_v24 = vpack.c.bf16 %v5680_v32, %v5679_v33  ;;  %10626 = vmatmul.mubr.bf16.gmra.mrb[124].mxu1 %v5801_v15  ;;  %v6514_v12 = vrot.slane %v5806_v30, 2  ;;  %v6775_v26 = vrot.slane %v13220_v23, 2  ;;  %v6777_v14 = vrot.slane %v13218_v43, 2  ;;  %v13301_v32 = vld [vmem:[#allocation3 + $0x18] sm:$0xff] }
 0x724   : >> { %v13237_v6 = vpack.c.bf16 %v5678_v2, %v5677_v50  ;;  %v5809_v53 = vsel %vm1989_vm4, %v5804_v45, %v5808_v20  ;;  %v6511_v60 = vor.u32 %v6510_v25, %v6509_v51  ;;  %v5812_v39 = vor.u32 %v5810_v44, %v5808_v20  ;;  %v11402_v50 = vld [vmem:[%s14061_s6 + $0x90] sm:$0xff]   ;;  %v11405_v20 = vld [vmem:[%s14061_s6 + $0xa8] sm:$0xff]   ;;  %v11407_v2 = vld [vmem:[%s14061_s6 + $0xb8] sm:$0xff]  }
 0x725   : >> { %5688 = vst [vmem:[#allocation3 + $0x58] sm:$0xff] %v5684_v24  ;;  %10629 = vmatprep.mubr.bf16.mxu1 %v5809_v53  ;;  %v6515_v48 = vor.u32 %v6514_v12, %v6513_v27  ;;  %v13255_v36 = vsel %vm2820_vm7, %v6775_v26, %v6777_v14  ;;  %v11406_v51 = vld [vmem:[%s14061_s6 + $0xb0] sm:$0xff]   ;;  %v11408_v15 = vld [vmem:[%s14061_s6 + $0xc0] sm:$0xff]   ;;  %v6193_v45 = vld [vmem:[#allocation3] sm:$0xfe]  ;;  %v6223_v25 = vrot.slane %v13288_v41, 1 }
 0x726   : >> { %v5814_v16 = vshll.u32 %v13237_v6, 16  ;;  %v5818_v35 = vshrl.u32 %v13237_v6, 16  ;;  %v6241_v59 = vrot.slane %v13237_v6, 1  ;;  %v13247_v10 = vsel %vm2586_vm6, %v13091_v58, %v6511_v60 }
 0x727   : >> { %v13250_v18 = vsel %vm2586_vm6, %v6511_v60, %v6515_v48  ;;  %v6779_v9 = vrot.slane %v13237_v6, 2  ;;  %v6222_v24 = vrot.slane %v6193_v45, 1  ;;  %v11409_v60 = vld [vmem:[%s14061_s6 + $0xc8] sm:$0xff]  }
 0x728   : >> { %v5816_v40 = vrot.slane %v5814_v16, 1  ;;  %v13259_v13 = vsel %vm2382_vm5, %v6239_v62, %v6241_v59  ;;  %v6517_v42 = vrot.slane %v5818_v35, 1  ;;  %v6518_v8 = vrot.slane %v5814_v16, 2  ;;  %v13291_v62 = vld [vmem:[#allocation3 + $0x10] sm:$0xff] }
 0x729   : >> { %v13264_v58 = vsel %vm2820_vm7, %v6777_v14, %v6779_v9  ;;  %v6224_v12 = vsel %vm2382_vm5, %v6222_v24, %v6223_v25  ;;  %v6225_v53 = vrot.slane %v13291_v62, 1  ;;  %v6227_v14 = vrot.slane %v13301_v32, 1  ;;  %v6741_v24 = vld [vmem:[#allocation3] sm:$0xfc] }
 0x72a   : >> { %v5817_v47 = vsel %vm1989_vm4, %v5812_v39, %v5816_v40  ;;  %v13267_v63 = vor.u32 %v6518_v8, %v6517_v42  ;;  %v5820_v7 = vor.u32 %v5818_v35, %v5816_v40  ;;  %v11410_v39 = vld [vmem:[%s14061_s6 + $0xd0] sm:$0xff]   ;;  %v6229_v16 = vrot.slane %v13050_v49, 1  ;;  %v11412_v8 = vld [vmem:[%s14061_s6 + $0xe0] sm:$0xff]  }
 0x72b   : >> { %10630 = vmatmul.mubr.bf16.gmra.mrb[128].mxu1 %v5817_v47  ;;  %v6231_v35 = vrot.slane %v13048_v57, 1  ;;  %v6233_v47 = vrot.slane %v13070_v17, 1 }
 0x72c   : >> { %v13269_v38 = vld [vmem:[#allocation3 + $0x58] sm:$0x7]  ;;  %v13273_v30 = vsel %vm2586_vm6, %v6515_v48, %v13267_v63  ;;  %v6228_v48 = vsel %vm2382_vm5, %v6225_v53, %v6227_v14  ;;  %v6230_v40 = vsel %vm2382_vm5, %v6227_v14, %v6229_v16  ;;  %v6769_v14 = vrot.slane %v13048_v57, 2 }
 0x72d   : >> { %v5822_v22 = vshll.u32 %v13269_v38, 16  ;;  %v6243_v0 = vrot.slane %v13269_v38, 1  ;;  %v5826_v19 = vshrl.u32 %v13269_v38, 16  ;;  %v5700_v27 = vld [vmem:[#allocation3 + $0x58] sm:$0x3]  ;;  %v6232_v42 = vsel %vm2382_vm5, %v6229_v16, %v6231_v35 }
 0x72f   : >> { %v5824_v1 = vrot.slane %v5822_v22, 1  ;;  %v13281_v28 = vsel %vm2382_vm5, %v6241_v59, %v6243_v0  ;;  %v11411_v59 = vld [vmem:[%s14061_s6 + $0xd8] sm:$0xff]   ;;  %v6235_v22 = vrot.slane %v13062_v21, 1 }
 0x731   : >> { %v5825_v44 = vsel %vm1989_vm4, %v5820_v7, %v5824_v1  ;;  %v5828_v33 = vor.u32 %v5826_v19, %v5824_v1  ;;  %v11413_v7 = vld [vmem:[%s14061_s6 + $0xe8] sm:$0xff]   ;;  %v6234_v1 = vsel %vm2382_vm5, %v6231_v35, %v6233_v47  ;;  %v6236_v19 = vsel %vm2382_vm5, %v6233_v47, %v6235_v22 }
 0x732   : >> { %10633 = vmatprep.mubr.bf16.mxu1 %v5825_v44  ;;  %v11414_v44 = vld [vmem:[%s14061_s6 + $0xf0] sm:$0xff]  }
 0x733   : >> { %10634 = vmatmul.mubr.bf16.gmra.mrb[132].mxu1 %v5828_v33  ;;  %v11415_v33 = vld [vmem:[%s14061_s6 + $0xf8] sm:$0xff]  }
 0x734   : >> { %10653 = vmatprep.mubr.bf16.mxu1 %v13112_v61  ;;  %v11403_v61 = vld [vmem:[%s14061_s6 + $0x98] sm:$0xff]  }
 0x73b   : >> { %10654 = vmatmul.mubr.bf16.vlgmr.msra.gmra.mrb[112].mxu1 %v13288_v41 }
 0x73c   : >> { %10657 = vmatprep.mubr.bf16.mxu1 %v13291_v62  ;;  %10678 = vmatpush3.bf16.msra.mxu1 %v13212_v46  ;;  %v11404_v46 = vld [vmem:[%s14061_s6 + $0xa0] sm:$0xff]  }
 0x73d   : >> { %10679 = vmatprep.subr.bf16.mxu1 %v11401_v55 }
 0x740   : >> { %10680 = vmatpush3.bf16.msra.mxu1 %v11401_v55  ;;  %v6238_v55 = vsel %vm2382_vm5, %v6235_v22, %v6237_v3 }
 0x741   : >> { %10681 = vmatprep.subr.bf16.mxu1 %v11402_v50 }
 0x743   : >> { %10658 = vmatmul.mubr.bf16.gmra.mrb[116].mxu1 %v13301_v32 }
 0x744   : >> { %10661 = vmatprep.mubr.bf16.mxu1 %v13050_v49  ;;  %10682 = vmatpush3.bf16.msra.mxu1 %v11402_v50  ;;  %v11416_v50 = vld [vmem:[%s14061_s6 + $0x100] sm:$0xff]  }
 0x745   : >> { %10683 = vmatprep.subr.bf16.mxu1 %v11403_v61 }
 0x748   : >> { %10684 = vmatpush3.bf16.msra.mxu1 %v11403_v61  ;;  %v6474_v61 = vshrl.u32 %v6193_v45, 16 }
 0x749   : >> { %10685 = vmatprep.subr.bf16.mxu1 %v11404_v46 }
 0x74b   : >> { %10662 = vmatmul.mubr.bf16.gmra.mrb[120].mxu1 %v13048_v57 }
 0x74c   : >> { %10665 = vmatprep.mubr.bf16.mxu1 %v13070_v17  ;;  %10686 = vmatpush3.bf16.msra.mxu1 %v11404_v46  ;;  %v6477_v46 = vshll.u32 %v6193_v45, 16 }
 0x74d   : >> { %10687 = vmatprep.subr.bf16.mxu1 %v11405_v20 }
 0x750   : >> { %10688 = vmatpush3.bf16.msra.mxu1 %v11405_v20  ;;  %v6476_v20 = vrot.slane %v6474_v61, 1 }
 0x751   : >> { %10689 = vmatprep.subr.bf16.mxu1 %v11406_v51 }
 0x753   : >> { %10666 = vmatmul.mubr.bf16.gmra.mrb[124].mxu1 %v13062_v21 }
 0x754   : >> { %10669 = vmatprep.mubr.bf16.mxu1 %v13220_v23  ;;  %10690 = vmatpush3.bf16.msra.mxu1 %v11406_v51  ;;  %v6479_v51 = vrot.slane %v6477_v46, 2  ;;  %v11426_v23 = vld [vmem:[%s14067_s12 + $0x4] ss:$8 sps:$4 sm:$0xff]  }
 0x755   : >> { %10691 = vmatprep.subr.bf16.mxu1 %v11407_v2 }
 0x756   : >> { %v6480_v3 = vor.u32 %v6479_v51, %v6476_v20 }
 0x758   : >> { %10692 = vmatpush3.bf16.msra.mxu1 %v11407_v2  ;;  %v11417_v2 = vld [vmem:[%s14061_s6 + $0x108] sm:$0xff]  }
 0x759   : >> { %10717 = vmatprep.subr.bf16.mxu1 %v11408_v15 }
 0x75b   : >> { %10670 = vmatmul.mubr.bf16.gmra.mrb[128].mxu1 %v13218_v43  ;;  %v6226_v43 = vsel %vm2382_vm5, %v6223_v25, %v6225_v53  ;;  %v6760_v25 = vrot.slane %v6741_v24, 2  ;;  %v11430_v24 = vld [vmem:[%s14067_s12 + $0x14] ss:$8 sps:$4 sm:$0xff]  }
 0x75c   : >> { %10673 = vmatprep.mubr.bf16.mxu1 %v13237_v6 }
 0x763   : >> { %10674 = vmatmul.mubr.bf16.gmra.mrb[132].mxu1 %v5700_v27  ;;  %v6761_v27 = vrot.slane %v13288_v41, 2 }
 0x764   : >> { %10693 = vmatprep.mubr.bf16.mxu1 %v6224_v12  ;;  %v6765_v12 = vrot.slane %v13301_v32, 2  ;;  %v6773_v32 = vrot.slane %v13062_v21, 2 }
 0x766   : >> { %v6776_v57 = vsel %vm2820_vm7, %v6773_v32, %v6775_v26  ;;  %v11429_v26 = vld [vmem:[%s14068_s13 + $0x4] ss:$8 sps:$4 sm:$0xff]  }
 0x767   : >> { %9296 = vmatprep.mubr.msk.bf16.mxu0 %vm7085_vm8, %v11429_v26  ;;  %v11456_v26 = vld [vmem:[%s14068_s13 + $0x54] ss:$8 sps:$4 sm:$0xff]  }
 0x76b   : >> { %10694 = vmatmul.mubr.bf16.vlgmr.msra.gmra.mrb[112].mxu1 %v6226_v43 }
 0x76c   : >> { %10697 = vmatprep.mubr.bf16.mxu1 %v6228_v48  ;;  %10718 = vmatpush3.bf16.msra.mxu1 %v11408_v15 }
 0x76d   : >> { %10719 = vmatprep.subr.bf16.mxu1 %v11409_v60 }
 0x770   : >> { %10720 = vmatpush3.bf16.msra.mxu1 %v11409_v60 }
 0x771   : >> { %10721 = vmatprep.subr.bf16.mxu1 %v11410_v39 }
 0x773   : >> { %10698 = vmatmul.mubr.bf16.gmra.mrb[116].mxu1 %v6230_v40 }
 0x774   : >> { %10701 = vmatprep.mubr.bf16.mxu1 %v6232_v42  ;;  %10722 = vmatpush3.bf16.msra.mxu1 %v11410_v39 }
 0x775   : >> { %10723 = vmatprep.subr.bf16.mxu1 %v11411_v59 }
 0x778   : >> { %10724 = vmatpush3.bf16.msra.mxu1 %v11411_v59 }
 0x779   : >> { %10725 = vmatprep.subr.bf16.mxu1 %v11412_v8 }
 0x77b   : >> { %10702 = vmatmul.mubr.bf16.gmra.mrb[120].mxu1 %v6234_v1 }
 0x77c   : >> { %10705 = vmatprep.mubr.bf16.mxu1 %v6236_v19  ;;  %10726 = vmatpush3.bf16.msra.mxu1 %v11412_v8 }
 0x77d   : >> { %10727 = vmatprep.subr.bf16.mxu1 %v11413_v7 }
 0x780   : >> { %10728 = vmatpush3.bf16.msra.mxu1 %v11413_v7 }
 0x781   : >> { %10729 = vmatprep.subr.bf16.mxu1 %v11414_v44 }
 0x783   : >> { %10706 = vmatmul.mubr.bf16.gmra.mrb[124].mxu1 %v6238_v55 }
 0x784   : >> { %10709 = vmatprep.mubr.bf16.mxu1 %v13235_v11  ;;  %10730 = vmatpush3.bf16.msra.mxu1 %v11414_v44  ;;  %v6484_v11 = vsel %vm2586_vm6, %v6480_v3, %v12783_v31  ;;  %v11419_v31 = vld [vmem:[%s14061_s6 + $0x118] sm:$0xff]  }
 0x785   : >> { %10731 = vmatprep.subr.bf16.mxu1 %v11415_v33 }
 0x788   : >> { %10732 = vmatpush3.bf16.msra.mxu1 %v11415_v33 }
 0x789   : >> { %10757 = vmatprep.subr.bf16.mxu1 %v11416_v50 }
 0x78b   : >> { %10710 = vmatmul.mubr.bf16.gmra.mrb[128].mxu1 %v13259_v13  ;;  %v11418_v13 = vld [vmem:[%s14061_s6 + $0x110] sm:$0xff]  }
 0x78c   : >> { %10713 = vmatprep.mubr.bf16.mxu1 %v13281_v28  ;;  %v11423_v28 = vld [vmem:[%s14061_s6 + $0x138] sm:$0xff]  }
 0x793   : >> { %10714 = vmatmul.mubr.bf16.gmra.mrb[132].mxu1 %v6243_v0 }
 0x794   : >> { %10733 = vmatprep.mubr.bf16.mxu1 %v6484_v11 }
 0x79b   : >> { %10734 = vmatmul.mubr.bf16.vlgmr.msra.gmra.mrb[112].mxu1 %v12805_v34  ;;  %v11420_v34 = vld [vmem:[%s14061_s6 + $0x120] sm:$0xff]  }
 0x79c   : >> { %10737 = vmatprep.mubr.bf16.mxu1 %v12809_v56  ;;  %10758 = vmatpush3.bf16.msra.mxu1 %v11416_v50  ;;  %v11421_v56 = vld [vmem:[%s14061_s6 + $0x128] sm:$0xff]  }
 0x79d   : >> { %10759 = vmatprep.subr.bf16.mxu1 %v11417_v2 }
 0x7a0   : >> { %10760 = vmatpush3.bf16.msra.mxu1 %v11417_v2 }
 0x7a1   : >> { %10761 = vmatprep.subr.bf16.mxu1 %v11418_v13 }
 0x7a3   : >> { %10738 = vmatmul.mubr.bf16.gmra.mrb[116].mxu1 %v13078_v54  ;;  %v6456_v54 = vld [vmem:[#allocation3 + $0x58] sm:$0xf] }
 0x7a4   : >> { %10741 = vmatprep.mubr.bf16.mxu1 %v13085_v29  ;;  %10762 = vmatpush3.bf16.msra.mxu1 %v11418_v13  ;;  %v11422_v29 = vld [vmem:[%s14061_s6 + $0x130] sm:$0xff]   ;;  %v6522_v38 = vshrl.u32 %v6456_v54, 16  ;;  %v6525_v0 = vshll.u32 %v6456_v54, 16 }
 0x7a5   : >> { %10763 = vmatprep.subr.bf16.mxu1 %v11419_v31 }
 0x7a6   : >> { %v6527_v15 = vrot.slane %v6525_v0, 2 }
 0x7a8   : >> { %10764 = vmatpush3.bf16.msra.mxu1 %v11419_v31 }
 0x7a9   : >> { %10765 = vmatprep.subr.bf16.mxu1 %v11420_v34 }
 0x7ab   : >> { %10742 = vmatmul.mubr.bf16.gmra.mrb[120].mxu1 %v13094_v37  ;;  %v6524_v37 = vrot.slane %v6522_v38, 1 }
 0x7ac   : >> { %10745 = vmatprep.mubr.bf16.mxu1 %v13098_v52  ;;  %10766 = vmatpush3.bf16.msra.mxu1 %v11420_v34 }
 0x7ad   : >> { %10767 = vmatprep.subr.bf16.mxu1 %v11421_v56  ;;  %v6528_v52 = vor.u32 %v6527_v15, %v6524_v37  ;;  %v11462_v37 = vld [vmem:[%s14063_s8 + $0x84] ss:$8 sps:$4 sm:$0xff]  }
 0x7af   : >> { %v6529_v45 = vsel %vm2586_vm6, %v13267_v63, %v6528_v52  ;;  %v6767_v63 = vrot.slane %v13050_v49, 2  ;;  %v6781_v49 = vrot.slane %v6456_v54, 2 }
 0x7b0   : >> { %10768 = vmatpush3.bf16.msra.mxu1 %v11421_v56 }
 0x7b1   : >> { %10769 = vmatprep.subr.bf16.mxu1 %v11422_v29  ;;  %v6768_v41 = vsel %vm2820_vm7, %v6765_v12, %v6767_v63  ;;  %v6770_v60 = vsel %vm2820_vm7, %v6767_v63, %v6769_v14  ;;  %v6782_v21 = vsel %vm2820_vm7, %v6779_v9, %v6781_v49  ;;  %v11438_v63 = vld [vmem:[%s14068_s13 + $0x24] ss:$8 sps:$4 sm:$0xff]  }
 0x7b3   : >> { %10746 = vmatmul.mubr.bf16.gmra.mrb[124].mxu1 %v13247_v10  ;;  %v6762_v10 = vsel %vm2820_vm7, %v6760_v25, %v6761_v27  ;;  %v11432_v25 = vld [vmem:[%s14068_s13 + $0x14] ss:$8 sps:$4 sm:$0xff]  }
 0x7b4   : >> { %10749 = vmatprep.mubr.bf16.mxu1 %v13250_v18  ;;  %10770 = vmatpush3.bf16.msra.mxu1 %v11422_v29  ;;  %v6763_v18 = vrot.slane %v13291_v62, 2  ;;  %v6771_v62 = vrot.slane %v13070_v17, 2  ;;  %v11628_v17 = vmov 0  }
 0x7b5   : >> { %10771 = vmatprep.subr.bf16.mxu1 %v11423_v28  ;;  %7261 = vmatprep.subr.bf16.mxu0 %v11628_v17 }
 0x7b6   : >> { %v6764_v53 = vsel %vm2820_vm7, %v6761_v27, %v6763_v18  ;;  %v6772_v43 = vsel %vm2820_vm7, %v6769_v14, %v6771_v62  ;;  %v6774_v48 = vsel %vm2820_vm7, %v6771_v62, %v6773_v32  ;;  %v11460_v27 = vld [vmem:[%s14063_s8 + $0x80] ss:$8 sps:$4 sm:$0xff]   ;;  %v11444_v62 = vld [vmem:[%s14068_s13 + $0x34] ss:$8 sps:$4 sm:$0xff]   ;;  %v11446_v32 = vld [vmem:[%s14067_s12 + $0x30] ss:$8 sps:$4 sm:$0xff]  }
 0x7b7   : >> { %v11440_v14 = vld [vmem:[%s14067_s12 + $0x20] ss:$8 sps:$4 sm:$0xff]  }
 0x7b8   : >> { %10772 = vmatpush3.bf16.msra.mxu1 %v11423_v28 }
 0x7b9   : >> { %7108 = vmatprep.subr.bf16.mxu1 %v11628_v17 }
 0x7bb   : >> { %10750 = vmatmul.mubr.bf16.gmra.mrb[128].mxu1 %v13273_v30  ;;  %v6766_v30 = vsel %vm2820_vm7, %v6763_v18, %v6765_v12  ;;  %v11463_v18 = vld [vmem:[%s14063_s8 + $0x90] ss:$8 sps:$4 sm:$0xff]  }
 0x7bc   : >> { %10753 = vmatprep.mubr.bf16.mxu1 %v6529_v45  ;;  %v11427_v45 = vld [vmem:[%s14068_s13] ss:$8 sps:$4 sm:$0xff]   ;;  %v11434_v12 = vld [vmem:[%s14067_s12 + $0x10] ss:$8 sps:$4 sm:$0xff]  }
 0x7c3   : >> { %10754 = vmatmul.mubr.bf16.gmra.mrb[132].mxu1 %v6528_v52  ;;  %v11424_v52 = vld [vmem:[%s14067_s12] ss:$8 sps:$4 sm:$0xff]  }
 0x7c4   : >> { %10773 = vmatprep.mubr.bf16.mxu1 %v6762_v10  ;;  %v11465_v10 = vld [vmem:[%s14063_s8 + $0x94] ss:$8 sps:$4 sm:$0xff]  }
 0x7cb   : >> { %10774 = vmatmul.mubr.bf16.vlgmr.msra.gmra.mrb[112].mxu1 %v6764_v53  ;;  %v11435_v53 = vld [vmem:[%s14068_s13 + $0x10] ss:$8 sps:$4 sm:$0xff]  }
 0x7cc   : >> { %10777 = vmatprep.mubr.bf16.mxu1 %v6766_v30  ;;  %v11436_v30 = vld [vmem:[%s14067_s12 + $0x24] ss:$8 sps:$4 sm:$0xff]  }
 0x7d3   : >> { %10778 = vmatmul.mubr.bf16.gmra.mrb[116].mxu1 %v6768_v41  ;;  %v11441_v41 = vld [vmem:[%s14068_s13 + $0x20] ss:$8 sps:$4 sm:$0xff]  }
 0x7d4   : >> { %10781 = vmatprep.mubr.bf16.mxu1 %v6770_v60  ;;  %v11442_v60 = vld [vmem:[%s14067_s12 + $0x34] ss:$8 sps:$4 sm:$0xff]  }
 0x7db   : >> { %10782 = vmatmul.mubr.bf16.gmra.mrb[120].mxu1 %v6772_v43  ;;  %v11447_v43 = vld [vmem:[%s14068_s13 + $0x30] ss:$8 sps:$4 sm:$0xff]  }
 0x7dc   : >> { %10785 = vmatprep.mubr.bf16.mxu1 %v6774_v48  ;;  %v11448_v48 = vld [vmem:[%s14067_s12 + $0x44] ss:$8 sps:$4 sm:$0xff]  }
 0x7e3   : >> { %10786 = vmatmul.mubr.bf16.gmra.mrb[124].mxu1 %v6776_v57  ;;  %v11450_v57 = vld [vmem:[%s14068_s13 + $0x44] ss:$8 sps:$4 sm:$0xff]  }
 0x7e4   : >> { %10789 = vmatprep.mubr.bf16.mxu1 %v13255_v36 }
 0x7eb   : >> { %10790 = vmatmul.mubr.bf16.gmra.mrb[128].mxu1 %v13264_v58 }
 0x7ec   : >> { %10793 = vmatprep.mubr.bf16.mxu1 %v6782_v21  ;;  %v11453_v21 = vld [vmem:[%s14068_s13 + $0x40] ss:$8 sps:$4 sm:$0xff]  }
 0x7f3   : >> { %10794 = vmatmul.mubr.bf16.gmra.mrb[132].mxu1 %v6781_v49  ;;  %v11452_v49 = vld [vmem:[%s14067_s12 + $0x40] ss:$8 sps:$4 sm:$0xff]  }
 0x7f4   : >> { %9278 = vmatprep.mubr.msk.bf16.mxu1 %vm7085_vm8, %v11426_v23  ;;  %v11454_v23 = vld [vmem:[%s14067_s12 + $0x54] ss:$8 sps:$4 sm:$0xff]  }
 0x89e   : >> { %v10775_v6 = vpop.f32.mrb[112].mxu1 }
 0x89f   : >> { %v6877_v36 = vpop.f32.mrb[113].mxu1 }
 0x8a0   : >> { %v10776_v9 = vpop.f32.mrb[114].mxu1 }
 0x8a1   : >> { %v7020_v58 = vpack.c.bf16 %v10776_v9, %v10775_v6  ;;  %v6880_v39 = vpop.f32.mrb[115].mxu1  ;;  %v11458_v6 = vld [vmem:[%s14067_s12 + $0x50] ss:$8 sps:$4 sm:$0xff]   ;;  %v11466_v9 = vld [vmem:[%s14063_s8 + $0xa0] ss:$8 sps:$4 sm:$0xff]  }
 0x8a2   : >> { %v7019_v16 = vpack.c.bf16 %v6880_v39, %v6877_v36  ;;  %v11459_v36 = vld [vmem:[%s14068_s13 + $0x50] ss:$8 sps:$4 sm:$0xff]   ;;  %v11471_v39 = vld [vmem:[%s14063_s8 + $0xb4] ss:$8 sps:$4 sm:$0xff]  }
 0x8a4   : >> { %7109 = vmatpush1.bf16.msra.mxu1 %v7019_v16  ;;  %7262 = vmatpush1.bf16.msra.mxu0 %v7019_v16  ;;  %v11469_v16 = vld [vmem:[%s14063_s8 + $0xb0] ss:$8 sps:$4 sm:$0xff]  }
 0x8a5   : >> { %7110 = vmatprep.subr.bf16.mxu1 %v11628_v17  ;;  %7263 = vmatprep.subr.bf16.mxu0 %v11628_v17 }
 0x8a6   : >> { %v10779_v35 = vpop.f32.mrb[116].mxu1 }
 0x8a7   : >> { %v6893_v59 = vpop.f32.mrb[117].mxu1 }
 0x8a8   : >> { %v10780_v40 = vpop.f32.mrb[118].mxu1  ;;  %7111 = vmatpush1.bf16.msra.mxu1 %v7020_v58  ;;  %7264 = vmatpush1.bf16.msra.mxu0 %v7020_v58  ;;  %v11468_v58 = vld [vmem:[%s14063_s8 + $0xa4] ss:$8 sps:$4 sm:$0xff]  }
 0x8a9   : >> { %v7022_v42 = vpack.c.bf16 %v10780_v40, %v10779_v35  ;;  %v6896_v8 = vpop.f32.mrb[119].mxu1  ;;  %7112 = vmatprep.subr.bf16.mxu1 %v11628_v17  ;;  %7265 = vmatprep.subr.bf16.mxu0 %v11628_v17  ;;  %v11472_v35 = vld [vmem:[%s14063_s8 + $0xc0] ss:$8 sps:$4 sm:$0xff]   ;;  %v11475_v40 = vld [vmem:[%s14063_s8 + $0xd0] ss:$8 sps:$4 sm:$0xff]  }
 0x8aa   : >> { %v7021_v47 = vpack.c.bf16 %v6896_v8, %v6893_v59  ;;  %v11474_v59 = vld [vmem:[%s14063_s8 + $0xc4] ss:$8 sps:$4 sm:$0xff]  }
 0x8ab   : >> { %v11480_v8 = vld [vmem:[%s14063_s8 + $0xe4] ss:$8 sps:$4 sm:$0xff]  }
 0x8ac   : >> { %7113 = vmatpush1.bf16.msra.mxu1 %v7021_v47  ;;  %7266 = vmatpush1.bf16.msra.mxu0 %v7021_v47  ;;  %v11478_v47 = vld [vmem:[%s14063_s8 + $0xe0] ss:$8 sps:$4 sm:$0xff]  }
 0x8ad   : >> { %7114 = vmatprep.subr.bf16.mxu1 %v11628_v17  ;;  %7267 = vmatprep.subr.bf16.mxu0 %v11628_v17 }
 0x8ae   : >> { %v10783_v22 = vpop.f32.mrb[120].mxu1 }
 0x8af   : >> { %v6909_v7 = vpop.f32.mrb[121].mxu1 }
 0x8b0   : >> { %v10784_v1 = vpop.f32.mrb[122].mxu1  ;;  %7115 = vmatpush1.bf16.msra.mxu1 %v7022_v42  ;;  %7268 = vmatpush1.bf16.msra.mxu0 %v7022_v42  ;;  %v11477_v42 = vld [vmem:[%s14063_s8 + $0xd4] ss:$8 sps:$4 sm:$0xff]  }
 0x8b1   : >> { %v7024_v19 = vpack.c.bf16 %v10784_v1, %v10783_v22  ;;  %v6912_v44 = vpop.f32.mrb[123].mxu1  ;;  %7116 = vmatprep.subr.bf16.mxu1 %v11628_v17  ;;  %7269 = vmatprep.subr.bf16.mxu0 %v11628_v17  ;;  %v11481_v22 = vld [vmem:[%s14063_s8 + $0xf0] ss:$8 sps:$4 sm:$0xff]   ;;  %v11486_v1 = vld [vmem:[%s14063_s8 + $0x4] ss:$8 sps:$4 sm:$0xff]  }
 0x8b2   : >> { %v7023_v33 = vpack.c.bf16 %v6912_v44, %v6909_v7  ;;  %v11483_v7 = vld [vmem:[%s14063_s8 + $0xf4] ss:$8 sps:$4 sm:$0xff]   ;;  %v13592_v44 = vld [vmem:[%s14062_s7] ss:$0 sm:$0xff] }
 0x8b4   : >> { %7117 = vmatpush1.bf16.msra.mxu1 %v7023_v33  ;;  %7270 = vmatpush1.bf16.msra.mxu0 %v7023_v33 }
 0x8b5   : >> { %7118 = vmatprep.subr.bf16.mxu1 %v11628_v17  ;;  %7271 = vmatprep.subr.bf16.mxu0 %v11628_v17 }
 0x8b6   : >> { %v10787_v55 = vpop.f32.mrb[124].mxu1 }
 0x8b7   : >> { %v6925_v50 = vpop.f32.mrb[125].mxu1 }
 0x8b8   : >> { %v10788_v61 = vpop.f32.mrb[126].mxu1  ;;  %7119 = vmatpush1.bf16.msra.mxu1 %v7024_v19  ;;  %7272 = vmatpush1.bf16.msra.mxu0 %v7024_v19 }
 0x8b9   : >> { %v7026_v46 = vpack.c.bf16 %v10788_v61, %v10787_v55  ;;  %v6928_v20 = vpop.f32.mrb[127].mxu1  ;;  %7120 = vmatprep.subr.bf16.mxu1 %v11628_v17  ;;  %7273 = vmatprep.subr.bf16.mxu0 %v11628_v17 }
 0x8ba   : >> { %v7025_v51 = vpack.c.bf16 %v6928_v20, %v6925_v50 }
 0x8bc   : >> { %7121 = vmatpush1.bf16.msra.mxu1 %v7025_v51  ;;  %7274 = vmatpush1.bf16.msra.mxu0 %v7025_v51 }
 0x8bd   : >> { %7122 = vmatprep.subr.bf16.mxu1 %v11628_v17  ;;  %7275 = vmatprep.subr.bf16.mxu0 %v11628_v17 }
 0x8be   : >> { %v10791_v3 = vpop.f32.mrb[128].mxu1 }
 0x8bf   : >> { %v6941_v11 = vpop.f32.mrb[129].mxu1 }
 0x8c0   : >> { %v10792_v2 = vpop.f32.mrb[130].mxu1  ;;  %7123 = vmatpush1.bf16.msra.mxu1 %v7026_v46  ;;  %7276 = vmatpush1.bf16.msra.mxu0 %v7026_v46 }
 0x8c1   : >> { %v7028_v13 = vpack.c.bf16 %v10792_v2, %v10791_v3  ;;  %v6944_v31 = vpop.f32.mrb[131].mxu1  ;;  %7124 = vmatprep.subr.bf16.mxu1 %v11628_v17  ;;  %7277 = vmatprep.subr.bf16.mxu0 %v11628_v17 }
 0x8c2   : >> { %v7027_v34 = vpack.c.bf16 %v6944_v31, %v6941_v11 }
 0x8c4   : >> { %7125 = vmatpush1.bf16.msra.mxu1 %v7027_v34  ;;  %7278 = vmatpush1.bf16.msra.mxu0 %v7027_v34 }
 0x8c5   : >> { %7126 = vmatprep.subr.bf16.mxu1 %v11628_v17  ;;  %7279 = vmatprep.subr.bf16.mxu0 %v11628_v17 }
 0x8c6   : >> { %v10795_v56 = vpop.f32.mrb[132].mxu1 }
 0x8c7   : >> { %v6957_v54 = vpop.f32.mrb[133].mxu1  ;;  %v7030_v28 = vpack.c.bf16 %v10795_v56, %v10795_v56 }
 0x8c8   : >> { %v10796_v29 = vpop.f32.mrb[134].mxu1  ;;  %7127 = vmatpush1.bf16.msra.mxu1 %v7028_v13  ;;  %7280 = vmatpush1.bf16.msra.mxu0 %v7028_v13 }
 0x8c9   : >> { %v6960_v38 = vpop.f32.mrb[135].mxu1  ;;  %7128 = vmatprep.subr.bf16.mxu1 %v11628_v17  ;;  %7281 = vmatprep.subr.bf16.mxu0 %v11628_v17  ;;  %v7106_v15 = vsel %vm7104_vm9, %v7030_v28, 0 }
 0x8ca   : >> { %v7029_v0 = vpack.c.bf16 %v6960_v38, %v6957_v54 }
 0x8cc   : >> { %7129 = vmatpush1.bf16.msra.mxu1 %v7029_v0  ;;  %7282 = vmatpush1.bf16.msra.mxu0 %v7029_v0 }
 0x8cd   : >> { %7130 = vmatprep.subr.bf16.mxu1 %v11628_v17  ;;  %7283 = vmatprep.subr.bf16.mxu0 %v11628_v17 }
 0x8d0   : >> { %7131 = vmatpush1.bf16.msra.mxu1 %v7106_v15  ;;  %7284 = vmatpush1.bf16.msra.mxu0 %v7106_v15 }
 0x8d1   : >> { %7568 = vmatprep.subr.bf16.mxu0 %v11462_v37 }
 0x8d3   : >> { %7141 = vmatmul.mubr.bf16.vlgmr.msra.gmra.mrb[136].mxu1 %v11424_v52  ;;  %7294 = vmatmul.mubr.bf16.vlgmr.msra.gmra.mrb[80].mxu0 %v11427_v45 }
 0x8d4   : >> { %9279 = vmatprep.mubr.msk.bf16.mxu1 %vm7085_vm8, %v11430_v24  ;;  %9297 = vmatprep.mubr.msk.bf16.mxu0 %vm7085_vm8, %v11432_v25 }
 0x8d5   : >> { %7569 = vmatpush1.bf16.msra.mxu0 %v11460_v27 }
 0x8d6   : >> { %7570 = vmatprep.subr.bf16.mxu0 %v11465_v10 }
 0x8d9   : >> { %7571 = vmatpush1.bf16.msra.mxu0 %v11463_v18 }
 0x8da   : >> { %7572 = vmatprep.subr.bf16.mxu0 %v11468_v58 }
 0x8db   : >> { %7149 = vmatmul.mubr.bf16.gmra.mrb[140].mxu1 %v11434_v12  ;;  %7302 = vmatmul.mubr.bf16.gmra.mrb[84].mxu0 %v11435_v53 }
 0x8dc   : >> { %9280 = vmatprep.mubr.msk.bf16.mxu1 %vm7085_vm8, %v11436_v30  ;;  %9298 = vmatprep.mubr.msk.bf16.mxu0 %vm7085_vm8, %v11438_v63 }
 0x8dd   : >> { %7573 = vmatpush1.bf16.msra.mxu0 %v11466_v9 }
 0x8de   : >> { %7574 = vmatprep.subr.bf16.mxu0 %v11471_v39  ;;  %v11484_v39 = vld [vmem:[%s14063_s8] ss:$8 sps:$4 sm:$0xff]  }
 0x8e1   : >> { %7575 = vmatpush1.bf16.msra.mxu0 %v11469_v16 }
 0x8e2   : >> { %7576 = vmatprep.subr.bf16.mxu0 %v11474_v59 }
 0x8e3   : >> { %7157 = vmatmul.mubr.bf16.gmra.mrb[144].mxu1 %v11440_v14  ;;  %7310 = vmatmul.mubr.bf16.gmra.mrb[88].mxu0 %v11441_v41 }
 0x8e4   : >> { %9281 = vmatprep.mubr.msk.bf16.mxu1 %vm7085_vm8, %v11442_v60  ;;  %9299 = vmatprep.mubr.msk.bf16.mxu0 %vm7085_vm8, %v11444_v62 }
 0x8e5   : >> { %7577 = vmatpush1.bf16.msra.mxu0 %v11472_v35  ;;  %v11489_v35 = vld [vmem:[%s14063_s8 + $0x14] ss:$8 sps:$4 sm:$0xff]  }
 0x8e6   : >> { %7578 = vmatprep.subr.bf16.mxu0 %v11477_v42 }
 0x8e9   : >> { %7579 = vmatpush1.bf16.msra.mxu0 %v11475_v40 }
 0x8ea   : >> { %7580 = vmatprep.subr.bf16.mxu0 %v11480_v8 }
 0x8eb   : >> { %7165 = vmatmul.mubr.bf16.gmra.mrb[148].mxu1 %v11446_v32  ;;  %7318 = vmatmul.mubr.bf16.gmra.mrb[92].mxu0 %v11447_v43 }
 0x8ec   : >> { %9282 = vmatprep.mubr.msk.bf16.mxu1 %vm7085_vm8, %v11448_v48  ;;  %9300 = vmatprep.mubr.msk.bf16.mxu0 %vm7085_vm8, %v11450_v57 }
 0x8ed   : >> { %7581 = vmatpush1.bf16.msra.mxu0 %v11478_v47 }
 0x8ee   : >> { %7582 = vmatprep.subr.bf16.mxu0 %v11483_v7 }
 0x8f1   : >> { %7583 = vmatpush1.bf16.msra.mxu0 %v11481_v22 }
 0x8f2   : >> { %7739 = vmatprep.subr.bf16.mxu0 %v11486_v1 }
 0x8f3   : >> { %7173 = vmatmul.mubr.bf16.gmra.mrb[152].mxu1 %v11452_v49  ;;  %7326 = vmatmul.mubr.bf16.gmra.mrb[96].mxu0 %v11453_v21 }
 0x8f4   : >> { %9283 = vmatprep.mubr.msk.bf16.mxu1 %vm7085_vm8, %v11454_v23  ;;  %9301 = vmatprep.mubr.msk.bf16.mxu0 %vm7085_vm8, %v11456_v26 }
 0x8fb   : >> { %7181 = vmatmul.mubr.bf16.gmra.mrb[156].mxu1 %v11458_v6  ;;  %7334 = vmatmul.mubr.bf16.gmra.mrb[100].mxu0 %v11459_v36 }
 0x8fc   : >> { %7600 = vmatprep.mubr.bf16.mxu0 %v11628_v17  ;;  %8630 = vmatprep.mubr.bf16.mxu1 %v11628_v17 }
 0x9a6   : >> { %v7142_v19 = vpop.f32.mrb[136].mxu1  ;;  %v7295_v33 = vpop.f32.mrb[80].mxu0 }
 0x9a7   : >> { %v7342_v55 = vmax.f32 %v7142_v19, %v7295_v33  ;;  %v7144_v50 = vpop.f32.mrb[137].mxu1  ;;  %v7297_v61 = vpop.f32.mrb[81].mxu0 }
 0x9a8   : >> { %v7145_v46 = vpop.f32.mrb[138].mxu1  ;;  %v7298_v20 = vpop.f32.mrb[82].mxu0  ;;  %v11487_v50 = vld [vmem:[%s14063_s8 + $0x10] ss:$8 sps:$4 sm:$0xff]  }
 0x9a9   : >> { %v7360_v51 = vadd.f32 %v13592_v44, %v7342_v55  ;;  %v7343_v3 = vmax.f32 %v7145_v46, %v7298_v20  ;;  %v7147_v11 = vpop.f32.mrb[139].mxu1  ;;  %v7300_v2 = vpop.f32.mrb[83].mxu0  ;;  %v11492_v20 = vld [vmem:[%s14063_s8 + $0x24] ss:$8 sps:$4 sm:$0xff]  }
 0x9ab   : >> { %v7361_v13 = vadd.f32 %v13592_v44, %v7343_v3  ;;  %v7372_v31 = vmax.f32 %v7360_v51, 0.0 }
 0x9ad   : >> { %v7373_v34 = vmax.f32 %v7361_v13, 0.0 }
 0x9ae   : >> { %v7150_v56 = vpop.f32.mrb[140].mxu1  ;;  %v7303_v54 = vpop.f32.mrb[84].mxu0 }
 0x9af   : >> { %v13596_v29 = vpack.c.bf16 %v7373_v34, %v7372_v31  ;;  %v7344_v38 = vmax.f32 %v7150_v56, %v7303_v54  ;;  %v7152_v0 = vpop.f32.mrb[141].mxu1  ;;  %v7305_v28 = vpop.f32.mrb[85].mxu0 }
 0x9b0   : >> { %v7153_v37 = vpop.f32.mrb[142].mxu1  ;;  %v7306_v15 = vpop.f32.mrb[86].mxu0  ;;  %v11495_v28 = vld [vmem:[%s14063_s8 + $0x34] ss:$8 sps:$4 sm:$0xff]  }
 0x9b1   : >> { %7390 = vst [vmem:[#allocation4] sm:$0xff] %v13596_v29  ;;  %v7362_v52 = vadd.f32 %v13592_v44, %v7344_v38  ;;  %v7345_v45 = vmax.f32 %v7153_v37, %v7306_v15  ;;  %v7155_v24 = vpop.f32.mrb[143].mxu1  ;;  %v7308_v25 = vpop.f32.mrb[87].mxu0  ;;  %v7438_v10 = vshll.u32 %v13596_v29, 16  ;;  %v7436_v48 = vshrl.u32 %v13596_v29, 16 }
 0x9b2   : >> { %v11490_v38 = vld [vmem:[%s14063_s8 + $0x20] ss:$8 sps:$4 sm:$0xff]  }
 0x9b3   : >> { %v7363_v27 = vadd.f32 %v13592_v44, %v7345_v45  ;;  %v7374_v18 = vmax.f32 %v7362_v52, 0.0  ;;  %v7440_v62 = vrot.slane %v7438_v10, 1 }
 0x9b5   : >> { %v7375_v12 = vmax.f32 %v7363_v27, 0.0  ;;  %v7441_v9 = vor.u32 %v7440_v62, %v7436_v48 }
 0x9b6   : >> { %v7158_v53 = vpop.f32.mrb[144].mxu1  ;;  %v7311_v30 = vpop.f32.mrb[88].mxu0 }
 0x9b7   : >> { %v13602_v63 = vpack.c.bf16 %v7375_v12, %v7374_v18  ;;  %v7346_v14 = vmax.f32 %v7158_v53, %v7311_v30  ;;  %v7160_v41 = vpop.f32.mrb[145].mxu1  ;;  %v7313_v60 = vpop.f32.mrb[89].mxu0  ;;  %v11493_v30 = vld [vmem:[%s14063_s8 + $0x30] ss:$8 sps:$4 sm:$0xff]  }
 0x9b8   : >> { %v7161_v32 = vpop.f32.mrb[146].mxu1  ;;  %v7314_v43 = vpop.f32.mrb[90].mxu0  ;;  %v11498_v60 = vld [vmem:[%s14063_s8 + $0x44] ss:$8 sps:$4 sm:$0xff]  }
 0x9b9   : >> { %v7364_v57 = vadd.f32 %v13592_v44, %v7346_v14  ;;  %v7347_v49 = vmax.f32 %v7161_v32, %v7314_v43  ;;  %v7163_v21 = vpop.f32.mrb[147].mxu1  ;;  %v7316_v23 = vpop.f32.mrb[91].mxu0  ;;  %v7443_v26 = vshll.u32 %v13602_v63, 16  ;;  %v7447_v6 = vshrl.u32 %v13602_v63, 16 }
 0x9bb   : >> { %v7365_v36 = vadd.f32 %v13592_v44, %v7347_v49  ;;  %v7445_v58 = vrot.slane %v7443_v26, 1  ;;  %v8088_v16 = vrot.slane %v7447_v6, 1  ;;  %v8089_v59 = vrot.slane %v7443_v26, 2 }
 0x9bc   : >> { %v7376_v40 = vmax.f32 %v7364_v57, 0.0 }
 0x9bd   : >> { %v7377_v42 = vmax.f32 %v7365_v36, 0.0  ;;  %v7446_v8 = vsel %vm1989_vm4, %v7441_v9, %v7445_v58  ;;  %v13616_v7 = vor.u32 %v8089_v59, %v8088_v16  ;;  %v7449_v56 = vor.u32 %v7447_v6, %v7445_v58  ;;  %v11496_v36 = vld [vmem:[%s14063_s8 + $0x40] ss:$8 sps:$4 sm:$0xff]   ;;  %v11501_v58 = vld [vmem:[%s14063_s8 + $0x54] ss:$8 sps:$4 sm:$0xff]  }
 0x9be   : >> { %v7166_v47 = vpop.f32.mrb[148].mxu1  ;;  %v7319_v22 = vpop.f32.mrb[92].mxu0  ;;  %7601 = vmatmul.mubr.bf16.vlgmr.msra.gmra.mrb[104].mxu0 %v7446_v8 }
 0x9bf   : >> { %v13618_v1 = vpack.c.bf16 %v7377_v42, %v7376_v40  ;;  %v7348_v19 = vmax.f32 %v7166_v47, %v7319_v22  ;;  %v7168_v33 = vpop.f32.mrb[149].mxu1  ;;  %v7321_v55 = vpop.f32.mrb[93].mxu0  ;;  %7610 = vmatprep.mubr.bf16.mxu0 %v11628_v17  ;;  %7740 = vmatpush1.bf16.msra.mxu0 %v11484_v39 }
 0x9c0   : >> { %v7169_v61 = vpop.f32.mrb[150].mxu1  ;;  %v7322_v46 = vpop.f32.mrb[94].mxu0  ;;  %7741 = vmatprep.subr.bf16.mxu0 %v11489_v35  ;;  %v11499_v55 = vld [vmem:[%s14063_s8 + $0x50] ss:$8 sps:$4 sm:$0xff]  }
 0x9c1   : >> { %v7366_v51 = vadd.f32 %v13592_v44, %v7348_v19  ;;  %v7349_v3 = vmax.f32 %v7169_v61, %v7322_v46  ;;  %v7171_v11 = vpop.f32.mrb[151].mxu1  ;;  %v7324_v2 = vpop.f32.mrb[95].mxu0  ;;  %v7451_v13 = vshll.u32 %v13618_v1, 16  ;;  %v7455_v31 = vshrl.u32 %v13618_v1, 16  ;;  %v11504_v46 = vld [vmem:[%s14063_s8 + $0x64] ss:$8 sps:$4 sm:$0xff]  }
 0x9c3   : >> { %v7367_v34 = vadd.f32 %v13592_v44, %v7349_v3  ;;  %v7453_v54 = vrot.slane %v7451_v13, 1  ;;  %7742 = vmatpush1.bf16.msra.mxu0 %v11487_v50  ;;  %v8092_v0 = vrot.slane %v7455_v31, 1  ;;  %v8093_v37 = vrot.slane %v7451_v13, 2 }
 0x9c4   : >> { %7743 = vmatprep.subr.bf16.mxu0 %v11492_v20  ;;  %v7378_v15 = vmax.f32 %v7366_v51, 0.0 }
 0x9c5   : >> { %v7379_v52 = vmax.f32 %v7367_v34, 0.0  ;;  %v7454_v45 = vsel %vm1989_vm4, %v7449_v56, %v7453_v54  ;;  %v8094_v27 = vor.u32 %v8093_v37, %v8092_v0  ;;  %v7457_v26 = vor.u32 %v7455_v31, %v7453_v54 }
 0x9c6   : >> { %v7174_v24 = vpop.f32.mrb[152].mxu1  ;;  %v7327_v25 = vpop.f32.mrb[96].mxu0  ;;  %7611 = vmatmul.mubr.bf16.gmra.mrb[108].mxu0 %v7454_v45 }
 0x9c7   : >> { %v13638_v10 = vpack.c.bf16 %v7379_v52, %v7378_v15  ;;  %v7350_v18 = vmax.f32 %v7174_v24, %v7327_v25  ;;  %v7176_v12 = vpop.f32.mrb[153].mxu1  ;;  %v7329_v53 = vpop.f32.mrb[97].mxu0  ;;  %7620 = vmatprep.mubr.bf16.mxu0 %v11628_v17  ;;  %7744 = vmatpush1.bf16.msra.mxu0 %v11490_v38  ;;  %v13649_v62 = vsel %vm2586_vm6, %v13616_v7, %v8094_v27  ;;  %v11502_v38 = vld [vmem:[%s14063_s8 + $0x60] ss:$8 sps:$4 sm:$0xff]   ;;  %v11505_v25 = vld [vmem:[%s14063_s8 + $0x70] ss:$8 sps:$4 sm:$0xff]  }
 0x9c8   : >> { %v7177_v14 = vpop.f32.mrb[154].mxu1  ;;  %v7330_v41 = vpop.f32.mrb[98].mxu0  ;;  %7745 = vmatprep.subr.bf16.mxu0 %v11495_v28  ;;  %v11507_v28 = vld [vmem:[%s14063_s8 + $0x74] ss:$8 sps:$4 sm:$0xff]  }
 0x9c9   : >> { %v7368_v32 = vadd.f32 %v13592_v44, %v7350_v18  ;;  %v7351_v43 = vmax.f32 %v7177_v14, %v7330_v41  ;;  %v7179_v48 = vpop.f32.mrb[155].mxu1  ;;  %v7332_v57 = vpop.f32.mrb[99].mxu0  ;;  %v7459_v49 = vshll.u32 %v13638_v10, 16  ;;  %v7463_v21 = vshrl.u32 %v13638_v10, 16 }
 0x9ca   : >> { %v11513_v48 = vld [vmem:[%s14063_s8 + $0x114] ss:$8 sps:$4 sm:$0xff]   ;;  %v11511_v57 = vld [vmem:[%s14063_s8 + $0x110] ss:$8 sps:$4 sm:$0xff]  }
 0x9cb   : >> { %v7369_v23 = vadd.f32 %v13592_v44, %v7351_v43  ;;  %v7461_v6 = vrot.slane %v7459_v49, 1  ;;  %7746 = vmatpush1.bf16.msra.mxu0 %v11493_v30  ;;  %v8096_v9 = vrot.slane %v7463_v21, 1  ;;  %v8097_v39 = vrot.slane %v7459_v49, 2  ;;  %v11508_v43 = vld [vmem:[%s14063_s8 + $0x100] ss:$8 sps:$4 sm:$0xff]  }
 0x9cc   : >> { %7747 = vmatprep.subr.bf16.mxu0 %v11498_v60  ;;  %v7380_v16 = vmax.f32 %v7368_v32, 0.0  ;;  %v11516_v49 = vld [vmem:[%s14063_s8 + $0x124] ss:$8 sps:$4 sm:$0xff]  }
 0x9cd   : >> { %v7381_v35 = vmax.f32 %v7369_v23, 0.0  ;;  %v7462_v59 = vsel %vm1989_vm4, %v7457_v26, %v7461_v6  ;;  %v8098_v8 = vor.u32 %v8097_v39, %v8096_v9  ;;  %v7465_v56 = vor.u32 %v7463_v21, %v7461_v6  ;;  %v11514_v21 = vld [vmem:[%s14063_s8 + $0x120] ss:$8 sps:$4 sm:$0xff]   ;;  %v11517_v23 = vld [vmem:[%s14063_s8 + $0x130] ss:$8 sps:$4 sm:$0xff]  }
 0x9ce   : >> { %v7182_v40 = vpop.f32.mrb[156].mxu1  ;;  %v7335_v42 = vpop.f32.mrb[100].mxu0  ;;  %7621 = vmatmul.mubr.bf16.gmra.mrb[112].mxu0 %v7462_v59  ;;  %v11522_v26 = vld [vmem:[%s14063_s8 + $0x144] ss:$8 sps:$4 sm:$0xff]   ;;  %v11520_v6 = vld [vmem:[%s14063_s8 + $0x140] ss:$8 sps:$4 sm:$0xff]  }
 0x9cf   : >> { %v13662_v47 = vpack.c.bf16 %v7381_v35, %v7380_v16  ;;  %v7352_v22 = vmax.f32 %v7182_v40, %v7335_v42  ;;  %v7184_v19 = vpop.f32.mrb[157].mxu1  ;;  %v7337_v33 = vpop.f32.mrb[101].mxu0  ;;  %7630 = vmatprep.mubr.bf16.mxu0 %v11628_v17  ;;  %7748 = vmatpush1.bf16.msra.mxu0 %v11496_v36  ;;  %v13672_v20 = vsel %vm2586_vm6, %v8094_v27, %v8098_v8  ;;  %v11510_v27 = vld [vmem:[%s14063_s8 + $0x104] ss:$8 sps:$4 sm:$0xff]   ;;  %v11525_v36 = vld [vmem:[%s14063_s8 + $0x154] ss:$8 sps:$4 sm:$0xff]  }
 0x9d0   : >> { %v7185_v50 = vpop.f32.mrb[158].mxu1  ;;  %v7338_v61 = vpop.f32.mrb[102].mxu0  ;;  %7749 = vmatprep.subr.bf16.mxu0 %v11501_v58  ;;  %v11523_v9 = vld [vmem:[%s14063_s8 + $0x150] ss:$8 sps:$4 sm:$0xff]   ;;  %v11528_v58 = vld [vmem:[%s14063_s8 + $0x164] ss:$8 sps:$4 sm:$0xff]  }
 0x9d1   : >> { %v7370_v51 = vadd.f32 %v13592_v44, %v7352_v22  ;;  %v7353_v3 = vmax.f32 %v7185_v50, %v7338_v61  ;;  %v7187_v11 = vpop.f32.mrb[159].mxu1  ;;  %v7340_v2 = vpop.f32.mrb[103].mxu0  ;;  %v7467_v13 = vshll.u32 %v13662_v47, 16  ;;  %v7471_v31 = vshrl.u32 %v13662_v47, 16  ;;  %v11526_v39 = vld [vmem:[%s14063_s8 + $0x160] ss:$8 sps:$4 sm:$0xff]  }
 0x9d2   : >> { %v11531_v16 = vld [vmem:[%s14063_s8 + $0x174] ss:$8 sps:$4 sm:$0xff]   ;;  %v11529_v35 = vld [vmem:[%s14063_s8 + $0x170] ss:$8 sps:$4 sm:$0xff]   ;;  %v11534_v59 = vld [vmem:[%s14063_s8 + $0x184] ss:$8 sps:$4 sm:$0xff]  }
 0x9d3   : >> { %v7371_v34 = vadd.f32 %v13592_v44, %v7353_v3  ;;  %v7469_v54 = vrot.slane %v7467_v13, 1  ;;  %7750 = vmatpush1.bf16.msra.mxu0 %v11499_v55  ;;  %v8100_v0 = vrot.slane %v7471_v31, 1  ;;  %v8101_v37 = vrot.slane %v7467_v13, 2  ;;  %v7830_v42 = vld [vmem:[#allocation4] sm:$0xfe] }
 0x9d4   : >> { %7751 = vmatprep.subr.bf16.mxu0 %v11504_v46  ;;  %v7382_v15 = vmax.f32 %v7370_v51, 0.0  ;;  %v7854_v22 = vrot.slane %v13602_v63, 1  ;;  %v11532_v19 = vld [vmem:[%s14063_s8 + $0x180] ss:$8 sps:$4 sm:$0xff]   ;;  %v11537_v33 = vld [vmem:[%s14063_s8 + $0x194] ss:$8 sps:$4 sm:$0xff]  }
 0x9d5   : >> { %v7383_v52 = vmax.f32 %v7371_v34, 0.0  ;;  %v7470_v45 = vsel %vm1989_vm4, %v7465_v56, %v7469_v54  ;;  %v13685_v44 = vor.u32 %v8101_v37, %v8100_v0  ;;  %v7473_v30 = vor.u32 %v7471_v31, %v7469_v54  ;;  %v11535_v50 = vld [vmem:[%s14063_s8 + $0x190] ss:$8 sps:$4 sm:$0xff]   ;;  %v11540_v61 = vld [vmem:[%s14063_s8 + $0x1a4] ss:$8 sps:$4 sm:$0xff]  }
 0x9d6   : >> { %7631 = vmatmul.mubr.bf16.gmra.mrb[116].mxu0 %v7470_v45  ;;  %v7856_v46 = vrot.slane %v13618_v1, 1  ;;  %v11538_v51 = vld [vmem:[%s14063_s8 + $0x1a0] ss:$8 sps:$4 sm:$0xff]   ;;  %v11543_v3 = vld [vmem:[%s14063_s8 + $0x1b4] ss:$8 sps:$4 sm:$0xff]   ;;  %v7858_v31 = vrot.slane %v13638_v10, 1 }
 0x9d7   : >> { %v7389_v24 = vpack.c.bf16 %v7383_v52, %v7382_v15  ;;  %7640 = vmatprep.mubr.bf16.mxu0 %v11628_v17  ;;  %7752 = vmatpush1.bf16.msra.mxu0 %v11502_v38  ;;  %v13696_v18 = vsel %vm2586_vm6, %v8098_v8, %v13685_v44  ;;  %v7853_v8 = vrot.slane %v7830_v42, 1  ;;  %v11541_v2 = vld [vmem:[%s14063_s8 + $0x1b0] ss:$8 sps:$4 sm:$0xff]   ;;  %v11546_v13 = vld [vmem:[%s14063_s8 + $0x1c4] ss:$8 sps:$4 sm:$0xff]  }
 0x9d8   : >> { %7753 = vmatprep.subr.bf16.mxu0 %v11507_v28  ;;  %v7857_v11 = vsel %vm2382_vm5, %v7854_v22, %v7856_v46  ;;  %v11544_v34 = vld [vmem:[%s14063_s8 + $0x1c0] ss:$8 sps:$4 sm:$0xff]   ;;  %v11549_v56 = vld [vmem:[%s14063_s8 + $0x1d4] ss:$8 sps:$4 sm:$0xff]   ;;  %v7859_v54 = vsel %vm2382_vm5, %v7856_v46, %v7858_v31  ;;  %v11547_v38 = vld [vmem:[%s14063_s8 + $0x1d0] ss:$8 sps:$4 sm:$0xff]  }
 0x9d9   : >> { %7395 = vst [vmem:[#allocation4 + $0x28] sm:$0xff] %v7389_v24  ;;  %v7855_v55 = vsel %vm2382_vm5, %v7853_v8, %v7854_v22  ;;  %v11552_v0 = vld [vmem:[%s14063_s8 + $0x1e4] ss:$8 sps:$4 sm:$0xff]   ;;  %v7860_v28 = vrot.slane %v13662_v47, 1  ;;  %v11550_v37 = vld [vmem:[%s14063_s8 + $0x1e0] ss:$8 sps:$4 sm:$0xff]  }
 0x9da   : >> { %v11555_v15 = vld [vmem:[%s14063_s8 + $0x1f4] ss:$8 sps:$4 sm:$0xff]   ;;  %v11553_v45 = vld [vmem:[%s14063_s8 + $0x1f0] ss:$8 sps:$4 sm:$0xff]   ;;  %v11558_v24 = vld [vmem:[%s14063_s8 + $0x204] ss:$8 sps:$4 sm:$0xff]  }
 0x9db   : >> { %7754 = vmatpush1.bf16.msra.mxu0 %v11505_v25  ;;  %v7861_v52 = vsel %vm2382_vm5, %v7858_v31, %v7860_v28  ;;  %v8312_v8 = vld [vmem:[#allocation4] sm:$0xfc]  ;;  %v8332_v22 = vrot.slane %v13602_v63, 2 }
 0x9dc   : >> { %7950 = vmatprep.subr.bf16.mxu0 %v11510_v27 }
 0x9e0   : >> { %v13698_v12 = vld [vmem:[#allocation4 + $0x28] sm:$0xf] }
 0x9e1   : >> { %v7475_v53 = vshll.u32 %v13698_v12, 16  ;;  %v7479_v60 = vshrl.u32 %v13698_v12, 16  ;;  %v7401_v40 = vld [vmem:[#allocation4 + $0x28] sm:$0x7]  ;;  %v7862_v25 = vrot.slane %v13698_v12, 1 }
 0x9e2   : >> { %v11561_v12 = vld [vmem:[%s14063_s8 + $0x214] ss:$8 sps:$4 sm:$0xff]  }
 0x9e3   : >> { %v7477_v14 = vrot.slane %v7475_v53, 1  ;;  %v7863_v27 = vsel %vm2382_vm5, %v7860_v28, %v7862_v25  ;;  %v8081_v53 = vshrl.u32 %v7830_v42, 16 }
 0x9e5   : >> { %v7478_v41 = vsel %vm1989_vm4, %v7473_v30, %v7477_v14  ;;  %v7481_v32 = vor.u32 %v7479_v60, %v7477_v14  ;;  %v8084_v30 = vshll.u32 %v7830_v42, 16  ;;  %v8083_v14 = vrot.slane %v8081_v53, 1 }
 0x9e6   : >> { %7641 = vmatmul.mubr.bf16.gmra.mrb[120].mxu0 %v7478_v41 }
 0x9e7   : >> { %7650 = vmatprep.mubr.bf16.mxu0 %v11628_v17  ;;  %v8086_v41 = vrot.slane %v8084_v30, 2 }
 0x9e9   : >> { %v8087_v60 = vor.u32 %v8086_v41, %v8083_v14 }
 0x9ee   : >> { %7651 = vmatmul.mubr.bf16.gmra.mrb[124].mxu0 %v7481_v32  ;;  %v11556_v32 = vld [vmem:[%s14063_s8 + $0x200] ss:$8 sps:$4 sm:$0xff]  }
 0x9ef   : >> { %7771 = vmatprep.mubr.bf16.mxu0 %v11628_v17 }
 0x9f6   : >> { %7772 = vmatmul.mubr.bf16.vlgmr.msra.gmra.mrb[104].mxu0 %v13596_v29  ;;  %v11519_v29 = vld [vmem:[%s14063_s8 + $0x134] ss:$8 sps:$4 sm:$0xff]  }
 0x9f7   : >> { %7781 = vmatprep.mubr.bf16.mxu0 %v11628_v17  ;;  %7951 = vmatpush1.bf16.msra.mxu0 %v11508_v43  ;;  %v8091_v43 = vsel %vm2586_vm6, %v8087_v60, %v13616_v7  ;;  %v11567_v7 = vld [vmem:[%s14063_s8 + $0x234] ss:$8 sps:$4 sm:$0xff]  }
 0x9f8   : >> { %7952 = vmatprep.subr.bf16.mxu0 %v11513_v48  ;;  %v11559_v48 = vld [vmem:[%s14063_s8 + $0x210] ss:$8 sps:$4 sm:$0xff]  }
 0x9fb   : >> { %7953 = vmatpush1.bf16.msra.mxu0 %v11511_v57  ;;  %v11564_v57 = vld [vmem:[%s14063_s8 + $0x224] ss:$8 sps:$4 sm:$0xff]  }
 0x9fc   : >> { %7954 = vmatprep.subr.bf16.mxu0 %v11516_v49  ;;  %v11562_v49 = vld [vmem:[%s14063_s8 + $0x220] ss:$8 sps:$4 sm:$0xff]  }
 0x9fe   : >> { %7782 = vmatmul.mubr.bf16.gmra.mrb[108].mxu0 %v13602_v63  ;;  %v8338_v63 = vrot.slane %v13662_v47, 2 }
 0x9ff   : >> { %7791 = vmatprep.mubr.bf16.mxu0 %v11628_v17  ;;  %7955 = vmatpush1.bf16.msra.mxu0 %v11514_v21  ;;  %v11565_v21 = vld [vmem:[%s14063_s8 + $0x230] ss:$8 sps:$4 sm:$0xff]  }
 0xa00   : >> { %7956 = vmatprep.subr.bf16.mxu0 %v11519_v29  ;;  %v11570_v29 = vld [vmem:[%s14063_s8 + $0x244] ss:$8 sps:$4 sm:$0xff]  }
 0xa03   : >> { %7957 = vmatpush1.bf16.msra.mxu0 %v11517_v23  ;;  %v11568_v23 = vld [vmem:[%s14063_s8 + $0x240] ss:$8 sps:$4 sm:$0xff]  }
 0xa04   : >> { %7958 = vmatprep.subr.bf16.mxu0 %v11522_v26  ;;  %v8063_v26 = vld [vmem:[#allocation4 + $0x28] sm:$0x1f] }
 0xa06   : >> { %7792 = vmatmul.mubr.bf16.gmra.mrb[112].mxu0 %v13618_v1 }
 0xa07   : >> { %7801 = vmatprep.mubr.bf16.mxu0 %v11628_v17  ;;  %7959 = vmatpush1.bf16.msra.mxu0 %v11520_v6  ;;  %v11571_v6 = vld [vmem:[%s14063_s8 + $0x250] ss:$8 sps:$4 sm:$0xff]  }
 0xa08   : >> { %7960 = vmatprep.subr.bf16.mxu0 %v11525_v36  ;;  %v11576_v36 = vld [vmem:[%s14063_s8 + $0x264] ss:$8 sps:$4 sm:$0xff]  }
 0xa0b   : >> { %7961 = vmatpush1.bf16.msra.mxu0 %v11523_v9  ;;  %v8105_v9 = vshrl.u32 %v8063_v26, 16 }
 0xa0c   : >> { %7962 = vmatprep.subr.bf16.mxu0 %v11528_v58  ;;  %v8108_v58 = vshll.u32 %v8063_v26, 16 }
 0xa0e   : >> { %7802 = vmatmul.mubr.bf16.gmra.mrb[116].mxu0 %v13638_v10 }
 0xa0f   : >> { %7811 = vmatprep.mubr.bf16.mxu0 %v11628_v17  ;;  %7963 = vmatpush1.bf16.msra.mxu0 %v11526_v39  ;;  %v11579_v39 = vld [vmem:[%s14063_s8 + $0x274] ss:$8 sps:$4 sm:$0xff]  }
 0xa10   : >> { %7964 = vmatprep.subr.bf16.mxu0 %v11531_v16  ;;  %v8107_v16 = vrot.slane %v8105_v9, 1  ;;  %v11583_v9 = vld [vmem:[%s14070_s15] sm:$0xff]  }
 0xa13   : >> { %7965 = vmatpush1.bf16.msra.mxu0 %v11529_v35  ;;  %v8110_v35 = vrot.slane %v8108_v58, 2  ;;  %v11584_v58 = vld [vmem:[%s14070_s15 + $0x8] sm:$0xff]  }
 0xa14   : >> { %8199 = vmatprep.subr.bf16.mxu0 %v11534_v59  ;;  %v11577_v59 = vld [vmem:[%s14063_s8 + $0x270] ss:$8 sps:$4 sm:$0xff]  }
 0xa16   : >> { %7812 = vmatmul.mubr.bf16.gmra.mrb[120].mxu0 %v13662_v47 }
 0xa17   : >> { %7821 = vmatprep.mubr.bf16.mxu0 %v11628_v17 }
 0xa1e   : >> { %7822 = vmatmul.mubr.bf16.gmra.mrb[124].mxu0 %v7401_v40  ;;  %v8111_v40 = vor.u32 %v8110_v35, %v8107_v16 }
 0xa1f   : >> { %7982 = vmatprep.mubr.bf16.mxu0 %v11628_v17 }
 0xa20   : >> { %v8112_v42 = vsel %vm2586_vm6, %v13685_v44, %v8111_v40  ;;  %v8336_v44 = vrot.slane %v13638_v10, 2 }
 0xa26   : >> { %7983 = vmatmul.mubr.bf16.vlgmr.msra.gmra.mrb[104].mxu0 %v7855_v55 }
 0xa27   : >> { %7992 = vmatprep.mubr.bf16.mxu0 %v11628_v17  ;;  %8200 = vmatpush1.bf16.msra.mxu0 %v11532_v19 }
 0xa28   : >> { %8201 = vmatprep.subr.bf16.mxu0 %v11537_v33  ;;  %v8334_v33 = vrot.slane %v13618_v1, 2  ;;  %v8340_v1 = vrot.slane %v8063_v26, 2  ;;  %v11580_v26 = vld [vmem:[%s14069_s14] sm:$0xff]  }
 0xa2a   : >> { %v8335_v55 = vsel %vm2820_vm7, %v8332_v22, %v8334_v33  ;;  %v8341_v46 = vsel %vm2820_vm7, %v8338_v63, %v8340_v1 }
 0xa2b   : >> { %8202 = vmatpush1.bf16.msra.mxu0 %v11535_v50  ;;  %v8337_v50 = vsel %vm2820_vm7, %v8334_v33, %v8336_v44 }
 0xa2c   : >> { %8203 = vmatprep.subr.bf16.mxu0 %v11540_v61  ;;  %v8339_v61 = vsel %vm2820_vm7, %v8336_v44, %v8338_v63  ;;  %v8553_v63 = vld [vmem:[%s14064_s9] sm:$0x3] }
 0xa2e   : >> { %7993 = vmatmul.mubr.bf16.gmra.mrb[108].mxu0 %v7857_v11 }
 0xa2f   : >> { %8002 = vmatprep.mubr.bf16.mxu0 %v11628_v17  ;;  %8204 = vmatpush1.bf16.msra.mxu0 %v11538_v51 }
 0xa30   : >> { %8205 = vmatprep.subr.bf16.mxu0 %v11543_v3 }
 0xa33   : >> { %8206 = vmatpush1.bf16.msra.mxu0 %v11541_v2 }
 0xa34   : >> { %8207 = vmatprep.subr.bf16.mxu0 %v11546_v13 }
 0xa36   : >> { %8003 = vmatmul.mubr.bf16.gmra.mrb[112].mxu0 %v7859_v54 }
 0xa37   : >> { %8012 = vmatprep.mubr.bf16.mxu0 %v11628_v17  ;;  %8208 = vmatpush1.bf16.msra.mxu0 %v11544_v34 }
 0xa38   : >> { %8209 = vmatprep.subr.bf16.mxu0 %v11549_v56 }
 0xa3b   : >> { %8210 = vmatpush1.bf16.msra.mxu0 %v11547_v38 }
 0xa3c   : >> { %8211 = vmatprep.subr.bf16.mxu0 %v11552_v0 }
 0xa3e   : >> { %8013 = vmatmul.mubr.bf16.gmra.mrb[116].mxu0 %v7861_v52 }
 0xa3f   : >> { %8022 = vmatprep.mubr.bf16.mxu0 %v11628_v17  ;;  %8212 = vmatpush1.bf16.msra.mxu0 %v11550_v37 }
 0xa40   : >> { %8213 = vmatprep.subr.bf16.mxu0 %v11555_v15 }
 0xa43   : >> { %8214 = vmatpush1.bf16.msra.mxu0 %v11553_v45 }
 0xa44   : >> { %8428 = vmatprep.subr.bf16.mxu0 %v11558_v24 }
 0xa46   : >> { %8023 = vmatmul.mubr.bf16.gmra.mrb[120].mxu0 %v7863_v27 }
 0xa47   : >> { %8032 = vmatprep.mubr.bf16.mxu0 %v11628_v17 }
 0xa4e   : >> { %8033 = vmatmul.mubr.bf16.gmra.mrb[124].mxu0 %v7862_v25 }
 0xa4f   : >> { %8231 = vmatprep.mubr.bf16.mxu0 %v11628_v17 }
 0xa56   : >> { %8232 = vmatmul.mubr.bf16.vlgmr.msra.gmra.mrb[104].mxu0 %v8091_v43 }
 0xa57   : >> { %8241 = vmatprep.mubr.bf16.mxu0 %v11628_v17  ;;  %8429 = vmatpush1.bf16.msra.mxu0 %v11556_v32 }
 0xa58   : >> { %8430 = vmatprep.subr.bf16.mxu0 %v11561_v12 }
 0xa5b   : >> { %8431 = vmatpush1.bf16.msra.mxu0 %v11559_v48 }
 0xa5c   : >> { %8432 = vmatprep.subr.bf16.mxu0 %v11564_v57 }
 0xa5e   : >> { %8242 = vmatmul.mubr.bf16.gmra.mrb[108].mxu0 %v13649_v62  ;;  %v11573_v62 = vld [vmem:[%s14063_s8 + $0x254] ss:$8 sps:$4 sm:$0xff]  }
 0xa5f   : >> { %8251 = vmatprep.mubr.bf16.mxu0 %v11628_v17  ;;  %8433 = vmatpush1.bf16.msra.mxu0 %v11562_v49 }
 0xa60   : >> { %8434 = vmatprep.subr.bf16.mxu0 %v11567_v7 }
 0xa63   : >> { %8435 = vmatpush1.bf16.msra.mxu0 %v11565_v21 }
 0xa64   : >> { %8436 = vmatprep.subr.bf16.mxu0 %v11570_v29 }
 0xa66   : >> { %8252 = vmatmul.mubr.bf16.gmra.mrb[112].mxu0 %v13672_v20  ;;  %v11574_v20 = vld [vmem:[%s14063_s8 + $0x260] ss:$8 sps:$4 sm:$0xff]  }
 0xa67   : >> { %8261 = vmatprep.mubr.bf16.mxu0 %v11628_v17  ;;  %8437 = vmatpush1.bf16.msra.mxu0 %v11568_v23 }
 0xa68   : >> { %8438 = vmatprep.subr.bf16.mxu0 %v11573_v62 }
 0xa6b   : >> { %8439 = vmatpush1.bf16.msra.mxu0 %v11571_v6  ;;  %v11581_v6 = vld [vmem:[%s14069_s14 + $0x8] sm:$0xff]  }
 0xa6c   : >> { %8440 = vmatprep.subr.bf16.mxu0 %v11576_v36  ;;  %v11582_v36 = vld [vmem:[%s14069_s14 + $0x10] sm:$0xff]  }
 0xa6e   : >> { %8262 = vmatmul.mubr.bf16.gmra.mrb[116].mxu0 %v13696_v18  ;;  %v8331_v18 = vrot.slane %v8312_v8, 2 }
 0xa6f   : >> { %8271 = vmatprep.mubr.bf16.mxu0 %v11628_v17  ;;  %8441 = vmatpush1.bf16.msra.mxu0 %v11574_v20  ;;  %v11585_v20 = vld [vmem:[%s14070_s15 + $0x10] sm:$0xff]  }
 0xa70   : >> { %8442 = vmatprep.subr.bf16.mxu0 %v11579_v39  ;;  %v8333_v19 = vsel %vm2820_vm7, %v8331_v18, %v8332_v22  ;;  %v14114_v22 = vlaneseq }
 0xa73   : >> { %8443 = vmatpush1.bf16.msra.mxu0 %v11577_v59 }
 0xa76   : >> { %8272 = vmatmul.mubr.bf16.gmra.mrb[120].mxu0 %v8112_v42 }
 0xa77   : >> { %8281 = vmatprep.mubr.bf16.mxu0 %v11628_v17 }
 0xa7e   : >> { %8282 = vmatmul.mubr.bf16.gmra.mrb[124].mxu0 %v8111_v40 }
 0xa7f   : >> { %8460 = vmatprep.mubr.bf16.mxu0 %v11628_v17 }
 0xa86   : >> { %8461 = vmatmul.mubr.bf16.vlgmr.msra.gmra.mrb[104].mxu0 %v8333_v19  ;;  %v8762_v19 = vshrl.u32 %v14114_v22, 7  ;;  %v8846_v22 = vld [vmem:[%s14072_s17 + $0x28] sm:$0xff] }
 0xa87   : >> { %8470 = vmatprep.mubr.bf16.mxu0 %v11628_v17 }
 0xa8e   : >> { %8471 = vmatmul.mubr.bf16.gmra.mrb[108].mxu0 %v8335_v55 }
 0xa8f   : >> { %8480 = vmatprep.mubr.bf16.mxu0 %v11628_v17 }
 0xa96   : >> { %8481 = vmatmul.mubr.bf16.gmra.mrb[112].mxu0 %v8337_v50  ;;  %v8763_v50 = vsub.s32 0, %v8762_v19 }
 0xa97   : >> { %8490 = vmatprep.mubr.bf16.mxu0 %v11628_v17 }
 0xa9e   : >> { %8491 = vmatmul.mubr.bf16.gmra.mrb[116].mxu0 %v8339_v61  ;;  %v8767_v61 = vsub.s32 1, %v8762_v19 }
 0xa9f   : >> { %8500 = vmatprep.mubr.bf16.mxu0 %v11628_v17 }
 0xaa6   : >> { %8501 = vmatmul.mubr.bf16.gmra.mrb[120].mxu0 %v8341_v46 }
 0xaa7   : >> { %8510 = vmatprep.mubr.bf16.mxu0 %v11628_v17 }
 0xaae   : >> { %8511 = vmatmul.mubr.bf16.gmra.mrb[124].mxu0 %v8340_v1  ;;  %v13948_v1 = vrot.slane %v8553_v63, %v8763_v50 }
 0xb59   : >> { %v8462_v10 = vpop.f32.mrb[104].mxu0 }
 0xb5a   : >> { %v8464_v51 = vpop.f32.mrb[105].mxu0 }
 0xb5b   : >> { %v8466_v3 = vpop.f32.mrb[106].mxu0 }
 0xb5c   : >> { %v8554_v11 = vpack.c.bf16 %v8466_v3, %v8462_v10  ;;  %v8468_v2 = vpop.f32.mrb[107].mxu0  ;;  %v13950_v10 = vrot.slane %v8553_v63, %v8767_v61  ;;  %v8801_v63 = vld [vmem:[%s14071_s16 + $0x30] sm:$0xff] }
 0xb5d   : >> { %v8555_v13 = vpack.c.bf16 %v8468_v2, %v8464_v51 }
 0xb5f   : >> { %8598 = vmatprep.subr.bf16.mxu1 %v8555_v13 }
 0xb60   : >> { %8599 = vmatpush1.bf16.msra.mxu1 %v8554_v11 }
 0xb61   : >> { %v8472_v47 = vpop.f32.mrb[108].mxu0 }
 0xb62   : >> { %v8474_v31 = vpop.f32.mrb[109].mxu0 }
 0xb63   : >> { %v8476_v34 = vpop.f32.mrb[110].mxu0 }
 0xb64   : >> { %v8556_v56 = vpack.c.bf16 %v8476_v34, %v8472_v47  ;;  %v8478_v54 = vpop.f32.mrb[111].mxu0 }
 0xb65   : >> { %v8557_v38 = vpack.c.bf16 %v8478_v54, %v8474_v31 }
 0xb67   : >> { %8600 = vmatprep.subr.bf16.mxu1 %v8557_v38 }
 0xb68   : >> { %8601 = vmatpush1.bf16.msra.mxu1 %v8556_v56 }
 0xb69   : >> { %v8482_v0 = vpop.f32.mrb[112].mxu0 }
 0xb6a   : >> { %v8484_v28 = vpop.f32.mrb[113].mxu0 }
 0xb6b   : >> { %v8486_v37 = vpop.f32.mrb[114].mxu0 }
 0xb6c   : >> { %v8558_v15 = vpack.c.bf16 %v8486_v37, %v8482_v0  ;;  %v8488_v52 = vpop.f32.mrb[115].mxu0  ;;  %v8841_v0 = vld [vmem:[%s14072_s17] sm:$0xff] }
 0xb6d   : >> { %v8559_v45 = vpack.c.bf16 %v8488_v52, %v8484_v28  ;;  %v8797_v52 = vld [vmem:[%s14071_s16 + $0x10] sm:$0xff] }
 0xb6f   : >> { %8602 = vmatprep.subr.bf16.mxu1 %v8559_v45 }
 0xb70   : >> { %8603 = vmatpush1.bf16.msra.mxu1 %v8558_v15 }
 0xb71   : >> { %v8492_v24 = vpop.f32.mrb[116].mxu0 }
 0xb72   : >> { %v8494_v25 = vpop.f32.mrb[117].mxu0 }
 0xb73   : >> { %v8496_v27 = vpop.f32.mrb[118].mxu0 }
 0xb74   : >> { %v8560_v53 = vpack.c.bf16 %v8496_v27, %v8492_v24  ;;  %v8498_v30 = vpop.f32.mrb[119].mxu0 }
 0xb75   : >> { %v8561_v14 = vpack.c.bf16 %v8498_v30, %v8494_v25  ;;  %v8842_v25 = vld [vmem:[%s14072_s17 + $0x8] sm:$0xff]  ;;  %v8844_v30 = vld [vmem:[%s14072_s17 + $0x18] sm:$0xff] }
 0xb77   : >> { %8604 = vmatprep.subr.bf16.mxu1 %v8561_v14 }
 0xb78   : >> { %8605 = vmatpush1.bf16.msra.mxu1 %v8560_v53 }
 0xb79   : >> { %v8502_v41 = vpop.f32.mrb[120].mxu0 }
 0xb7a   : >> { %v8504_v60 = vpop.f32.mrb[121].mxu0 }
 0xb7b   : >> { %v8506_v32 = vpop.f32.mrb[122].mxu0 }
 0xb7c   : >> { %v8562_v12 = vpack.c.bf16 %v8506_v32, %v8502_v41  ;;  %v8508_v43 = vpop.f32.mrb[123].mxu0 }
 0xb7d   : >> { %v8563_v48 = vpack.c.bf16 %v8508_v43, %v8504_v60 }
 0xb7f   : >> { %8606 = vmatprep.subr.bf16.mxu1 %v8563_v48 }
 0xb80   : >> { %8607 = vmatpush1.bf16.msra.mxu1 %v8562_v12 }
 0xb81   : >> { %v8512_v57 = vpop.f32.mrb[124].mxu0 }
 0xb82   : >> { %v8564_v49 = vpack.c.bf16 %v8512_v57, %v8512_v57  ;;  %v8514_v7 = vpop.f32.mrb[125].mxu0 }
 0xb83   : >> { %v8565_v21 = vpack.c.bf16 %v8514_v7, %v8514_v7  ;;  %v8516_v29 = vpop.f32.mrb[126].mxu0 }
 0xb84   : >> { %v8593_v23 = vsel %vm8591_vm10, %v8564_v49, 0  ;;  %v8517_v62 = vpop.f32.mrb[127].mxu0 }
 0xb85   : >> { %9386 = vmatprep.subr.msk.bf16.mxu1 %vm8591_vm10, %v8565_v21 }
 0xb86   : >> { %8609 = vmatpush1.bf16.msra.mxu1 %v8593_v23 }
 0xb87   : >> { %8685 = vmatprep.subr.bf16.mxu1 %v8555_v13 }
 0xb89   : >> { %9387 = vmatmul.mubr.msk.bf16.vlgmr.msra.gmra.mrb[160].mxu1 %vm8581_vm11, %v11580_v26 }
 0xb8a   : >> { %8686 = vmatpush1.bf16.msra.mxu1 %v8554_v11  ;;  %8640 = vmatprep.mubr.bf16.mxu1 %v11628_v17 }
 0xb8b   : >> { %8687 = vmatprep.subr.bf16.mxu1 %v8557_v38  ;;  %v8795_v38 = vld [vmem:[%s14071_s16] sm:$0xff] }
 0xb8e   : >> { %8688 = vmatpush1.bf16.msra.mxu1 %v8556_v56 }
 0xb8f   : >> { %8689 = vmatprep.subr.bf16.mxu1 %v8559_v45  ;;  %v8843_v45 = vld [vmem:[%s14072_s17 + $0x10] sm:$0xff] }
 0xb91   : >> { %9388 = vmatmul.mubr.msk.bf16.gmra.mrb[164].mxu1 %vm8581_vm11, %v11581_v6 }
 0xb92   : >> { %8690 = vmatpush1.bf16.msra.mxu1 %v8558_v15  ;;  %8650 = vmatprep.mubr.bf16.mxu1 %v11628_v17  ;;  %v8796_v15 = vld [vmem:[%s14071_s16 + $0x8] sm:$0xff] }
 0xb93   : >> { %8691 = vmatprep.subr.bf16.mxu1 %v8561_v14 }
 0xb96   : >> { %8692 = vmatpush1.bf16.msra.mxu1 %v8560_v53  ;;  %v8798_v53 = vld [vmem:[%s14071_s16 + $0x18] sm:$0xff] }
 0xb97   : >> { %8693 = vmatprep.subr.bf16.mxu1 %v8563_v48 }
 0xb99   : >> { %9389 = vmatmul.mubr.msk.bf16.gmra.mrb[168].mxu1 %vm8581_vm11, %v11582_v36 }
 0xb9a   : >> { %8694 = vmatpush1.bf16.msra.mxu1 %v8562_v12  ;;  %8717 = vmatprep.mubr.bf16.mxu1 %v11628_v17 }
 0xb9b   : >> { %9393 = vmatprep.subr.msk.bf16.mxu1 %vm8591_vm10, %v8565_v21 }
 0xb9e   : >> { %8696 = vmatpush1.bf16.msra.mxu1 %v8593_v23 }
 0xba1   : >> { %9394 = vmatmul.mubr.msk.bf16.vlgmr.msra.gmra.mrb[172].mxu1 %vm8581_vm11, %v11583_v9 }
 0xba2   : >> { %8727 = vmatprep.mubr.bf16.mxu1 %v11628_v17 }
 0xba9   : >> { %9395 = vmatmul.mubr.msk.bf16.gmra.mrb[176].mxu1 %vm8581_vm11, %v11584_v58 }
 0xbaa   : >> { %8737 = vmatprep.mubr.bf16.mxu1 %v11628_v17 }
 0xbb1   : >> { %9396 = vmatmul.mubr.msk.bf16.gmra.mrb[180].mxu1 %vm8581_vm11, %v11585_v20 }
 0xc5c   : >> { %v8632_v39 = vpop.f32.mrb[160].mxu1 }
 0xc5d   : >> { %v8634_v16 = vpop.f32.mrb[161].mxu1 }
 0xc5e   : >> { %v8636_v35 = vpop.f32.mrb[162].mxu1 }
 0xc5f   : >> { %v8638_v59 = vpop.f32.mrb[163].mxu1 }
 0xc64   : >> { %v8642_v40 = vpop.f32.mrb[164].mxu1 }
 0xc65   : >> { %v8644_v42 = vpop.f32.mrb[165].mxu1 }
 0xc66   : >> { %v13932_v8 = vpop.f32.mrb[166].mxu1 }
 0xc67   : >> { %v13934_v18 = vpop.f32.mrb[167].mxu1 }
 0xc6c   : >> { %v13937_v33 = vpop.f32.mrb[168].mxu1 }
 0xc6d   : >> { %v13939_v17 = vpop.f32.mrb[169].mxu1 }
 0xc6e   : >> { %v13941_v55 = vpop.f32.mrb[170].mxu1 }
 0xc6f   : >> { %v13943_v44 = vpop.f32.mrb[171].mxu1 }
 0xc74   : >> { %v8719_v46 = vpop.f32.mrb[172].mxu1 }
 0xc75   : >> { %v8748_v51 = vmax.f32 %v8632_v39, %v8719_v46  ;;  %v8721_v3 = vpop.f32.mrb[173].mxu1 }
 0xc76   : >> { %v8749_v11 = vmax.f32 %v8634_v16, %v8721_v3  ;;  %v8723_v2 = vpop.f32.mrb[174].mxu1  ;;  %v8799_v16 = vld [vmem:[%s14071_s16 + $0x20] sm:$0xff] }
 0xc77   : >> { %v8771_v13 = vadd.f32 %v13948_v1, %v8748_v51  ;;  %v8750_v47 = vmax.f32 %v8636_v35, %v8723_v2  ;;  %v8725_v31 = vpop.f32.mrb[175].mxu1  ;;  %v8845_v35 = vld [vmem:[%s14072_s17 + $0x20] sm:$0xff]  ;;  %v8848_v2 = vld [vmem:[%s14072_s17 + $0x38] sm:$0xff] }
 0xc78   : >> { %v8772_v34 = vadd.f32 %v13950_v10, %v8749_v11  ;;  %v8751_v56 = vmax.f32 %v8638_v59, %v8725_v31  ;;  %v8802_v11 = vld [vmem:[%s14071_s16 + $0x38] sm:$0xff] }
 0xc79   : >> { %v8783_v54 = vmax.f32 %v8771_v13, 0.0  ;;  %v8773_v28 = vadd.f32 %v13948_v1, %v8750_v47 }
 0xc7a   : >> { %v8784_v37 = vmax.f32 %v8772_v34, 0.0  ;;  %v8774_v24 = vadd.f32 %v13950_v10, %v8751_v56 }
 0xc7b   : >> { %v8785_v27 = vmax.f32 %v8773_v28, 0.0  ;;  %v8807_v14 = vmul.f32 %v8795_v38, %v8783_v54  ;;  %v8853_v41 = vmul.f32 %v8841_v0, %v8783_v54 }
 0xc7c   : >> { %v8786_v60 = vmax.f32 %v8774_v24, 0.0  ;;  %v8729_v32 = vpop.f32.mrb[176].mxu1  ;;  %v8808_v12 = vmul.f32 %v8796_v15, %v8784_v37  ;;  %v8854_v7 = vmul.f32 %v8842_v25, %v8784_v37 }
 0xc7d   : >> { %v8809_v43 = vmul.f32 %v8797_v52, %v8785_v27  ;;  %v8855_v48 = vmul.f32 %v8843_v45, %v8785_v27  ;;  %v8752_v57 = vmax.f32 %v8642_v40, %v8729_v32  ;;  %v8731_v49 = vpop.f32.mrb[177].mxu1 }
 0xc7e   : >> { %v8810_v21 = vmul.f32 %v8798_v53, %v8786_v60  ;;  %v8856_v29 = vmul.f32 %v8844_v30, %v8786_v60  ;;  %v8753_v23 = vmax.f32 %v8644_v42, %v8731_v49  ;;  %v8733_v62 = vpop.f32.mrb[178].mxu1  ;;  %v8805_v49 = vld [vmem:[%s14071_s16 + $0x50] sm:$0xff] }
 0xc7f   : >> { %v8819_v26 = vadd.f32 %v8809_v43, %v8807_v14  ;;  %v8865_v6 = vadd.f32 %v8855_v48, %v8853_v41  ;;  %v8775_v36 = vadd.f32 %v13948_v1, %v8752_v57  ;;  %v8754_v9 = vmax.f32 %v13932_v8, %v8733_v62  ;;  %v8735_v58 = vpop.f32.mrb[179].mxu1  ;;  %v8800_v8 = vld [vmem:[%s14071_s16 + $0x28] sm:$0xff]  ;;  %v8803_v48 = vld [vmem:[%s14071_s16 + $0x40] sm:$0xff]  ;;  %v8806_v62 = vld [vmem:[%s14071_s16 + $0x58] sm:$0xff] }
 0xc80   : >> { %v8830_v20 = vadd.f32 %v8810_v21, %v8808_v12  ;;  %v8876_v39 = vadd.f32 %v8856_v29, %v8854_v7  ;;  %v8776_v59 = vadd.f32 %v13950_v10, %v8753_v23  ;;  %v8755_v40 = vmax.f32 %v13934_v18, %v8735_v58  ;;  %v8847_v18 = vld [vmem:[%s14072_s17 + $0x30] sm:$0xff]  ;;  %v8849_v57 = vld [vmem:[%s14072_s17 + $0x40] sm:$0xff] }
 0xc81   : >> { %v8787_v42 = vmax.f32 %v8775_v36, 0.0  ;;  %v8777_v19 = vadd.f32 %v13948_v1, %v8754_v9  ;;  %v8851_v23 = vld [vmem:[%s14072_s17 + $0x50] sm:$0xff] }
 0xc82   : >> { %v8788_v50 = vmax.f32 %v8776_v59, 0.0  ;;  %v8778_v61 = vadd.f32 %v13950_v10, %v8755_v40 }
 0xc83   : >> { %v8811_v46 = vmul.f32 %v8799_v16, %v8787_v42  ;;  %v8857_v51 = vmul.f32 %v8845_v35, %v8787_v42  ;;  %v8789_v3 = vmax.f32 %v8777_v19, 0.0 }
 0xc84   : >> { %v8812_v13 = vmul.f32 %v8800_v8, %v8788_v50  ;;  %v8858_v47 = vmul.f32 %v8846_v22, %v8788_v50  ;;  %v8790_v31 = vmax.f32 %v8778_v61, 0.0  ;;  %v8739_v34 = vpop.f32.mrb[180].mxu1 }
 0xc85   : >> { %v8820_v56 = vadd.f32 %v8819_v26, %v8811_v46  ;;  %v8866_v54 = vadd.f32 %v8865_v6, %v8857_v51  ;;  %v8813_v38 = vmul.f32 %v8801_v63, %v8789_v3  ;;  %v8859_v0 = vmul.f32 %v8847_v18, %v8789_v3  ;;  %v8741_v28 = vpop.f32.mrb[181].mxu1 }
 0xc86   : >> { %v8831_v37 = vadd.f32 %v8830_v20, %v8812_v13  ;;  %v8877_v15 = vadd.f32 %v8876_v39, %v8858_v47  ;;  %v8814_v52 = vmul.f32 %v8802_v11, %v8790_v31  ;;  %v8860_v45 = vmul.f32 %v8848_v2, %v8790_v31  ;;  %v8743_v24 = vpop.f32.mrb[182].mxu1 }
 0xc87   : >> { %v8821_v25 = vadd.f32 %v8820_v56, %v8813_v38  ;;  %v8867_v27 = vadd.f32 %v8866_v54, %v8859_v0  ;;  %v8756_v53 = vmax.f32 %v13937_v33, %v8739_v34  ;;  %v8757_v30 = vmax.f32 %v13939_v17, %v8741_v28  ;;  %v8745_v14 = vpop.f32.mrb[183].mxu1  ;;  %v8804_v17 = vld [vmem:[%s14071_s16 + $0x48] sm:$0xff] }
 0xc88   : >> { %v8832_v41 = vadd.f32 %v8831_v37, %v8814_v52  ;;  %v8878_v60 = vadd.f32 %v8877_v15, %v8860_v45  ;;  %v8758_v32 = vmax.f32 %v13941_v55, %v8743_v24  ;;  %v8759_v12 = vmax.f32 %v13943_v44, %v8745_v14  ;;  %v8850_v55 = vld [vmem:[%s14072_s17 + $0x48] sm:$0xff] }
 0xc89   : >> { %v8779_v43 = vadd.f32 %v13948_v1, %v8756_v53  ;;  %v8780_v33 = vadd.f32 %v13950_v10, %v8757_v30 }
 0xc8a   : >> { %v8781_v44 = vadd.f32 %v13948_v1, %v8758_v32  ;;  %v8782_v7 = vadd.f32 %v13950_v10, %v8759_v12  ;;  %v8852_v1 = vld [vmem:[%s14072_s17 + $0x58] sm:$0xff] }
 0xc8b   : >> { %v8791_v21 = vmax.f32 %v8779_v43, 0.0  ;;  %v8792_v29 = vmax.f32 %v8780_v33, 0.0  ;;  %v8896_v43 = vld [vmem:[%s14073_s18] sm:$0x1] }
 0xc8c   : >> { %v8793_v26 = vmax.f32 %v8781_v44, 0.0  ;;  %v8794_v6 = vmax.f32 %v8782_v7, 0.0 }
 0xc8d   : >> { %v8815_v36 = vmul.f32 %v8803_v48, %v8791_v21  ;;  %v8861_v9 = vmul.f32 %v8849_v57, %v8791_v21  ;;  %v8816_v58 = vmul.f32 %v8804_v17, %v8792_v29  ;;  %v8862_v10 = vmul.f32 %v8850_v55, %v8792_v29 }
 0xc8e   : >> { %v8817_v20 = vmul.f32 %v8805_v49, %v8793_v26  ;;  %v8863_v39 = vmul.f32 %v8851_v23, %v8793_v26  ;;  %v8818_v16 = vmul.f32 %v8806_v62, %v8794_v6  ;;  %v8864_v35 = vmul.f32 %v8852_v1, %v8794_v6 }
 0xc8f   : >> { %v8822_v59 = vadd.f32 %v8821_v25, %v8815_v36  ;;  %v8868_v40 = vadd.f32 %v8867_v27, %v8861_v9  ;;  %v8833_v42 = vadd.f32 %v8832_v41, %v8816_v58  ;;  %v8879_v8 = vadd.f32 %v8878_v60, %v8862_v10 }
 0xc91   : >> { %v8823_v22 = vadd.f32 %v8822_v59, %v8817_v20  ;;  %v8869_v19 = vadd.f32 %v8868_v40, %v8863_v39  ;;  %v8834_v50 = vadd.f32 %v8833_v42, %v8818_v16  ;;  %v8880_v63 = vadd.f32 %v8879_v8, %v8864_v35 }
 0xc93   : >> { %v8870_v18 = vrot.slane %v8869_v19, 4  ;;  %v8881_v61 = vrot.slane %v8880_v63, 4  ;;  %v8824_v46 = vrot.slane %v8823_v22, 4  ;;  %v8835_v51 = vrot.slane %v8834_v50, 4 }
 0xc95   : >> { %v8825_v3 = vadd.f32 %v8824_v46, %v8823_v22  ;;  %v8836_v11 = vadd.f32 %v8835_v51, %v8834_v50  ;;  %v8871_v2 = vadd.f32 %v8870_v18, %v8869_v19  ;;  %v8882_v13 = vadd.f32 %v8881_v61, %v8880_v63 }
 0xc97   : >> { %v8826_v47 = vrot.slane %v8825_v3, 2  ;;  %v8837_v31 = vrot.slane %v8836_v11, 2  ;;  %v8872_v34 = vrot.slane %v8871_v2, 2  ;;  %v8883_v56 = vrot.slane %v8882_v13, 2 }
 0xc99   : >> { %v8827_v54 = vadd.f32 %v8826_v47, %v8825_v3  ;;  %v8838_v38 = vadd.f32 %v8837_v31, %v8836_v11  ;;  %v8873_v0 = vadd.f32 %v8872_v34, %v8871_v2  ;;  %v8884_v28 = vadd.f32 %v8883_v56, %v8882_v13 }
 0xc9b   : >> { %v8828_v37 = vrot.slane %v8827_v54, 1  ;;  %v8839_v15 = vrot.slane %v8838_v38, 1  ;;  %v8874_v52 = vrot.slane %v8873_v0, 1  ;;  %v8885_v45 = vrot.slane %v8884_v28, 1 }
 0xc9d   : >> { %v8829_v24 = vadd.f32 %v8828_v37, %v8827_v54  ;;  %v8840_v25 = vadd.f32 %v8839_v15, %v8838_v38  ;;  %v8875_v27 = vadd.f32 %v8874_v52, %v8873_v0  ;;  %v8886_v53 = vadd.f32 %v8885_v45, %v8884_v28 }
 0xc9f   : >> { %v8887_v30 = vadd.f32 %v8840_v25, %v8829_v24  ;;  %v8890_v14 = vadd.f32 %v8886_v53, %v8875_v27 }
 0xca1   : >> { %8888 = vadd.xlane.f32.xlu0 %v8887_v30 }
 0xca5   : >> { %8891 = vadd.xlane.f32.xlu0 %v8890_v14 }
 0xd2e   : >> { %v8889_v41 = vpop.xlane.xlu0 %8888 }
 0xd2f   : >> { %v8893_v32 = vmul.f32 %v11743_v4, %v8889_v41 }
 0xd32   : >> { %v8892_v60 = vpop.xlane.xlu0 %8891 }
 0xd33   : >> { %v8894_v12 = vmul.f32 %v11745_v5, %v8892_v60  ;;  %635 = sbr.rel (!%p633_p4) target bundleno = 21 (0x15), region = 143 }
 0xd35   : >> { %v8895_v48 = vadd.f32 %v8894_v12, %v8893_v32 }
 0xd37   : >> { %v8897_v57 = vadd.f32 %v8896_v43, %v8895_v48 }
 0xd39   : >> { %8899 = vst [vmem:[%s8898_s1] sm:$0x1] %v8897_v57 }
 0xd3a PF: > { %s29_s0 = sadd.s32 1, %s11620_s0  }
 0xd3b   : > { %p26_p5 = scmp.ge.s32.totalorder %s29_s0, 4  }
 0xd3d   :  { %28 = sbr.rel (!%p26_p5) target bundleno = 5 (0x5), region = 154 }

</bundles_post_ra>
